<compile_context>
chip_gen: v6e
topology: v6e:2x2x1
jax: 0.10.0
libtpu: 0.0.40
codegen_flags: <defaults>
</compile_context>

<pallas_src>
import numpy as np
import jax
import jax.numpy as jnp
from jax import lax
from jax.experimental import pallas as pl
from jax.experimental.pallas import tpu as pltpu

F32 = jnp.float32
BF16 = jnp.bfloat16
HIGHEST = lax.Precision.HIGHEST
EPS_BN = 1e-5
EPS_LN = 1e-5

# Model geometry (LayerNorm(3072) with the (3,1)-kernel conv stack implies a
# 12x12 input per element).
H_IN, W_IN = 12, 12
HW = H_IN * W_IN           # 144
H1 = H_IN - 2              # 10  after conv1 (3,1)
H2 = H1 - 2                # 8   after conv2 (3,1)
HP = H2 // 2               # 4   after AvgPool2d((2,1))
C1, C2 = 32, 64
N1 = H1 * W_IN             # 120 conv1 output rows (channel-last)
N2 = H2 * W_IN             # 96  conv2 output rows
S_POOL = HP * W_IN         # 48  pooled spatial positions
D_FLAT = C2 * S_POOL       # 3072
N_FC1 = 128
N_SPLIT = 2                # fc1 column split: one half per TensorCore on v7x
N_HALF = N_FC1 // N_SPLIT  # 64


# ----------------------------------------------------------------------------
# Kernel 1: fused conv1+BN1+ReLU -> conv2+BN2+ReLU -> AvgPool((2,1))
# Whole batch in ONE grid step (static unroll over B); all intermediates stay
# in VMEM/vregs.
# ----------------------------------------------------------------------------
def conv_stage_kernel(x_ref, w1_ref, sh1_ref, w2_ref, sh2_ref, o_ref):
    # Hoisted broadcasts (emitted once; JAX does not CSE broadcast_in_dim).
    w1 = w1_ref[...]                                   # (3, 32) BN1-folded taps
    w1_0 = jnp.broadcast_to(w1[0:1, :], (N1, C1))
    w1_1 = jnp.broadcast_to(w1[1:2, :], (N1, C1))
    w1_2 = jnp.broadcast_to(w1[2:3, :], (N1, C1))
    sh1 = jnp.broadcast_to(sh1_ref[...], (N1, C1))
    sh2 = jnp.broadcast_to(sh2_ref[...], (N2, C2))
    w2 = w2_ref[...]                                   # (3, 32, 64) BN2-folded

    for b in range(x_ref.shape[0]):                    # static unroll over batch
        # conv1 + BN1 + ReLU on the VPU: one lane-broadcast of the input
        # column, sliced three times for the three H-taps.
        xb = jnp.broadcast_to(x_ref[b], (HW, C1))      # (144, 32)
        y1 = (xb[0:N1] * w1_0
              + xb[W_IN:W_IN + N1] * w1_1
              + xb[2 * W_IN:2 * W_IN + N1] * w1_2
              + sh1)
        y1 = jnp.maximum(y1, 0.0)                      # (120, 32) channel-last
        # Dropout(0.2) is identity in eval/inference mode.

        # conv2 + BN2 + ReLU: three accumulated K=32 MXU matmuls (default
        # precision).
        # TODO(synk): a single K=96 matmul needs a lane-concat of the shifted
        # views; relayout cost ~= the two extra MXU pushes here, so the
        # proven 3-matmul form is kept.
        acc = jnp.dot(y1[0:N2], w2[0], preferred_element_type=jnp.float32)
        acc = acc + jnp.dot(y1[W_IN:W_IN + N2], w2[1],
                            preferred_element_type=jnp.float32)
        acc = acc + jnp.dot(y1[2 * W_IN:2 * W_IN + N2], w2[2],
                            preferred_element_type=jnp.float32)
        y2 = jnp.maximum(acc + sh2, 0.0)               # (96, 64)

        # AvgPool2d((2,1)) as direct sub-block stores (no concatenate).
        for t in range(HP):
            o_ref[b, t * W_IN:(t + 1) * W_IN, :] = 0.5 * (
                y2[(2 * t) * W_IN:(2 * t + 1) * W_IN, :]
                + y2[(2 * t + 1) * W_IN:(2 * t + 2) * W_IN, :])


def conv_stage(xcol, w1_eff, shift1, w2_eff, shift2):
    B = xcol.shape[0]
    return pl.pallas_call(
        conv_stage_kernel,
        grid=(1,),
        out_shape=jax.ShapeDtypeStruct((B, S_POOL, C2), F32),
        in_specs=[
            pl.BlockSpec((B, HW, 1), lambda i: (0, 0, 0)),
            pl.BlockSpec((3, C1), lambda i: (0, 0)),
            pl.BlockSpec((1, C1), lambda i: (0, 0)),
            pl.BlockSpec((3, C1, C2), lambda i: (0, 0, 0)),
            pl.BlockSpec((1, C2), lambda i: (0, 0)),
        ],
        out_specs=pl.BlockSpec((B, S_POOL, C2), lambda i: (0, 0, 0)),
        compiler_params=pltpu.CompilerParams(
            dimension_semantics=("arbitrary",)),
    )(xcol, w1_eff, shift1, w2_eff, shift2)


# ----------------------------------------------------------------------------
# Kernel 2: fused head  LayerNorm(3072) -> fc1 -> ReLU -> (Dropout=id) -> fc2
# LN gamma/beta and the NCHW flatten permutation are pre-folded into G / cb.
# Grid is 2-wide over the fc1 column halves ("parallel": one half per v7x TC);
# each step emits partial logits (+ b2/2) which are summed in the wrapper.
# ----------------------------------------------------------------------------
def head_kernel(x_ref, g_ref, cs_ref, cb_ref, w2_ref, b2h_ref, o_ref):
    x = x_ref[...]                                     # (B, 3072) f32
    inv_d = 1.0 / D_FLAT
    # Two-pass LayerNorm statistics (permutation-invariant).
    mean = jnp.sum(x, axis=-1, keepdims=True) * inv_d
    xc = x - mean
    var = jnp.sum(xc * xc, axis=-1, keepdims=True) * inv_d
    rstd = lax.rsqrt(var + EPS_LN)                     # (B, 1)

    # fc1 half-block with LN folded in.  G is streamed bf16 (HBM-bound);
    # cast the tiny x operand down so the MXU runs a single bf16 pass,
    # accumulation in f32.
    dot = jnp.dot(x.astype(BF16), g_ref[0],
                  preferred_element_type=jnp.float32)  # (B, 64)
    h = rstd * dot - (rstd * mean) * cs_ref[0] + cb_ref[0]
    h = jnp.maximum(h, 0.0)
    # Dropout(0.7) is identity in eval/inference mode.

    # fc2 half-contraction; each half adds b2/N_SPLIT so the summed partials
    # recover the full bias exactly.
    o_ref[0] = (jnp.dot(h.astype(BF16), w2_ref[0],
                        preferred_element_type=jnp.float32)
                + b2h_ref[...])


def head_stage(flat, G, colsum, cb, fcw2, b2frac):
    B = flat.shape[0]
    C = fcw2.shape[-1]
    partials = pl.pallas_call(
        head_kernel,
        grid=(N_SPLIT,),
        out_shape=jax.ShapeDtypeStruct((N_SPLIT, B, C), F32),
        in_specs=[
            pl.BlockSpec((B, D_FLAT), lambda j: (0, 0)),
            pl.BlockSpec((1, D_FLAT, N_HALF), lambda j: (j, 0, 0)),
            pl.BlockSpec((1, 1, N_HALF), lambda j: (j, 0, 0)),
            pl.BlockSpec((1, 1, N_HALF), lambda j: (j, 0, 0)),
            pl.BlockSpec((1, N_HALF, C), lambda j: (j, 0, 0)),
            pl.BlockSpec((1, C), lambda j: (0, 0)),
        ],
        out_specs=pl.BlockSpec((1, B, C), lambda j: (j, 0, 0)),
        compiler_params=pltpu.CompilerParams(
            dimension_semantics=("parallel",)),        # v7x: one fc1 half per TC
    )(flat, G, colsum, cb, fcw2, b2frac)
    return jnp.sum(partials, axis=0)                   # tiny (2,B,C) reduction


# ----------------------------------------------------------------------------
# Parameters (deterministic, synthetic) and one-time host-side folding
# ----------------------------------------------------------------------------
def init_params(key, num_classes=2):
    ks = jax.random.split(key, 18)
    p = {}
    # conv1: Conv2d(1, 32, kernel=(3,1))  -> weight (32,1,3,1) stored as (32,3)
    p['W1'] = 0.2 * jax.random.normal(ks[0], (32, 3), F32)
    p['b1'] = 0.1 * jax.random.normal(ks[1], (32,), F32)
    p['g1'] = 1.0 + 0.1 * jax.random.normal(ks[2], (32,), F32)
    p['be1'] = 0.1 * jax.random.normal(ks[3], (32,), F32)
    p['rm1'] = 0.1 * jax.random.normal(ks[4], (32,), F32)
    p['rv1'] = 0.5 + jnp.abs(jax.random.normal(ks[5], (32,), F32))
    # conv2: Conv2d(32, 64, kernel=(3,1)) -> weight (64,32,3,1) stored as (64,32,3)
    p['W2'] = 0.1 * jax.random.normal(ks[6], (64, 32, 3), F32)
    p['b2'] = 0.1 * jax.random.normal(ks[7], (64,), F32)
    p['g2'] = 1.0 + 0.1 * jax.random.normal(ks[8], (64,), F32)
    p['be2'] = 0.1 * jax.random.normal(ks[9], (64,), F32)
    p['rm2'] = 0.1 * jax.random.normal(ks[10], (64,), F32)
    p['rv2'] = 0.5 + jnp.abs(jax.random.normal(ks[11], (64,), F32))
    # LayerNorm(3072)
    p['ln_g'] = 1.0 + 0.1 * jax.random.normal(ks[12], (3072,), F32)
    p['ln_b'] = 0.1 * jax.random.normal(ks[13], (3072,), F32)
    # fc1: Linear(3072, 128); fc2: Linear(128, num_classes)
    p['fcw1'] = 0.03 * jax.random.normal(ks[14], (3072, 128), F32)
    p['fcb1'] = 0.1 * jax.random.normal(ks[15], (128,), F32)
    p['fcw2'] = 0.1 * jax.random.normal(ks[16], (128, num_classes), F32)
    p['fcb2'] = 0.1 * jax.random.normal(ks[17], (num_classes,), F32)
    return p


def prepare_params(p):
    """One-time host-side folding: BN->conv, LN+flatten-permutation->fc1,
    bf16 cast of the HBM-heavy head weights, fc1-column split for v7x."""
    s1 = p['g1'] / jnp.sqrt(p['rv1'] + EPS_BN)
    s2 = p['g2'] / jnp.sqrt(p['rv2'] + EPS_BN)
    fp = {}
    # conv1: w1_eff[kh, c] = W1[c, kh] * s1[c];  shift folds bias + BN shift.
    fp['w1'] = (p['W1'].T * s1[None, :]).astype(F32)                      # (3, 32)
    fp['sh1'] = (p['b1'] * s1 + p['be1'] - p['rm1'] * s1)[None, :].astype(F32)
    # conv2: w2_eff[kh, ci, co] = W2[co, ci, kh] * s2[co]
    fp['w2'] = (jnp.transpose(p['W2'], (2, 1, 0)) * s2[None, None, :]).astype(F32)
    fp['sh2'] = (p['b2'] * s2 + p['be2'] - p['rm2'] * s2)[None, :].astype(F32)

    # Head: fold LN gamma into fc1 rows; permute rows from NCHW flatten order
    # (i = c*48 + s) to the kernel's channel-last order (j = s*64 + c); then
    # split the 128 fc1 columns into N_SPLIT halves (one per grid step).
    gW = p['ln_g'][:, None] * p['fcw1']                                   # (3072, 128)
    G = gW.reshape(C2, S_POOL, N_FC1).transpose(1, 0, 2).reshape(D_FLAT, N_FC1)
    colsum = jnp.sum(gW, axis=0)                                          # (128,)
    cb = p['fcb1'] + jnp.dot(p['ln_b'], p['fcw1'], precision=HIGHEST)     # (128,)

    def split_cols(a):   # (R, 128) -> (N_SPLIT, R, 64)
        return jnp.stack([a[:, i * N_HALF:(i + 1) * N_HALF]
                          for i in range(N_SPLIT)], axis=0)

    fp['G'] = split_cols(G).astype(BF16)                       # (2, 3072, 64) bf16
    fp['colsum'] = split_cols(colsum[None, :]).astype(F32)     # (2, 1, 64)
    fp['cb'] = split_cols(cb[None, :]).astype(F32)             # (2, 1, 64)
    fp['fcw2'] = jnp.stack([p['fcw2'][i * N_HALF:(i + 1) * N_HALF]
                            for i in range(N_SPLIT)], axis=0).astype(BF16)
    fp['b2frac'] = (p['fcb2'] / N_SPLIT)[None, :].astype(F32)  # (1, C)
    return fp


# ----------------------------------------------------------------------------
# Forward pass: two fused Pallas kernels; only free reshapes in between
# ----------------------------------------------------------------------------
@jax.jit
def forward_pallas(x, fp):
    B = x.shape[0]
    xcol = x.reshape(B, HW, 1)                           # spatial rows, 1 lane
    pooled = conv_stage(xcol, fp['w1'], fp['sh1'], fp['w2'], fp['sh2'])
    flat = pooled.reshape(B, D_FLAT)                     # free row-major reshape;
    # the (s,c)->(c,s) NCHW permutation is baked into fp['G'] rows.
    return head_stage(flat, fp['G'], fp['colsum'], fp['cb'],
                      fp['fcw2'], fp['b2frac'])


# ----------------------------------------------------------------------------
# Independent pure-JAX reference (mirrors the PyTorch module in eval mode)
# ----------------------------------------------------------------------------
def forward_reference(x, p):
    xb = x[:, None, :, :]                                   # (B,1,H,W) NCHW
    w1 = p['W1'][:, None, :, None]                          # (32,1,3,1) OIHW
    y = lax.conv_general_dilated(xb, w1, (1, 1), 'VALID',
                                 dimension_numbers=('NCHW', 'OIHW', 'NCHW'),
                                 precision=HIGHEST)
    y = y + p['b1'][None, :, None, None]
    y = ((y - p['rm1'][None, :, None, None])
         / jnp.sqrt(p['rv1'][None, :, None, None] + EPS_BN)
         * p['g1'][None, :, None, None] + p['be1'][None, :, None, None])
    y = jnp.maximum(y, 0.0)

    w2 = p['W2'][:, :, :, None]                             # (64,32,3,1)
    y = lax.conv_general_dilated(y, w2, (1, 1), 'VALID',
                                 dimension_numbers=('NCHW', 'OIHW', 'NCHW'),
                                 precision=HIGHEST)
    y = y + p['b2'][None, :, None, None]
    y = ((y - p['rm2'][None, :, None, None])
         / jnp.sqrt(p['rv2'][None, :, None, None] + EPS_BN)
         * p['g2'][None, :, None, None] + p['be2'][None, :, None, None])
    y = jnp.maximum(y, 0.0)

    Hh = y.shape[2]
    y = (y[:, :, 0:(Hh // 2) * 2:2, :] + y[:, :, 1:(Hh // 2) * 2:2, :]) * 0.5
    flat = y.reshape(y.shape[0], -1)                        # NCHW flatten

    mean = flat.mean(-1, keepdims=True)
    var = ((flat - mean) ** 2).mean(-1, keepdims=True)
    xn = (flat - mean) / jnp.sqrt(var + EPS_LN) * p['ln_g'] + p['ln_b']
    h = jnp.maximum(jnp.dot(xn, p['fcw1'], precision=HIGHEST) + p['fcb1'], 0.0)
    return jnp.dot(h, p['fcw2'], precision=HIGHEST) + p['fcb2']


if __name__ == "__main__":
    key = jax.random.PRNGKey(0)
    kx, kp = jax.random.split(key)

    # Input (B, H, W) = (2, 12, 12):
    # conv1 -> (2,32,10,12), conv2 -> (2,64,8,12), avgpool -> (2,64,4,12),
    # flatten -> (2, 3072) which matches LayerNorm(3072) / Linear(3072,128).
    x = jax.random.normal(kx, (2, H_IN, W_IN), F32)
    params = init_params(kp, num_classes=2)
    folded = prepare_params(params)        # one-time host-side weight folding

    out = forward_pallas(x, folded)
    out = jax.block_until_ready(out)
    assert out.shape == (2, 2)

    ref = forward_reference(x, params)
    # Accuracy contract: kernels use default (bf16-pass) MXU precision and
    # bf16-stored head weights; reference runs at HIGHEST, hence the loose
    # tolerance (estimated kernel error ~1e-2 on O(1) logits).
    np.testing.assert_allclose(np.asarray(out), np.asarray(ref),
                               rtol=5e-2, atol=5e-2)
    print("KERNEL_OK")
</pallas_src>

<mosaic_0001>
module attributes {stable_mosaic.version = 11 : i64} {
  func.func @conv_stage_kernel(%arg0: i32, %arg1: memref<2x144x1xf32, #tpu.memory_space<vmem>>, %arg2: memref<3x32xf32, #tpu.memory_space<vmem>>, %arg3: memref<1x32xf32, #tpu.memory_space<vmem>>, %arg4: memref<3x32x64xf32, #tpu.memory_space<vmem>>, %arg5: memref<1x64xf32, #tpu.memory_space<vmem>>, %arg6: memref<2x48x64xf32, #tpu.memory_space<vmem>>) attributes {dimension_semantics = [#tpu.dimension_semantics<arbitrary>], iteration_bounds = array<i64: 1>, scalar_prefetch = 0 : i64, scratch_operands = 0 : i64, tpu.core_type = #tpu.core_type<tc>, window_params = [{pipeline_mode = #tpu.pipeline_mode<synchronous>, transform_indices = @transform_0, window_bounds = array<i64: 2, 144, 1>}, {pipeline_mode = #tpu.pipeline_mode<synchronous>, transform_indices = @transform_1, window_bounds = array<i64: 3, 32>}, {pipeline_mode = #tpu.pipeline_mode<synchronous>, transform_indices = @transform_2, window_bounds = array<i64: 1, 32>}, {pipeline_mode = #tpu.pipeline_mode<synchronous>, transform_indices = @transform_3, window_bounds = array<i64: 3, 32, 64>}, {pipeline_mode = #tpu.pipeline_mode<synchronous>, transform_indices = @transform_4, window_bounds = array<i64: 1, 64>}, {pipeline_mode = #tpu.pipeline_mode<synchronous>, transform_indices = @transform_5, window_bounds = array<i64: 2, 48, 64>}]} {
    %c0 = arith.constant 0 : index
    %c0_0 = arith.constant 0 : index
    %0 = vector.load %arg2[%c0, %c0_0] : memref<3x32xf32, #tpu.memory_space<vmem>>, vector<3x32xf32>
    %1 = vector.extract_strided_slice %0 {offsets = [0, 0], sizes = [1, 32], strides = [1, 1]} : vector<3x32xf32> to vector<1x32xf32>
    %2 = vector.shape_cast %1 : vector<1x32xf32> to vector<1x32xf32>
    %3 = vector.broadcast %2 : vector<1x32xf32> to vector<120x32xf32>
    %4 = vector.extract_strided_slice %0 {offsets = [1, 0], sizes = [1, 32], strides = [1, 1]} : vector<3x32xf32> to vector<1x32xf32>
    %5 = vector.shape_cast %4 : vector<1x32xf32> to vector<1x32xf32>
    %6 = vector.broadcast %5 : vector<1x32xf32> to vector<120x32xf32>
    %7 = vector.extract_strided_slice %0 {offsets = [2, 0], sizes = [1, 32], strides = [1, 1]} : vector<3x32xf32> to vector<1x32xf32>
    %8 = vector.shape_cast %7 : vector<1x32xf32> to vector<1x32xf32>
    %9 = vector.broadcast %8 : vector<1x32xf32> to vector<120x32xf32>
    %c0_1 = arith.constant 0 : index
    %c0_2 = arith.constant 0 : index
    %10 = vector.load %arg3[%c0_1, %c0_2] : memref<1x32xf32, #tpu.memory_space<vmem>>, vector<1x32xf32>
    %11 = vector.shape_cast %10 : vector<1x32xf32> to vector<1x32xf32>
    %12 = vector.broadcast %11 : vector<1x32xf32> to vector<120x32xf32>
    %c0_3 = arith.constant 0 : index
    %c0_4 = arith.constant 0 : index
    %13 = vector.load %arg5[%c0_3, %c0_4] : memref<1x64xf32, #tpu.memory_space<vmem>>, vector<1x64xf32>
    %14 = vector.shape_cast %13 : vector<1x64xf32> to vector<1x64xf32>
    %15 = vector.broadcast %14 : vector<1x64xf32> to vector<96x64xf32>
    %c0_5 = arith.constant 0 : index
    %c0_6 = arith.constant 0 : index
    %c0_7 = arith.constant 0 : index
    %16 = vector.load %arg4[%c0_5, %c0_6, %c0_7] : memref<3x32x64xf32, #tpu.memory_space<vmem>>, vector<3x32x64xf32>
    %c0_8 = arith.constant 0 : index
    %c0_9 = arith.constant 0 : index
    %c0_10 = arith.constant 0 : index
    %17 = vector.load %arg1[%c0_8, %c0_9, %c0_10] : memref<2x144x1xf32, #tpu.memory_space<vmem>>, vector<1x144x1xf32>
    %18 = vector.shape_cast %17 : vector<1x144x1xf32> to vector<144x1xf32>
    %19 = vector.shape_cast %18 : vector<144x1xf32> to vector<144x1xf32>
    %20 = vector.broadcast %19 : vector<144x1xf32> to vector<144x32xf32>
    %21 = vector.extract_strided_slice %20 {offsets = [0, 0], sizes = [120, 32], strides = [1, 1]} : vector<144x32xf32> to vector<120x32xf32>
    %22 = arith.mulf %21, %3 : vector<120x32xf32>
    %23 = vector.extract_strided_slice %20 {offsets = [12, 0], sizes = [120, 32], strides = [1, 1]} : vector<144x32xf32> to vector<120x32xf32>
    %24 = arith.mulf %23, %6 : vector<120x32xf32>
    %25 = arith.addf %22, %24 : vector<120x32xf32>
    %26 = vector.extract_strided_slice %20 {offsets = [24, 0], sizes = [120, 32], strides = [1, 1]} : vector<144x32xf32> to vector<120x32xf32>
    %27 = arith.mulf %26, %9 : vector<120x32xf32>
    %28 = arith.addf %25, %27 : vector<120x32xf32>
    %29 = arith.addf %28, %12 : vector<120x32xf32>
    %cst = arith.constant 0.000000e+00 : f32
    %30 = vector.broadcast %cst : f32 to vector<120x32xf32>
    %31 = arith.maximumf %29, %30 : vector<120x32xf32>
    %32 = vector.extract_strided_slice %31 {offsets = [0, 0], sizes = [96, 32], strides = [1, 1]} : vector<120x32xf32> to vector<96x32xf32>
    %33 = vector.extract_strided_slice %16 {offsets = [0, 0, 0], sizes = [1, 32, 64], strides = [1, 1, 1]} : vector<3x32x64xf32> to vector<1x32x64xf32>
    %34 = vector.shape_cast %33 : vector<1x32x64xf32> to vector<32x64xf32>
    %cst_11 = arith.constant dense<0.000000e+00> : vector<96x64xf32>
    %35 = tpu.matmul %32, %34, %cst_11 {dimension_numbers = #tpu.dot_dimension_numbers<[1], [0], [0], [1], [0, 0, 1, 1], [], []>} : vector<96x32xf32>, vector<32x64xf32>, vector<96x64xf32> -> vector<96x64xf32>
    %36 = vector.extract_strided_slice %31 {offsets = [12, 0], sizes = [96, 32], strides = [1, 1]} : vector<120x32xf32> to vector<96x32xf32>
    %37 = vector.extract_strided_slice %16 {offsets = [1, 0, 0], sizes = [1, 32, 64], strides = [1, 1, 1]} : vector<3x32x64xf32> to vector<1x32x64xf32>
    %38 = vector.shape_cast %37 : vector<1x32x64xf32> to vector<32x64xf32>
    %cst_12 = arith.constant dense<0.000000e+00> : vector<96x64xf32>
    %39 = tpu.matmul %36, %38, %cst_12 {dimension_numbers = #tpu.dot_dimension_numbers<[1], [0], [0], [1], [0, 0, 1, 1], [], []>} : vector<96x32xf32>, vector<32x64xf32>, vector<96x64xf32> -> vector<96x64xf32>
    %40 = arith.addf %35, %39 : vector<96x64xf32>
    %41 = vector.extract_strided_slice %31 {offsets = [24, 0], sizes = [96, 32], strides = [1, 1]} : vector<120x32xf32> to vector<96x32xf32>
    %42 = vector.extract_strided_slice %16 {offsets = [2, 0, 0], sizes = [1, 32, 64], strides = [1, 1, 1]} : vector<3x32x64xf32> to vector<1x32x64xf32>
    %43 = vector.shape_cast %42 : vector<1x32x64xf32> to vector<32x64xf32>
    %cst_13 = arith.constant dense<0.000000e+00> : vector<96x64xf32>
    %44 = tpu.matmul %41, %43, %cst_13 {dimension_numbers = #tpu.dot_dimension_numbers<[1], [0], [0], [1], [0, 0, 1, 1], [], []>} : vector<96x32xf32>, vector<32x64xf32>, vector<96x64xf32> -> vector<96x64xf32>
    %45 = arith.addf %40, %44 : vector<96x64xf32>
    %46 = arith.addf %45, %15 : vector<96x64xf32>
    %cst_14 = arith.constant 0.000000e+00 : f32
    %47 = vector.broadcast %cst_14 : f32 to vector<96x64xf32>
    %48 = arith.maximumf %46, %47 : vector<96x64xf32>
    %49 = vector.extract_strided_slice %48 {offsets = [0, 0], sizes = [12, 64], strides = [1, 1]} : vector<96x64xf32> to vector<12x64xf32>
    %50 = vector.extract_strided_slice %48 {offsets = [12, 0], sizes = [12, 64], strides = [1, 1]} : vector<96x64xf32> to vector<12x64xf32>
    %51 = arith.addf %49, %50 : vector<12x64xf32>
    %cst_15 = arith.constant 5.000000e-01 : f32
    %52 = vector.broadcast %cst_15 : f32 to vector<12x64xf32>
    %53 = arith.mulf %52, %51 : vector<12x64xf32>
    %c0_16 = arith.constant 0 : index
    %c0_17 = arith.constant 0 : index
    %c0_18 = arith.constant 0 : index
    %54 = vector.load %arg6[%c0_16, %c0_17, %c0_18] : memref<2x48x64xf32, #tpu.memory_space<vmem>>, vector<1x12x64xf32>
    %55 = vector.shape_cast %54 : vector<1x12x64xf32> to vector<12x64xf32>
    %56 = vector.shape_cast %53 : vector<12x64xf32> to vector<1x12x64xf32>
    tpu.vector_store %arg6[%c0_16, %c0_17, %c0_18], %56 {strides = array<i32>} : memref<2x48x64xf32, #tpu.memory_space<vmem>>, vector<1x12x64xf32>,
    %57 = vector.extract_strided_slice %48 {offsets = [24, 0], sizes = [12, 64], strides = [1, 1]} : vector<96x64xf32> to vector<12x64xf32>
    %58 = vector.extract_strided_slice %48 {offsets = [36, 0], sizes = [12, 64], strides = [1, 1]} : vector<96x64xf32> to vector<12x64xf32>
    %59 = arith.addf %57, %58 : vector<12x64xf32>
    %cst_19 = arith.constant 5.000000e-01 : f32
    %60 = vector.broadcast %cst_19 : f32 to vector<12x64xf32>
    %61 = arith.mulf %60, %59 : vector<12x64xf32>
    %c0_20 = arith.constant 0 : index
    %c12 = arith.constant 12 : index
    %c0_21 = arith.constant 0 : index
    %62 = vector.load %arg6[%c0_20, %c12, %c0_21] : memref<2x48x64xf32, #tpu.memory_space<vmem>>, vector<1x12x64xf32>
    %63 = vector.shape_cast %62 : vector<1x12x64xf32> to vector<12x64xf32>
    %64 = vector.shape_cast %61 : vector<12x64xf32> to vector<1x12x64xf32>
    tpu.vector_store %arg6[%c0_20, %c12, %c0_21], %64 {strides = array<i32>} : memref<2x48x64xf32, #tpu.memory_space<vmem>>, vector<1x12x64xf32>,
    %65 = vector.extract_strided_slice %48 {offsets = [48, 0], sizes = [12, 64], strides = [1, 1]} : vector<96x64xf32> to vector<12x64xf32>
    %66 = vector.extract_strided_slice %48 {offsets = [60, 0], sizes = [12, 64], strides = [1, 1]} : vector<96x64xf32> to vector<12x64xf32>
    %67 = arith.addf %65, %66 : vector<12x64xf32>
    %cst_22 = arith.constant 5.000000e-01 : f32
    %68 = vector.broadcast %cst_22 : f32 to vector<12x64xf32>
    %69 = arith.mulf %68, %67 : vector<12x64xf32>
    %c0_23 = arith.constant 0 : index
    %c24 = arith.constant 24 : index
    %c0_24 = arith.constant 0 : index
    %70 = vector.load %arg6[%c0_23, %c24, %c0_24] : memref<2x48x64xf32, #tpu.memory_space<vmem>>, vector<1x12x64xf32>
    %71 = vector.shape_cast %70 : vector<1x12x64xf32> to vector<12x64xf32>
    %72 = vector.shape_cast %69 : vector<12x64xf32> to vector<1x12x64xf32>
    tpu.vector_store %arg6[%c0_23, %c24, %c0_24], %72 {strides = array<i32>} : memref<2x48x64xf32, #tpu.memory_space<vmem>>, vector<1x12x64xf32>,
    %73 = vector.extract_strided_slice %48 {offsets = [72, 0], sizes = [12, 64], strides = [1, 1]} : vector<96x64xf32> to vector<12x64xf32>
    %74 = vector.extract_strided_slice %48 {offsets = [84, 0], sizes = [12, 64], strides = [1, 1]} : vector<96x64xf32> to vector<12x64xf32>
    %75 = arith.addf %73, %74 : vector<12x64xf32>
    %cst_25 = arith.constant 5.000000e-01 : f32
    %76 = vector.broadcast %cst_25 : f32 to vector<12x64xf32>
    %77 = arith.mulf %76, %75 : vector<12x64xf32>
    %c0_26 = arith.constant 0 : index
    %c36 = arith.constant 36 : index
    %c0_27 = arith.constant 0 : index
    %78 = vector.load %arg6[%c0_26, %c36, %c0_27] : memref<2x48x64xf32, #tpu.memory_space<vmem>>, vector<1x12x64xf32>
    %79 = vector.shape_cast %78 : vector<1x12x64xf32> to vector<12x64xf32>
    %80 = vector.shape_cast %77 : vector<12x64xf32> to vector<1x12x64xf32>
    tpu.vector_store %arg6[%c0_26, %c36, %c0_27], %80 {strides = array<i32>} : memref<2x48x64xf32, #tpu.memory_space<vmem>>, vector<1x12x64xf32>,
    %c1 = arith.constant 1 : index
    %c0_28 = arith.constant 0 : index
    %c0_29 = arith.constant 0 : index
    %81 = vector.load %arg1[%c1, %c0_28, %c0_29] : memref<2x144x1xf32, #tpu.memory_space<vmem>>, vector<1x144x1xf32>
    %82 = vector.shape_cast %81 : vector<1x144x1xf32> to vector<144x1xf32>
    %83 = vector.shape_cast %82 : vector<144x1xf32> to vector<144x1xf32>
    %84 = vector.broadcast %83 : vector<144x1xf32> to vector<144x32xf32>
    %85 = vector.extract_strided_slice %84 {offsets = [0, 0], sizes = [120, 32], strides = [1, 1]} : vector<144x32xf32> to vector<120x32xf32>
    %86 = arith.mulf %85, %3 : vector<120x32xf32>
    %87 = vector.extract_strided_slice %84 {offsets = [12, 0], sizes = [120, 32], strides = [1, 1]} : vector<144x32xf32> to vector<120x32xf32>
    %88 = arith.mulf %87, %6 : vector<120x32xf32>
    %89 = arith.addf %86, %88 : vector<120x32xf32>
    %90 = vector.extract_strided_slice %84 {offsets = [24, 0], sizes = [120, 32], strides = [1, 1]} : vector<144x32xf32> to vector<120x32xf32>
    %91 = arith.mulf %90, %9 : vector<120x32xf32>
    %92 = arith.addf %89, %91 : vector<120x32xf32>
    %93 = arith.addf %92, %12 : vector<120x32xf32>
    %cst_30 = arith.constant 0.000000e+00 : f32
    %94 = vector.broadcast %cst_30 : f32 to vector<120x32xf32>
    %95 = arith.maximumf %93, %94 : vector<120x32xf32>
    %96 = vector.extract_strided_slice %95 {offsets = [0, 0], sizes = [96, 32], strides = [1, 1]} : vector<120x32xf32> to vector<96x32xf32>
    %97 = vector.extract_strided_slice %16 {offsets = [0, 0, 0], sizes = [1, 32, 64], strides = [1, 1, 1]} : vector<3x32x64xf32> to vector<1x32x64xf32>
    %98 = vector.shape_cast %97 : vector<1x32x64xf32> to vector<32x64xf32>
    %cst_31 = arith.constant dense<0.000000e+00> : vector<96x64xf32>
    %99 = tpu.matmul %96, %98, %cst_31 {dimension_numbers = #tpu.dot_dimension_numbers<[1], [0], [0], [1], [0, 0, 1, 1], [], []>} : vector<96x32xf32>, vector<32x64xf32>, vector<96x64xf32> -> vector<96x64xf32>
    %100 = vector.extract_strided_slice %95 {offsets = [12, 0], sizes = [96, 32], strides = [1, 1]} : vector<120x32xf32> to vector<96x32xf32>
    %101 = vector.extract_strided_slice %16 {offsets = [1, 0, 0], sizes = [1, 32, 64], strides = [1, 1, 1]} : vector<3x32x64xf32> to vector<1x32x64xf32>
    %102 = vector.shape_cast %101 : vector<1x32x64xf32> to vector<32x64xf32>
    %cst_32 = arith.constant dense<0.000000e+00> : vector<96x64xf32>
    %103 = tpu.matmul %100, %102, %cst_32 {dimension_numbers = #tpu.dot_dimension_numbers<[1], [0], [0], [1], [0, 0, 1, 1], [], []>} : vector<96x32xf32>, vector<32x64xf32>, vector<96x64xf32> -> vector<96x64xf32>
    %104 = arith.addf %99, %103 : vector<96x64xf32>
    %105 = vector.extract_strided_slice %95 {offsets = [24, 0], sizes = [96, 32], strides = [1, 1]} : vector<120x32xf32> to vector<96x32xf32>
    %106 = vector.extract_strided_slice %16 {offsets = [2, 0, 0], sizes = [1, 32, 64], strides = [1, 1, 1]} : vector<3x32x64xf32> to vector<1x32x64xf32>
    %107 = vector.shape_cast %106 : vector<1x32x64xf32> to vector<32x64xf32>
    %cst_33 = arith.constant dense<0.000000e+00> : vector<96x64xf32>
    %108 = tpu.matmul %105, %107, %cst_33 {dimension_numbers = #tpu.dot_dimension_numbers<[1], [0], [0], [1], [0, 0, 1, 1], [], []>} : vector<96x32xf32>, vector<32x64xf32>, vector<96x64xf32> -> vector<96x64xf32>
    %109 = arith.addf %104, %108 : vector<96x64xf32>
    %110 = arith.addf %109, %15 : vector<96x64xf32>
    %cst_34 = arith.constant 0.000000e+00 : f32
    %111 = vector.broadcast %cst_34 : f32 to vector<96x64xf32>
    %112 = arith.maximumf %110, %111 : vector<96x64xf32>
    %113 = vector.extract_strided_slice %112 {offsets = [0, 0], sizes = [12, 64], strides = [1, 1]} : vector<96x64xf32> to vector<12x64xf32>
    %114 = vector.extract_strided_slice %112 {offsets = [12, 0], sizes = [12, 64], strides = [1, 1]} : vector<96x64xf32> to vector<12x64xf32>
    %115 = arith.addf %113, %114 : vector<12x64xf32>
    %cst_35 = arith.constant 5.000000e-01 : f32
    %116 = vector.broadcast %cst_35 : f32 to vector<12x64xf32>
    %117 = arith.mulf %116, %115 : vector<12x64xf32>
    %c1_36 = arith.constant 1 : index
    %c0_37 = arith.constant 0 : index
    %c0_38 = arith.constant 0 : index
    %118 = vector.load %arg6[%c1_36, %c0_37, %c0_38] : memref<2x48x64xf32, #tpu.memory_space<vmem>>, vector<1x12x64xf32>
    %119 = vector.shape_cast %118 : vector<1x12x64xf32> to vector<12x64xf32>
    %120 = vector.shape_cast %117 : vector<12x64xf32> to vector<1x12x64xf32>
    tpu.vector_store %arg6[%c1_36, %c0_37, %c0_38], %120 {strides = array<i32>} : memref<2x48x64xf32, #tpu.memory_space<vmem>>, vector<1x12x64xf32>,
    %121 = vector.extract_strided_slice %112 {offsets = [24, 0], sizes = [12, 64], strides = [1, 1]} : vector<96x64xf32> to vector<12x64xf32>
    %122 = vector.extract_strided_slice %112 {offsets = [36, 0], sizes = [12, 64], strides = [1, 1]} : vector<96x64xf32> to vector<12x64xf32>
    %123 = arith.addf %121, %122 : vector<12x64xf32>
    %cst_39 = arith.constant 5.000000e-01 : f32
    %124 = vector.broadcast %cst_39 : f32 to vector<12x64xf32>
    %125 = arith.mulf %124, %123 : vector<12x64xf32>
    %c1_40 = arith.constant 1 : index
    %c12_41 = arith.constant 12 : index
    %c0_42 = arith.constant 0 : index
    %126 = vector.load %arg6[%c1_40, %c12_41, %c0_42] : memref<2x48x64xf32, #tpu.memory_space<vmem>>, vector<1x12x64xf32>
    %127 = vector.shape_cast %126 : vector<1x12x64xf32> to vector<12x64xf32>
    %128 = vector.shape_cast %125 : vector<12x64xf32> to vector<1x12x64xf32>
    tpu.vector_store %arg6[%c1_40, %c12_41, %c0_42], %128 {strides = array<i32>} : memref<2x48x64xf32, #tpu.memory_space<vmem>>, vector<1x12x64xf32>,
    %129 = vector.extract_strided_slice %112 {offsets = [48, 0], sizes = [12, 64], strides = [1, 1]} : vector<96x64xf32> to vector<12x64xf32>
    %130 = vector.extract_strided_slice %112 {offsets = [60, 0], sizes = [12, 64], strides = [1, 1]} : vector<96x64xf32> to vector<12x64xf32>
    %131 = arith.addf %129, %130 : vector<12x64xf32>
    %cst_43 = arith.constant 5.000000e-01 : f32
    %132 = vector.broadcast %cst_43 : f32 to vector<12x64xf32>
    %133 = arith.mulf %132, %131 : vector<12x64xf32>
    %c1_44 = arith.constant 1 : index
    %c24_45 = arith.constant 24 : index
    %c0_46 = arith.constant 0 : index
    %134 = vector.load %arg6[%c1_44, %c24_45, %c0_46] : memref<2x48x64xf32, #tpu.memory_space<vmem>>, vector<1x12x64xf32>
    %135 = vector.shape_cast %134 : vector<1x12x64xf32> to vector<12x64xf32>
    %136 = vector.shape_cast %133 : vector<12x64xf32> to vector<1x12x64xf32>
    tpu.vector_store %arg6[%c1_44, %c24_45, %c0_46], %136 {strides = array<i32>} : memref<2x48x64xf32, #tpu.memory_space<vmem>>, vector<1x12x64xf32>,
    %137 = vector.extract_strided_slice %112 {offsets = [72, 0], sizes = [12, 64], strides = [1, 1]} : vector<96x64xf32> to vector<12x64xf32>
    %138 = vector.extract_strided_slice %112 {offsets = [84, 0], sizes = [12, 64], strides = [1, 1]} : vector<96x64xf32> to vector<12x64xf32>
    %139 = arith.addf %137, %138 : vector<12x64xf32>
    %cst_47 = arith.constant 5.000000e-01 : f32
    %140 = vector.broadcast %cst_47 : f32 to vector<12x64xf32>
    %141 = arith.mulf %140, %139 : vector<12x64xf32>
    %c1_48 = arith.constant 1 : index
    %c36_49 = arith.constant 36 : index
    %c0_50 = arith.constant 0 : index
    %142 = vector.load %arg6[%c1_48, %c36_49, %c0_50] : memref<2x48x64xf32, #tpu.memory_space<vmem>>, vector<1x12x64xf32>
    %143 = vector.shape_cast %142 : vector<1x12x64xf32> to vector<12x64xf32>
    %144 = vector.shape_cast %141 : vector<12x64xf32> to vector<1x12x64xf32>
    tpu.vector_store %arg6[%c1_48, %c36_49, %c0_50], %144 {strides = array<i32>} : memref<2x48x64xf32, #tpu.memory_space<vmem>>, vector<1x12x64xf32>,
    return
  }
  func.func @transform_0(%arg0: i32) -> (i32, i32, i32) {
    %c0_i32 = arith.constant 0 : i32
    %c0_i32_0 = arith.constant 0 : i32
    %c0_i32_1 = arith.constant 0 : i32
    %c0_i32_2 = arith.constant 0 : i32
    return %c0_i32, %c0_i32_0, %c0_i32_1 : i32, i32, i32
  }
  func.func @transform_1(%arg0: i32) -> (i32, i32) {
    %c0_i32 = arith.constant 0 : i32
    %c0_i32_0 = arith.constant 0 : i32
    %c0_i32_1 = arith.constant 0 : i32
    return %c0_i32, %c0_i32_0 : i32, i32
  }
  func.func @transform_2(%arg0: i32) -> (i32, i32) {
    %c0_i32 = arith.constant 0 : i32
    %c0_i32_0 = arith.constant 0 : i32
    %c0_i32_1 = arith.constant 0 : i32
    return %c0_i32, %c0_i32_0 : i32, i32
  }
  func.func @transform_3(%arg0: i32) -> (i32, i32, i32) {
    %c0_i32 = arith.constant 0 : i32
    %c0_i32_0 = arith.constant 0 : i32
    %c0_i32_1 = arith.constant 0 : i32
    %c0_i32_2 = arith.constant 0 : i32
    return %c0_i32, %c0_i32_0, %c0_i32_1 : i32, i32, i32
  }
  func.func @transform_4(%arg0: i32) -> (i32, i32) {
    %c0_i32 = arith.constant 0 : i32
    %c0_i32_0 = arith.constant 0 : i32
    %c0_i32_1 = arith.constant 0 : i32
    return %c0_i32, %c0_i32_0 : i32, i32
  }
  func.func @transform_5(%arg0: i32) -> (i32, i32, i32) {
    %c0_i32 = arith.constant 0 : i32
    %c0_i32_0 = arith.constant 0 : i32
    %c0_i32_1 = arith.constant 0 : i32
    %c0_i32_2 = arith.constant 0 : i32
    return %c0_i32, %c0_i32_0, %c0_i32_1 : i32, i32, i32
  }
}

module attributes {stable_mosaic.version = 11 : i64} {
  func.func @head_kernel(%arg0: i32, %arg1: memref<2x3072xf32, #tpu.memory_space<vmem>>, %arg2: memref<1x3072x64xbf16, #tpu.memory_space<vmem>>, %arg3: memref<1x1x64xf32, #tpu.memory_space<vmem>>, %arg4: memref<1x1x64xf32, #tpu.memory_space<vmem>>, %arg5: memref<1x64x2xbf16, #tpu.memory_space<vmem>>, %arg6: memref<1x2xf32, #tpu.memory_space<vmem>>, %arg7: memref<1x2x2xf32, #tpu.memory_space<vmem>>) attributes {dimension_semantics = [#tpu.dimension_semantics<parallel>], iteration_bounds = array<i64: 2>, scalar_prefetch = 0 : i64, scratch_operands = 0 : i64, tpu.core_type = #tpu.core_type<tc>, window_params = [{pipeline_mode = #tpu.pipeline_mode<synchronous>, transform_indices = @transform_0, window_bounds = array<i64: 2, 3072>}, {transform_indices = @transform_1, window_bounds = array<i64: 1, 3072, 64>}, {transform_indices = @transform_2, window_bounds = array<i64: 1, 1, 64>}, {transform_indices = @transform_3, window_bounds = array<i64: 1, 1, 64>}, {transform_indices = @transform_4, window_bounds = array<i64: 1, 64, 2>}, {pipeline_mode = #tpu.pipeline_mode<synchronous>, transform_indices = @transform_5, window_bounds = array<i64: 1, 2>}, {transform_indices = @transform_6, window_bounds = array<i64: 1, 2, 2>}]} {
    %c0 = arith.constant 0 : index
    %c0_0 = arith.constant 0 : index
    %0 = vector.load %arg1[%c0, %c0_0] : memref<2x3072xf32, #tpu.memory_space<vmem>>, vector<2x3072xf32>
    %cst = arith.constant dense<0.000000e+00> : vector<2xf32>
    %1 = vector.multi_reduction <add>, %0, %cst [1] : vector<2x3072xf32> to vector<2xf32>
    %2 = vector.shape_cast %1 : vector<2xf32> to vector<2x1xf32>
    %cst_1 = arith.constant 3.25520843E-4 : f32
    %3 = vector.broadcast %cst_1 : f32 to vector<2x1xf32>
    %4 = arith.mulf %2, %3 : vector<2x1xf32>
    %5 = vector.broadcast %4 : vector<2x1xf32> to vector<2x3072xf32>
    %6 = arith.subf %0, %5 : vector<2x3072xf32>
    %7 = arith.mulf %6, %6 : vector<2x3072xf32>
    %cst_2 = arith.constant dense<0.000000e+00> : vector<2xf32>
    %8 = vector.multi_reduction <add>, %7, %cst_2 [1] : vector<2x3072xf32> to vector<2xf32>
    %9 = vector.shape_cast %8 : vector<2xf32> to vector<2x1xf32>
    %cst_3 = arith.constant 3.25520843E-4 : f32
    %10 = vector.broadcast %cst_3 : f32 to vector<2x1xf32>
    %11 = arith.mulf %9, %10 : vector<2x1xf32>
    %cst_4 = arith.constant 9.99999974E-6 : f32
    %12 = vector.broadcast %cst_4 : f32 to vector<2x1xf32>
    %13 = arith.addf %11, %12 : vector<2x1xf32>
    %14 = math.rsqrt %13 : vector<2x1xf32>
    %15 = arith.truncf %0 : vector<2x3072xf32> to vector<2x3072xbf16>
    %c0_5 = arith.constant 0 : index
    %c0_6 = arith.constant 0 : index
    %c0_7 = arith.constant 0 : index
    %16 = vector.load %arg2[%c0_5, %c0_6, %c0_7] : memref<1x3072x64xbf16, #tpu.memory_space<vmem>>, vector<1x3072x64xbf16>
    %17 = vector.shape_cast %16 : vector<1x3072x64xbf16> to vector<3072x64xbf16>
    %cst_8 = arith.constant dense<0.000000e+00> : vector<2x64xf32>
    %18 = tpu.matmul %15, %17, %cst_8 {dimension_numbers = #tpu.dot_dimension_numbers<[1], [0], [0], [1], [0, 0, 1, 1], [], []>} : vector<2x3072xbf16>, vector<3072x64xbf16>, vector<2x64xf32> -> vector<2x64xf32>
    %19 = vector.broadcast %14 : vector<2x1xf32> to vector<2x64xf32>
    %20 = arith.mulf %19, %18 : vector<2x64xf32>
    %21 = arith.mulf %14, %4 : vector<2x1xf32>
    %c0_9 = arith.constant 0 : index
    %c0_10 = arith.constant 0 : index
    %c0_11 = arith.constant 0 : index
    %22 = vector.load %arg3[%c0_9, %c0_10, %c0_11] : memref<1x1x64xf32, #tpu.memory_space<vmem>>, vector<1x1x64xf32>
    %23 = vector.shape_cast %22 : vector<1x1x64xf32> to vector<1x64xf32>
    %24 = vector.broadcast %21 : vector<2x1xf32> to vector<2x64xf32>
    %25 = vector.broadcast %23 : vector<1x64xf32> to vector<2x64xf32>
    %26 = arith.mulf %24, %25 : vector<2x64xf32>
    %27 = arith.subf %20, %26 : vector<2x64xf32>
    %c0_12 = arith.constant 0 : index
    %c0_13 = arith.constant 0 : index
    %c0_14 = arith.constant 0 : index
    %28 = vector.load %arg4[%c0_12, %c0_13, %c0_14] : memref<1x1x64xf32, #tpu.memory_space<vmem>>, vector<1x1x64xf32>
    %29 = vector.shape_cast %28 : vector<1x1x64xf32> to vector<1x64xf32>
    %30 = vector.broadcast %29 : vector<1x64xf32> to vector<2x64xf32>
    %31 = arith.addf %27, %30 : vector<2x64xf32>
    %cst_15 = arith.constant 0.000000e+00 : f32
    %32 = vector.broadcast %cst_15 : f32 to vector<2x64xf32>
    %33 = arith.maximumf %31, %32 : vector<2x64xf32>
    %34 = arith.truncf %33 : vector<2x64xf32> to vector<2x64xbf16>
    %c0_16 = arith.constant 0 : index
    %c0_17 = arith.constant 0 : index
    %c0_18 = arith.constant 0 : index
    %35 = vector.load %arg5[%c0_16, %c0_17, %c0_18] : memref<1x64x2xbf16, #tpu.memory_space<vmem>>, vector<1x64x2xbf16>
    %36 = vector.shape_cast %35 : vector<1x64x2xbf16> to vector<64x2xbf16>
    %cst_19 = arith.constant dense<0.000000e+00> : vector<2x2xf32>
    %37 = tpu.matmul %34, %36, %cst_19 {dimension_numbers = #tpu.dot_dimension_numbers<[1], [0], [0], [1], [0, 0, 1, 1], [], []>} : vector<2x64xbf16>, vector<64x2xbf16>, vector<2x2xf32> -> vector<2x2xf32>
    %c0_20 = arith.constant 0 : index
    %c0_21 = arith.constant 0 : index
    %38 = vector.load %arg6[%c0_20, %c0_21] : memref<1x2xf32, #tpu.memory_space<vmem>>, vector<1x2xf32>
    %39 = vector.broadcast %38 : vector<1x2xf32> to vector<2x2xf32>
    %40 = arith.addf %37, %39 : vector<2x2xf32>
    %c0_22 = arith.constant 0 : index
    %c0_23 = arith.constant 0 : index
    %c0_24 = arith.constant 0 : index
    %41 = vector.load %arg7[%c0_22, %c0_23, %c0_24] : memref<1x2x2xf32, #tpu.memory_space<vmem>>, vector<1x2x2xf32>
    %42 = vector.shape_cast %41 : vector<1x2x2xf32> to vector<2x2xf32>
    %43 = vector.shape_cast %40 : vector<2x2xf32> to vector<1x2x2xf32>
    tpu.vector_store %arg7[%c0_22, %c0_23, %c0_24], %43 {strides = array<i32>} : memref<1x2x2xf32, #tpu.memory_space<vmem>>, vector<1x2x2xf32>,
    return
  }
  func.func @transform_0(%arg0: i32) -> (i32, i32) {
    %c0_i32 = arith.constant 0 : i32
    %c0_i32_0 = arith.constant 0 : i32
    %c0_i32_1 = arith.constant 0 : i32
    return %c0_i32, %c0_i32_0 : i32, i32
  }
  func.func @transform_1(%arg0: i32) -> (i32, i32, i32) {
    %c0_i32 = arith.constant 0 : i32
    %c0_i32_0 = arith.constant 0 : i32
    %c0_i32_1 = arith.constant 0 : i32
    return %arg0, %c0_i32, %c0_i32_0 : i32, i32, i32
  }
  func.func @transform_2(%arg0: i32) -> (i32, i32, i32) {
    %c0_i32 = arith.constant 0 : i32
    %c0_i32_0 = arith.constant 0 : i32
    %c0_i32_1 = arith.constant 0 : i32
    return %arg0, %c0_i32, %c0_i32_0 : i32, i32, i32
  }
  func.func @transform_3(%arg0: i32) -> (i32, i32, i32) {
    %c0_i32 = arith.constant 0 : i32
    %c0_i32_0 = arith.constant 0 : i32
    %c0_i32_1 = arith.constant 0 : i32
    return %arg0, %c0_i32, %c0_i32_0 : i32, i32, i32
  }
  func.func @transform_4(%arg0: i32) -> (i32, i32, i32) {
    %c0_i32 = arith.constant 0 : i32
    %c0_i32_0 = arith.constant 0 : i32
    %c0_i32_1 = arith.constant 0 : i32
    return %arg0, %c0_i32, %c0_i32_0 : i32, i32, i32
  }
  func.func @transform_5(%arg0: i32) -> (i32, i32) {
    %c0_i32 = arith.constant 0 : i32
    %c0_i32_0 = arith.constant 0 : i32
    %c0_i32_1 = arith.constant 0 : i32
    return %c0_i32, %c0_i32_0 : i32, i32
  }
  func.func @transform_6(%arg0: i32) -> (i32, i32, i32) {
    %c0_i32 = arith.constant 0 : i32
    %c0_i32_0 = arith.constant 0 : i32
    %c0_i32_1 = arith.constant 0 : i32
    return %arg0, %c0_i32, %c0_i32_0 : i32, i32, i32
  }
}

</mosaic_0001>

<bundles_post_ra>
// kernel: forward_pallas.2
= control target key start
LH: loop header
LB: loop body
LE: loop exit
PB: predicated region body
PF: predicated region fallthrough
CT: control target
= control target key end

     0   :  { %10 = vsyncpa [#allocation3], 0  ;;  %s3043_s0 = inlined_call_operand.vmem [shape: f32[2,144,1], index: 0, kind: input, shape index: {}]   ;;  %s3044_s1 = inlined_call_operand.hbm [shape: f32[3,32], index: 1, kind: input, shape index: {}]   ;;  %s3045_s2 = inlined_call_operand.hbm [shape: f32[1,32], index: 2, kind: input, shape index: {}]   ;;  %s3046_s3 = inlined_call_operand.hbm [shape: f32[3,32,64], index: 3, kind: input, shape index: {}]   ;;  %s3047_s4 = inlined_call_operand.hbm [shape: f32[1,64], index: 4, kind: input, shape index: {}]   ;;  %s3048_s5 = inlined_call_operand.vmem [shape: f32[2,48,64], index: 5, kind: output, shape index: {}]  }
   0x1   :  { %11 = vsyncpa [#allocation5], 0 }
   0x2   :  { %12 = vsyncpa [#allocation8], 0  ;;  %s2234_s18 = smov [#allocation4]   ;;  %s2235_s20 = smov [#allocation2]  }
   0x3   :  { %s31_s19 = sshll.u32 %s2234_s18, 4  ;;  %s21_s21 = sshll.u32 %s2235_s20, 4  ;;  %s32_s19 = int_to_ptr.vmem [resolvable:$true] %s31_s19  ;;  %s22_s21 = int_to_ptr.vmem [resolvable:$true] %s21_s21 }
   0x4   :  { %s2156_s22 = scalar_lea.vmem %s32_s19, 16  ;;  %s2160_s23 = scalar_lea.vmem %s32_s19, 32 }
   0x5   :  { %p2157_p0 = scmp.ne.s32.totalorder %s32_s19, %s2156_s22  ;;  %p2161_p1 = scmp.lt.s32.totalorder %s32_s19, %s32_s19 }
   0x6   :  { %p2162_p2 = scmp.lt.s32.totalorder %s2160_s23, %s2156_s22 }
   0x8   :  { %p2163_p3 = por %p2162_p2, %p2161_p1 }
   0xa   :  { %p2164_p4 = pnand %p2163_p3, %p2157_p0 }
   0xc   :  { %2167 = shalt.err (!%p2164_p4)
}
   0xd   :  { %34 = dma.hbm_to_vmem [thread:$0]  %s3045_s2, 16, %s32_s19, [#allocation5]  }
   0xe   :  { %s2176_s26 = scalar_lea.vmem %s22_s21, 64  ;;  %p2181_p6 = scmp.lt.s32.totalorder %s22_s21, %s22_s21 }
   0xf   :  { %p2177_p5 = scmp.ne.s32.totalorder %s22_s21, %s2176_s26  ;;  %p2182_p7 = scmp.lt.s32.totalorder %s2176_s26, %s2176_s26 }
  0x11   :  { %p2183_p8 = por %p2182_p7, %p2181_p6 }
  0x13   :  { %p2184_p9 = pnand %p2183_p8, %p2177_p5 }
  0x15   :  { %2187 = shalt.err (!%p2184_p9)
}
  0x16   :  { %24 = dma.hbm_to_vmem [thread:$0]  %s3044_s1, 64, %s22_s21, [#allocation3]  }
  0x17   :  { %s2236_s29 = smov [#allocation6]  }
  0x18   :  { %s40_s30 = sshll.u32 %s2236_s29, 4  ;;  %s41_s30 = int_to_ptr.vmem [resolvable:$true] %s40_s30 }
  0x19   :  { %s2196_s6 = scalar_lea.vmem %s41_s30, 1536  ;;  %p2201_p11 = scmp.lt.s32.totalorder %s41_s30, %s41_s30 }
  0x1a   :  { %p2197_p10 = scmp.ne.s32.totalorder %s41_s30, %s2196_s6  ;;  %p2202_p12 = scmp.lt.s32.totalorder %s2196_s6, %s2196_s6 }
  0x1c   :  { %p2203_p13 = por %p2202_p12, %p2201_p11 }
  0x1e   :  { %p2204_p0 = pnand %p2203_p13, %p2197_p10 }
  0x20   :  { %2207 = shalt.err (!%p2204_p0)
}
  0x21   :  { %s2237_s2 = smov 128   ;;  %s2238_s7 = smov 8  }
  0x22   :  { %46 = dma.hbm_to_vmem [thread:$0]  %s3046_s3, 1536, %s41_s30, [#allocation5], %s2237_s2, %s2237_s2, %s2238_s7  }
  0x23   :  { %s2239_s10 = smov [#allocation7]  }
  0x24   :  { %s53_s11 = sshll.u32 %s2239_s10, 4  ;;  %s54_s11 = int_to_ptr.vmem [resolvable:$true] %s53_s11 }
  0x25   :  { %s2216_s1 = scalar_lea.vmem %s54_s11, 16  ;;  %s2220_s12 = scalar_lea.vmem %s54_s11, 32 }
  0x26   :  { %p2217_p1 = scmp.ne.s32.totalorder %s54_s11, %s2216_s1  ;;  %p2221_p2 = scmp.lt.s32.totalorder %s54_s11, %s54_s11 }
  0x27   :  { %p2222_p3 = scmp.lt.s32.totalorder %s2220_s12, %s2216_s1 }
  0x29   :  { %p2223_p4 = por %p2222_p3, %p2221_p2 }
  0x2b   :  { %p2224_p5 = pnand %p2223_p4, %p2217_p1 }
  0x2d   :  { %2227 = shalt.err (!%p2224_p5)
}
  0x2e   :  { %56 = dma.hbm_to_vmem [thread:$0]  %s3047_s4, 16, %s54_s11, [#allocation8]  }
  0x2f   :  { %2228 = dma.done.wait [#allocation3], 64  }
  0x30   :  { %2229 = vsyncadd [#allocation3], 4294967232 }
  0x31   :  { %2230 = dma.done.wait [#allocation5], 1552  }
  0x32   :  { %2231 = vsyncadd [#allocation5], 4294965744 }
  0x33   :  { %2232 = dma.done.wait [#allocation8], 16  }
  0x34   :  { %2233 = vsyncadd [#allocation8], 4294967280  ;;  %v2240_v0 = vmov 0   ;;  %v112_v1 = vld [vmem:[%s3043_s0 + $0x20] sm:$0xff]  ;;  %v110_v2 = vld [vmem:[%s3043_s0 + $0x10] sm:$0xff]  ;;  %v70_v46 = vlaneseq  ;;  %vm258_vm0 = vcmask 1043456  }
  0x35   :  { %2147 = vset.pattern.permute.xlu1 %v2240_v0  ;;  %2146 = vset.pattern.permute.xlu0 %v2240_v0  ;;  %v113_v3 = vld [vmem:[%s3043_s0 + $0x28] sm:$0xff]  ;;  %v111_v4 = vld [vmem:[%s3043_s0 + $0x18] sm:$0xff]  ;;  %v114_v5 = vld [vmem:[%s3043_s0 + $0x30] sm:$0xff]  ;;  %vm423_vm1 = vcmask 261120   ;;  %vm902_vm2 = vcmask 523264   ;;  %vm904_vm3 = vcmask 519168  }
  0x36   :  { %148 = vperm.xlu1 %2147, %v112_v1   ;;  %138 = vperm.xlu0 %2146, %v110_v2   ;;  %v109_v6 = vld [vmem:[%s3043_s0 + $0x8] sm:$0xff]  ;;  %v115_v7 = vld [vmem:[%s3043_s0 + $0x38] sm:$0xff]  ;;  %v108_v8 = vld [vmem:[%s3043_s0] sm:$0xff]  ;;  %v71_v47 = vshrl.u32 %v70_v46, 7 }
  0x37   :  { %v2307_v9 = vld [vmem:[#allocation6 + $0x38] sm:$0xff]  ;;  %v117_v12 = vld [vmem:[%s3043_s0 + $0x48] sm:$0xff]  ;;  %v2319_v13 = vld [vmem:[#allocation6 + $0x30] sm:$0xff] }
  0x38   :  { %v2309_v10 = vld [vmem:[#allocation6 + $0x18] sm:$0xff]  ;;  %1983 = vmatprep.subr.mxu0 %v2307_v9  ;;  %v2323_v14 = vld [vmem:[#allocation6 + $0x10] sm:$0xff]  ;;  %v2327_v15 = vld [vmem:[#allocation6 + $0x28] sm:$0xff]  ;;  %v76_v48 = vsub.s32 1, %v71_v47  ;;  %v72_v51 = vsub.s32 0, %v71_v47  ;;  %v80_v54 = vsub.s32 2, %v71_v47 }
  0x39   :  { %v116_v11 = vld [vmem:[%s3043_s0 + $0x40] sm:$0xff]  ;;  %2009 = vmatprep.subr.mxu1 %v2309_v10  ;;  %1984 = vmatpush3.msra.mxu0 %v2307_v9  ;;  %v2329_v16 = vld [vmem:[#allocation6 + $0x8] sm:$0xff]  ;;  %v119_v18 = vld [vmem:[%s3043_s0 + $0x58] sm:$0xff] }
  0x3a   :  { %153 = vperm.xlu1 %2147, %v113_v3   ;;  %143 = vperm.xlu0 %2146, %v111_v4   ;;  %v118_v17 = vld [vmem:[%s3043_s0 + $0x50] sm:$0xff]  ;;  %v2341_v19 = vld [vmem:[#allocation6 + $0x20] sm:$0xff]  ;;  %v123_v24 = vld [vmem:[%s3043_s0 + $0x78] sm:$0xff] }
  0x3b   :  { %2010 = vmatpush3.msra.mxu1 %v2309_v10  ;;  %1985 = vmatprep.subr.mxu0 %v2319_v13  ;;  %v120_v20 = vld [vmem:[%s3043_s0 + $0x60] sm:$0xff]  ;;  %v121_v21 = vld [vmem:[%s3043_s0 + $0x68] sm:$0xff]  ;;  %v122_v23 = vld [vmem:[%s3043_s0 + $0x70] sm:$0xff] }
  0x3c   :  { %2011 = vmatprep.subr.mxu1 %v2323_v14  ;;  %1986 = vmatpush3.msra.mxu0 %v2319_v13  ;;  %v2353_v22 = vld [vmem:[#allocation6] sm:$0xff]  ;;  %v1829_v28 = vld [vmem:[%s3043_s0 + $0xb0] sm:$0xff]  ;;  %v1830_v29 = vld [vmem:[%s3043_s0 + $0xb8] sm:$0xff] }
  0x3d   :  { %2012 = vmatpush3.msra.mxu1 %v2323_v14  ;;  %1987 = vmatprep.subr.mxu0 %v2327_v15  ;;  %v124_v25 = vld [vmem:[%s3043_s0 + $0x80] sm:$0xff]  ;;  %v1828_v27 = vld [vmem:[%s3043_s0 + $0xa8] sm:$0xff]  ;;  %v1826_v30 = vld [vmem:[%s3043_s0 + $0x98] sm:$0xff] }
  0x3e   :  { %158 = vperm.xlu1 %2147, %v114_v5   ;;  %133 = vperm.xlu0 %2146, %v109_v6   ;;  %v1827_v26 = vld [vmem:[%s3043_s0 + $0xa0] sm:$0xff]  ;;  %v1832_v33 = vld [vmem:[%s3043_s0 + $0xc8] sm:$0xff]  ;;  %v1833_v34 = vld [vmem:[%s3043_s0 + $0xd0] sm:$0xff] }
  0x3f   :  { %2013 = vmatprep.subr.mxu1 %v2329_v16  ;;  %1988 = vmatpush3.msra.mxu0 %v2327_v15  ;;  %v2382_v31 = vld [vmem:[#allocation6 + $0x58] sm:$0xff]  ;;  %v1836_v37 = vld [vmem:[%s3043_s0 + $0xe8] sm:$0xff]  ;;  %v1837_v38 = vld [vmem:[%s3043_s0 + $0xf0] sm:$0xff] }
  0x40   :  { %2014 = vmatpush3.msra.mxu1 %v2329_v16  ;;  %1989 = vmatprep.subr.mxu0 %v2341_v19  ;;  %v1831_v32 = vld [vmem:[%s3043_s0 + $0xc0] sm:$0xff]  ;;  %v1834_v35 = vld [vmem:[%s3043_s0 + $0xd8] sm:$0xff]  ;;  %v1840_v41 = vld [vmem:[%s3043_s0 + $0x108] sm:$0xff] }
  0x41   :  { %1990 = vmatpush3.msra.mxu0 %v2341_v19  ;;  %2015 = vmatprep.subr.mxu1 %v2353_v22  ;;  %v1835_v36 = vld [vmem:[%s3043_s0 + $0xe0] sm:$0xff]  ;;  %v1838_v39 = vld [vmem:[%s3043_s0 + $0xf8] sm:$0xff]  ;;  %v1841_v42 = vld [vmem:[%s3043_s0 + $0x110] sm:$0xff] }
  0x42   :  { %163 = vperm.xlu0 %2146, %v115_v7   ;;  %128 = vperm.xlu1 %2147, %v108_v8   ;;  %v1839_v40 = vld [vmem:[%s3043_s0 + $0x100] sm:$0xff]  ;;  %v125_v43 = vld [vmem:[%s3043_s0 + $0x88] sm:$0xff]  ;;  %v1825_v44 = vld [vmem:[%s3043_s0 + $0x90] sm:$0xff] }
  0x43   :  { %2016 = vmatpush3.msra.mxu1 %v2353_v22  ;;  %2035 = vmatprep.subr.mxu0 %v2382_v31  ;;  %v1842_v45 = vld [vmem:[%s3043_s0 + $0x118] sm:$0xff]  ;;  %v69_v49 = vld [vmem:[#allocation2] sm:$0x7] }
  0x44   :  { %2061 = vmatprep.subr.mxu1 %v2307_v9  ;;  %v2427_v50 = vrot.slane %v69_v49, %v76_v48  ;;  %v2430_v56 = vrot.slane %v69_v49, %v72_v51  ;;  %v2435_v62 = vrot.slane %v69_v49, %v80_v54 }
  0x46   :  { %168 = vperm.xlu0 %2146, %v116_v11   ;;  %173 = vperm.xlu1 %2147, %v117_v12  }
  0x4a   :  { %178 = vperm.xlu0 %2146, %v118_v17   ;;  %183 = vperm.xlu1 %2147, %v119_v18  }
  0x4e   :  { %188 = vperm.xlu0 %2146, %v120_v20   ;;  %193 = vperm.xlu1 %2147, %v121_v21  }
  0x52   :  { %198 = vperm.xlu0 %2146, %v122_v23   ;;  %218 = vperm.xlu1 %2147, %v123_v24   ;;  %v2447_v24 = vld [vmem:[#allocation4] ss:$0 sm:$0xff] }
  0x56   :  { %223 = vperm.xlu0 %2146, %v124_v25   ;;  %976 = vperm.xlu1 %2147, %v1827_v26  }
  0x5a   :  { %981 = vperm.xlu0 %2146, %v1828_v27   ;;  %986 = vperm.xlu1 %2147, %v1829_v28  }
  0x5e   :  { %991 = vperm.xlu0 %2146, %v1830_v29   ;;  %971 = vperm.xlu1 %2147, %v1826_v30  }
  0x62   :  { %996 = vperm.xlu0 %2146, %v1831_v32   ;;  %1001 = vperm.xlu1 %2147, %v1832_v33  }
  0x66   :  { %1006 = vperm.xlu0 %2146, %v1833_v34   ;;  %1011 = vperm.xlu1 %2147, %v1834_v35  }
  0x6a   :  { %1016 = vperm.xlu0 %2146, %v1835_v36   ;;  %1021 = vperm.xlu1 %2147, %v1836_v37  }
  0x6e   :  { %1026 = vperm.xlu0 %2146, %v1837_v38   ;;  %1031 = vperm.xlu1 %2147, %v1838_v39  }
  0x72   :  { %1036 = vperm.xlu0 %2146, %v1839_v40   ;;  %1056 = vperm.xlu1 %2147, %v1840_v41  }
  0x76   :  { %1061 = vperm.xlu0 %2146, %v1841_v42   ;;  %322 = vperm.xlu1 %2147, %v125_v43  }
  0x7a   :  { %966 = vperm.xlu0 %2146, %v1825_v44   ;;  %1159 = vperm.xlu1 %2147, %v1842_v45  }
  0xb1   :  { %v149_v52 = vpop.permute.xlu1 %148  ;;  %v139_v53 = vpop.permute.xlu0 %138 }
  0xb2   :  { %v229_v55 = vmul.f32 %v149_v52, %v2427_v50  ;;  %v227_v59 = vmul.f32 %v139_v53, %v2427_v50  ;;  %v203_v1 = vmul.f32 %v139_v53, %v2430_v56  ;;  %v205_v21 = vmul.f32 %v149_v52, %v2430_v56 }
  0xb3   :  { %v326_v23 = vmul.f32 %v149_v52, %v2435_v62 }
  0xb4   :  { %v264_v63 = vrot.slane %v229_v55, 4  ;;  %v260_v6 = vrot.slane %v227_v59, 4 }
  0xb5   :  { %v154_v57 = vpop.permute.xlu1 %153  ;;  %v144_v58 = vpop.permute.xlu0 %143 }
  0xb6   :  { %v230_v60 = vmul.f32 %v154_v57, %v2427_v50  ;;  %v228_v61 = vmul.f32 %v144_v58, %v2427_v50  ;;  %v204_v2 = vmul.f32 %v144_v58, %v2430_v56  ;;  %v206_v34 = vmul.f32 %v154_v57, %v2430_v56 }
  0xb7   :  { %v327_v38 = vmul.f32 %v154_v57, %v2435_v62  ;;  %v325_v42 = vmul.f32 %v144_v58, %v2435_v62 }
  0xb8   :  { %v266_v0 = vrot.slane %v230_v60, 4  ;;  %v262_v3 = vrot.slane %v228_v61, 4 }
  0xb9   :  { %v159_v4 = vpop.permute.xlu1 %158  ;;  %v134_v5 = vpop.permute.xlu0 %133 }
  0xba   :  { %v267_v7 = vsel %vm258_vm0, %v264_v63, %v266_v0  ;;  %v231_v8 = vmul.f32 %v159_v4, %v2427_v50  ;;  %v328_v11 = vmul.f32 %v159_v4, %v2435_v62  ;;  %v265_v12 = vsel %vm258_vm0, %v262_v3, %v264_v63 }
  0xbb   :  { %v308_v17 = vadd.f32 %v267_v7, %v204_v2  ;;  %v202_v18 = vmul.f32 %v134_v5, %v2430_v56  ;;  %v226_v20 = vmul.f32 %v134_v5, %v2427_v50  ;;  %v263_v26 = vsel %vm258_vm0, %v260_v6, %v262_v3 }
  0xbc   :  { %v268_v25 = vrot.slane %v231_v8, 4  ;;  %v307_v27 = vadd.f32 %v265_v12, %v203_v1  ;;  %v207_v43 = vmul.f32 %v159_v4, %v2430_v56 }
  0xbd   :  { %v343_v28 = vadd.f32 %v328_v11, %v308_v17  ;;  %v259_v29 = vrot.slane %v226_v20, 4  ;;  %v306_v30 = vadd.f32 %v263_v26, %v202_v18  ;;  %v164_v32 = vpop.permute.xlu0 %163  ;;  %v129_v33 = vpop.permute.xlu1 %128 }
  0xbe   :  { %v232_v35 = vmul.f32 %v164_v32, %v2427_v50  ;;  %v269_v36 = vsel %vm258_vm0, %v266_v0, %v268_v25  ;;  %v329_v37 = vmul.f32 %v164_v32, %v2435_v62  ;;  %v201_v45 = vmul.f32 %v129_v33, %v2430_v56 }
  0xbf   :  { %v358_v39 = vadd.f32 %v2447_v24, %v343_v28  ;;  %v341_v40 = vadd.f32 %v326_v23, %v306_v30  ;;  %v309_v41 = vadd.f32 %v269_v36, %v205_v21  ;;  %v261_v47 = vsel %vm258_vm0, %v259_v29, %v260_v6 }
  0xc0   :  { %v270_v44 = vrot.slane %v232_v35, 4  ;;  %v342_v51 = vadd.f32 %v327_v38, %v307_v27  ;;  %v208_v53 = vmul.f32 %v164_v32, %v2430_v56  ;;  %v305_v63 = vadd.f32 %v261_v47, %v201_v45 }
  0xc1   :  { %v344_v46 = vadd.f32 %v329_v37, %v309_v41  ;;  %v169_v48 = vpop.permute.xlu0 %168  ;;  %v174_v49 = vpop.permute.xlu1 %173  ;;  %v2461_v52 = vadd.f32 %v2447_v24, %v341_v40  ;;  %v2467_v58 = vmax.f32 %v358_v39, 0.0 }
  0xc2   :  { %v233_v54 = vmul.f32 %v169_v48, %v2427_v50  ;;  %v271_v55 = vsel %vm258_vm0, %v268_v25, %v270_v44  ;;  %v330_v57 = vmul.f32 %v169_v48, %v2435_v62  ;;  %v234_v61 = vmul.f32 %v174_v49, %v2427_v50 }
  0xc3   :  { %v359_v59 = vadd.f32 %v2447_v24, %v344_v46  ;;  %v310_v60 = vadd.f32 %v271_v55, %v206_v34  ;;  %v209_v0 = vmul.f32 %v169_v48, %v2430_v56  ;;  %v210_v2 = vmul.f32 %v174_v49, %v2430_v56 }
  0xc4   :  { %v272_v1 = vrot.slane %v233_v54, 4  ;;  %v274_v4 = vrot.slane %v234_v61, 4  ;;  %v2474_v7 = vadd.f32 %v2447_v24, %v342_v51  ;;  %v371_v8 = vmax.f32 %v2461_v52, 0.0 }
  0xc5   :  { %v345_v3 = vadd.f32 %v330_v57, %v310_v60  ;;  %v179_v5 = vpop.permute.xlu0 %178  ;;  %v184_v6 = vpop.permute.xlu1 %183  ;;  %v2477_v11 = vmax.f32 %v359_v59, 0.0  ;;  %v331_v17 = vmul.f32 %v174_v49, %v2435_v62  ;;  %v401_v25 = vrot.slane %v2467_v58, 4 }
  0xc6   :  { %v273_v12 = vsel %vm258_vm0, %v270_v44, %v272_v1  ;;  %v235_v18 = vmul.f32 %v179_v5, %v2427_v50  ;;  %v275_v21 = vsel %vm258_vm0, %v272_v1, %v274_v4  ;;  %v332_v23 = vmul.f32 %v179_v5, %v2435_v62 }
  0xc7   :  { %v311_v20 = vadd.f32 %v273_v12, %v207_v43  ;;  %v211_v26 = vmul.f32 %v179_v5, %v2430_v56  ;;  %v312_v28 = vadd.f32 %v275_v21, %v208_v53  ;;  %v236_v29 = vmul.f32 %v184_v6, %v2427_v50 }
  0xc8   :  { %v276_v27 = vrot.slane %v235_v18, 4  ;;  %v360_v30 = vadd.f32 %v2447_v24, %v345_v3  ;;  %v372_v33 = vmax.f32 %v2474_v7, 0.0  ;;  %v398_v34 = vrot.slane %v371_v8, 4 }
  0xc9   :  { %v346_v32 = vadd.f32 %v331_v17, %v311_v20  ;;  %v189_v35 = vpop.permute.xlu0 %188  ;;  %v194_v36 = vpop.permute.xlu1 %193  ;;  %v278_v38 = vrot.slane %v236_v29, 4  ;;  %v333_v39 = vmul.f32 %v184_v6, %v2435_v62  ;;  %v340_v40 = vadd.f32 %v325_v42, %v305_v63  ;;  %v2502_v63 = vld [vmem:[#allocation6 + $0x50] sm:$0xff] }
  0xca   :  { %v277_v37 = vsel %vm258_vm0, %v274_v4, %v276_v27  ;;  %v347_v43 = vadd.f32 %v332_v23, %v312_v28  ;;  %v399_v45 = vrot.slane %v372_v33, 4  ;;  %v212_v46 = vmul.f32 %v184_v6, %v2430_v56 }
  0xcb   :  { %v361_v41 = vadd.f32 %v2447_v24, %v346_v32  ;;  %v313_v44 = vadd.f32 %v277_v37, %v209_v0  ;;  %v355_v47 = vadd.f32 %v2447_v24, %v340_v40  ;;  %v237_v48 = vmul.f32 %v189_v35, %v2427_v50 }
  0xcc   :  { %v279_v49 = vsel %vm258_vm0, %v276_v27, %v278_v38  ;;  %v2496_v51 = vmax.f32 %v360_v30, 0.0  ;;  %v400_v53 = vsel %vm258_vm0, %v398_v34, %v399_v45  ;;  %v213_v42 = vmul.f32 %v189_v35, %v2430_v56 }
  0xcd   :  { %v348_v52 = vadd.f32 %v333_v39, %v313_v44  ;;  %v199_v54 = vpop.permute.xlu0 %198  ;;  %v219_v55 = vpop.permute.xlu1 %218  ;;  %1991 = vmatprep.mubr.msk.f32.mxu0 %vm423_vm1, %v400_v53  ;;  %v402_v57 = vsel %vm258_vm0, %v399_v45, %v401_v25  ;;  %v370_v59 = vmax.f32 %v355_v47, 0.0  ;;  %v280_v60 = vrot.slane %v237_v48, 4 }
  0xce   :  { %v314_v61 = vadd.f32 %v279_v49, %v210_v2  ;;  %v2504_v0 = vmax.f32 %v361_v41, 0.0  ;;  %v362_v1 = vadd.f32 %v2447_v24, %v347_v43  ;;  %1992 = vmatmul.mubr.msk.f32.vlgmr.msra.gmra.mxu0 %vm423_vm1, %v402_v57  ;;  %v334_v3 = vmul.f32 %v189_v35, %v2435_v62 }
  0xcf   :  { %v238_v4 = vmul.f32 %v194_v36, %v2427_v50  ;;  %v363_v5 = vadd.f32 %v2447_v24, %v348_v52  ;;  %2017 = vmatprep.mubr.msk.f32.mxu1 %vm423_vm1, %v370_v59  ;;  %v214_v6 = vmul.f32 %v194_v36, %v2430_v56  ;;  %v281_v2 = vsel %vm258_vm0, %v278_v38, %v280_v60 }
  0xd0   :  { %v403_v7 = vrot.slane %v2477_v11, 4  ;;  %2036 = vmatpush3.msra.mxu0 %v2382_v31  ;;  %v349_v12 = vadd.f32 %v334_v3, %v314_v61  ;;  %v315_v18 = vadd.f32 %v281_v2, %v211_v26  ;;  %v335_v20 = vmul.f32 %v194_v36, %v2435_v62  ;;  %2018 = vmatmul.mubr.msk.f32.vlgmr.msra.gmra.mxu1 %vm423_vm1, %v371_v8  ;;  %v2577_v3 = vld [vmem:[#allocation6 + $0x40] sm:$0xff] }
  0xd1   :  { %v282_v17 = vrot.slane %v238_v4, 4  ;;  %v224_v21 = vpop.permute.xlu0 %223  ;;  %v977_v23 = vpop.permute.xlu1 %976  ;;  %2037 = vmatprep.subr.mxu0 %v2502_v63  ;;  %2020 = vmatprep.mubr.msk.f32.mxu1 %vm423_vm1, %v372_v33  ;;  %v239_v28 = vmul.f32 %v199_v54, %v2427_v50  ;;  %v336_v29 = vmul.f32 %v199_v54, %v2435_v62  ;;  %v2524_v30 = vmul.f32 %v219_v55, %v2427_v50 }
  0xd2   :  { %v404_v27 = vsel %vm258_vm0, %v401_v25, %v403_v7  ;;  %v364_v26 = vadd.f32 %v2447_v24, %v349_v12  ;;  %v350_v32 = vadd.f32 %v335_v20, %v315_v18  ;;  %v2529_v8 = vmul.f32 %v199_v54, %v2430_v56  ;;  %2062 = vmatpush3.msra.mxu1 %v2307_v9  ;;  %v2548_v9 = vld [vmem:[#allocation6 + $0x48] sm:$0xff] }
  0xd3   :  { %1994 = vmatprep.mubr.msk.f32.mxu0 %vm423_vm1, %v404_v27  ;;  %v283_v34 = vsel %vm258_vm0, %v280_v60, %v282_v17  ;;  %v284_v25 = vrot.slane %v239_v28, 4  ;;  %v286_v33 = vrot.slane %v2524_v30, 4  ;;  %v405_v36 = vrot.slane %v2496_v51, 4  ;;  %2038 = vmatpush3.msra.mxu0 %v2502_v63 }
  0xd4   :  { %v316_v35 = vadd.f32 %v283_v34, %v212_v46  ;;  %v2536_v37 = vmax.f32 %v362_v1, 0.0  ;;  %v365_v38 = vadd.f32 %v2447_v24, %v350_v32  ;;  %2021 = vmatmul.mubr.msk.f32.gmra.mxu1 %vm423_vm1, %v2467_v58  ;;  %v2542_v39 = vmul.f32 %v224_v21, %v2427_v50  ;;  %2063 = vmatprep.subr.mxu1 %v2319_v13 }
  0xd5   :  { %v338_v40 = vmul.f32 %v224_v21, %v2435_v62  ;;  %v2545_v41 = vpop.permute.xlu0 %981  ;;  %v987_v43 = vpop.permute.xlu1 %986  ;;  %v285_v45 = vsel %vm258_vm0, %v282_v17, %v284_v25  ;;  %v406_v46 = vsel %vm258_vm0, %v403_v7, %v405_v36  ;;  %2023 = vmatprep.mubr.msk.f32.mxu1 %vm423_vm1, %v2477_v11  ;;  %v287_v47 = vsel %vm258_vm0, %v284_v25, %v286_v33 }
  0xd6   :  { %v351_v44 = vadd.f32 %v336_v29, %v316_v35  ;;  %v317_v48 = vadd.f32 %v285_v45, %v213_v42  ;;  %v337_v49 = vmul.f32 %v219_v55, %v2435_v62  ;;  %1995 = vmatmul.mubr.msk.f32.gmra.mxu0 %vm423_vm1, %v406_v46  ;;  %v318_v52 = vadd.f32 %v287_v47, %v214_v6 }
  0xd7   :  { %2064 = vmatpush3.msra.mxu1 %v2319_v13  ;;  %v2560_v53 = vmax.f32 %v363_v5, 0.0  ;;  %v2564_v57 = vmul.f32 %v977_v23, %v2427_v50  ;;  %v407_v59 = vrot.slane %v2504_v0, 4  ;;  %2039 = vmatprep.subr.mxu0 %v2548_v9  ;;  %v2569_v42 = vmax.f32 %v364_v26, 0.0 }
  0xd8   :  { %v366_v54 = vadd.f32 %v2447_v24, %v351_v44  ;;  %2065 = vmatprep.subr.mxu1 %v2327_v15  ;;  %v352_v55 = vadd.f32 %v337_v49, %v317_v48  ;;  %v353_v60 = vadd.f32 %v338_v40, %v318_v52  ;;  %2024 = vmatmul.mubr.msk.f32.gmra.mxu1 %vm423_vm1, %v2496_v51  ;;  %v409_v13 = vrot.slane %v2536_v37, 4 }
  0xd9   :  { %v2574_v61 = vpop.permute.xlu0 %991  ;;  %v972_v1 = vpop.permute.xlu1 %971  ;;  %2040 = vmatpush3.msra.mxu0 %v2548_v9  ;;  %v2579_v4 = vmax.f32 %v365_v38, 0.0  ;;  %v288_v5 = vrot.slane %v2542_v39, 4  ;;  %v408_v6 = vsel %vm258_vm0, %v405_v36, %v407_v59  ;;  %2026 = vmatprep.mubr.msk.f32.mxu1 %vm423_vm1, %v2504_v0  ;;  %v1066_v2 = vmul.f32 %v2545_v41, %v2427_v50 }
  0xda   :  { %2066 = vmatpush3.msra.mxu1 %v2327_v15  ;;  %v2589_v7 = vadd.f32 %v2447_v24, %v352_v55  ;;  %v1041_v12 = vmul.f32 %v977_v23, %v2430_v56  ;;  %1997 = vmatprep.mubr.msk.f32.mxu0 %vm423_vm1, %v408_v6  ;;  %v410_v17 = vsel %vm258_vm0, %v407_v59, %v409_v13  ;;  %v2596_v20 = vmax.f32 %v366_v54, 0.0 }
  0xdb   :  { %v1042_v18 = vmul.f32 %v2545_v41, %v2430_v56  ;;  %v1097_v21 = vrot.slane %v2564_v57, 4  ;;  %1998 = vmatmul.mubr.msk.f32.gmra.mxu0 %vm423_vm1, %v410_v17  ;;  %v1099_v27 = vrot.slane %v1066_v2, 4  ;;  %v1067_v15 = vmul.f32 %v987_v43, %v2427_v50  ;;  %2041 = vmatprep.subr.mxu0 %v2577_v3 }
  0xdc   :  { %v2603_v23 = vadd.f32 %v2447_v24, %v353_v60  ;;  %v1043_v28 = vmul.f32 %v987_v43, %v2430_v56  ;;  %2027 = vmatmul.mubr.msk.f32.gmra.mxu1 %vm423_vm1, %v2536_v37  ;;  %v411_v29 = vrot.slane %v2560_v53, 4  ;;  %v413_v26 = vrot.slane %v2569_v42, 4  ;;  %2042 = vmatpush3.msra.mxu0 %v2577_v3 }
  0xdd   :  { %v997_v32 = vpop.permute.xlu0 %996  ;;  %v1002_v34 = vpop.permute.xlu1 %1001  ;;  %v382_v25 = vmax.f32 %v2589_v7, 0.0  ;;  %v1101_v35 = vrot.slane %v1067_v15, 4  ;;  %v1163_v36 = vmul.f32 %v987_v43, %v2435_v62  ;;  %2029 = vmatprep.mubr.msk.f32.mxu1 %vm423_vm1, %v2560_v53  ;;  %v1068_v38 = vmul.f32 %v2574_v61, %v2427_v50  ;;  %2067 = vmatprep.subr.mxu1 %v2341_v19 }
  0xde   :  { %v412_v40 = vsel %vm258_vm0, %v409_v13, %v411_v29  ;;  %v414_v44 = vsel %vm258_vm0, %v411_v29, %v413_v26  ;;  %v1164_v45 = vmul.f32 %v2574_v61, %v2435_v62  ;;  %v1040_v46 = vmul.f32 %v972_v1, %v2430_v56  ;;  %2068 = vmatpush3.msra.mxu1 %v2341_v19 }
  0xdf   :  { %2000 = vmatprep.mubr.msk.f32.mxu0 %vm423_vm1, %v412_v40  ;;  %v1102_v43 = vsel %vm258_vm0, %v1099_v27, %v1101_v35  ;;  %v1103_v47 = vrot.slane %v1068_v38, 4  ;;  %v1100_v48 = vsel %vm258_vm0, %v1097_v21, %v1099_v27  ;;  %v415_v49 = vrot.slane %v2579_v4, 4  ;;  %2087 = vmatprep.subr.mxu0 %v2309_v10 }
  0xe0   :  { %2001 = vmatmul.mubr.msk.f32.gmra.mxu0 %vm423_vm1, %v414_v44  ;;  %v1144_v52 = vadd.f32 %v1102_v43, %v1041_v12  ;;  %v2633_v54 = vmul.f32 %v972_v1, %v2427_v50  ;;  %v1143_v19 = vadd.f32 %v1100_v48, %v1040_v46  ;;  %2030 = vmatmul.mubr.msk.f32.gmra.mxu1 %vm423_vm1, %v2569_v42  ;;  %v417_v59 = vrot.slane %v2596_v20, 4 }
  0xe1   :  { %v1007_v55 = vpop.permute.xlu0 %1006  ;;  %v383_v60 = vmax.f32 %v2603_v23, 0.0  ;;  %v416_v13 = vsel %vm258_vm0, %v413_v26, %v415_v49  ;;  %2032 = vmatprep.mubr.msk.f32.mxu1 %vm423_vm1, %v2579_v4  ;;  %v1069_v6 = vmul.f32 %v997_v32, %v2427_v50  ;;  %v1104_v2 = vsel %vm258_vm0, %v1101_v35, %v1103_v47  ;;  %v1012_v15 = vpop.permute.xlu1 %1011  ;;  %2113 = vmatprep.subr.mxu1 %v2382_v31 }
  0xe2   :  { %v1179_v1 = vadd.f32 %v1164_v45, %v1144_v52  ;;  %v1178_v12 = vadd.f32 %v1163_v36, %v1143_v19  ;;  %2003 = vmatprep.mubr.msk.f32.mxu0 %vm423_vm1, %v416_v13  ;;  %v418_v17 = vsel %vm258_vm0, %v415_v49, %v417_v59  ;;  %v1145_v27 = vadd.f32 %v1104_v2, %v1042_v18 }
  0xe3   :  { %v1044_v29 = vmul.f32 %v2574_v61, %v2430_v56  ;;  %v1105_v38 = vrot.slane %v1069_v6, 4  ;;  %v1165_v26 = vmul.f32 %v997_v32, %v2435_v62  ;;  %v1070_v40 = vmul.f32 %v1002_v34, %v2427_v50 }
  0xe4   :  { %v2652_v35 = vadd.f32 %v2447_v24, %v1179_v1  ;;  %v1096_v36 = vrot.slane %v2633_v54, 4  ;;  %2004 = vmatmul.mubr.msk.f32.gmra.mxu0 %vm423_vm1, %v418_v17  ;;  %v1045_v18 = vmul.f32 %v997_v32, %v2430_v56  ;;  %2033 = vmatmul.mubr.msk.f32.gmra.mxu1 %vm423_vm1, %v2596_v20  ;;  %v419_v61 = vrot.slane %v382_v25, 4 }
  0xe5   :  { %v1017_v44 = vpop.permute.xlu0 %1016  ;;  %v1180_v45 = vadd.f32 %v1165_v26, %v1145_v27  ;;  %v1106_v46 = vsel %vm258_vm0, %v1103_v47, %v1105_v38  ;;  %v1107_v43 = vrot.slane %v1070_v40, 4  ;;  %v421_v48 = vrot.slane %v383_v60, 4 }
  0xe6   :  { %v2665_v49 = vadd.f32 %v2447_v24, %v1178_v12  ;;  %v1146_v52 = vadd.f32 %v1106_v46, %v1043_v28  ;;  %v1166_v32 = vmul.f32 %v1002_v34, %v2435_v62  ;;  %v420_v19 = vsel %vm258_vm0, %v417_v59, %v419_v61  ;;  %v1022_v59 = vpop.permute.xlu1 %1021 }
  0xe7   :  { %v1195_v13 = vadd.f32 %v2447_v24, %v1180_v45  ;;  %v1046_v6 = vmul.f32 %v1002_v34, %v2430_v56  ;;  %2006 = vmatprep.mubr.msk.f32.mxu0 %vm423_vm1, %v420_v19  ;;  %v422_v47 = vsel %vm258_vm0, %v419_v61, %v421_v48  ;;  %v1071_v2 = vmul.f32 %v1007_v55, %v2427_v50 }
  0xe8   :  { %v1209_v1 = vmax.f32 %v2652_v35, 0.0  ;;  %v1181_v17 = vadd.f32 %v1166_v32, %v1146_v52  ;;  %2007 = vmatmul.mubr.msk.f32.gmra.mxu0 %vm423_vm1, %v422_v47  ;;  %v1108_v28 = vsel %vm258_vm0, %v1105_v38, %v1107_v43  ;;  %v1167_v12 = vmul.f32 %v1007_v55, %v2435_v62 }
  0xe9   :  { %v2678_v27 = vmax.f32 %v1195_v13, 0.0  ;;  %2043 = vmatprep.mubr.msk.f32.mxu0 %vm423_vm1, %v2467_v58  ;;  %v1109_v34 = vrot.slane %v1071_v2, 4  ;;  %v1147_v26 = vadd.f32 %v1108_v28, %v1044_v29  ;;  %v1072_v40 = vmul.f32 %v1012_v15, %v2427_v50  ;;  %v1027_v61 = vpop.permute.xlu0 %1026 }
  0xea   :  { %v1208_v45 = vmax.f32 %v2665_v49, 0.0  ;;  %v1047_v46 = vmul.f32 %v1007_v55, %v2430_v56  ;;  %v1048_v48 = vmul.f32 %v1012_v15, %v2430_v56  ;;  %v1073_v38 = vmul.f32 %v1017_v44, %v2427_v50 }
  0xeb   :  { %v1196_v52 = vadd.f32 %v2447_v24, %v1181_v17  ;;  %v1182_v32 = vadd.f32 %v1167_v12, %v1147_v26  ;;  %v1110_v19 = vsel %vm258_vm0, %v1107_v43, %v1109_v34  ;;  %v1111_v13 = vrot.slane %v1072_v40, 4  ;;  %v1032_v26 = vpop.permute.xlu1 %1031 }
  0xec   :  { %v1148_v58 = vadd.f32 %v1110_v19, %v1045_v18  ;;  %v1168_v29 = vmul.f32 %v1012_v15, %v2435_v62  ;;  %2044 = vmatmul.mubr.msk.f32.vlgmr.msra.gmra.mxu0 %vm423_vm1, %v2477_v11  ;;  %v1113_v47 = vrot.slane %v1073_v38, 4  ;;  %v1169_v2 = vmul.f32 %v1017_v44, %v2435_v62 }
  0xed   :  { %v1238_v55 = vrot.slane %v2678_v27, 4  ;;  %2046 = vmatprep.mubr.msk.f32.mxu0 %vm423_vm1, %v2496_v51  ;;  %v1049_v17 = vmul.f32 %v1017_v44, %v2430_v56  ;;  %v1112_v28 = vsel %vm258_vm0, %v1109_v34, %v1111_v13  ;;  %v1074_v43 = vmul.f32 %v1022_v59, %v2427_v50  ;;  %2088 = vmatpush3.msra.mxu0 %v2309_v10  ;;  %v2705_v44 = vpop.permute.xlu0 %1036 }
  0xee   :  { %v1197_v18 = vadd.f32 %v2447_v24, %v1182_v32  ;;  %v1183_v15 = vadd.f32 %v1168_v29, %v1148_v58  ;;  %v1149_v12 = vadd.f32 %v1112_v28, %v1046_v6  ;;  %v1114_v11 = vsel %vm258_vm0, %v1111_v13, %v1113_v47  ;;  %2089 = vmatprep.subr.mxu0 %v2323_v14 }
  0xef   :  { %v1115_v40 = vrot.slane %v1074_v43, 4  ;;  %v1150_v38 = vadd.f32 %v1114_v11, %v1047_v46  ;;  %v1170_v19 = vmul.f32 %v1022_v59, %v2435_v62  ;;  %v1235_v51 = vrot.slane %v1208_v45, 4  ;;  %2090 = vmatpush3.msra.mxu0 %v2323_v14 }
  0xf0   :  { %v2708_v34 = vmax.f32 %v1196_v52, 0.0  ;;  %v1198_v6 = vadd.f32 %v2447_v24, %v1183_v15  ;;  %v1184_v32 = vadd.f32 %v1169_v2, %v1149_v12  ;;  %2047 = vmatmul.mubr.msk.f32.gmra.mxu0 %vm423_vm1, %v2504_v0  ;;  %v1236_v10 = vrot.slane %v1209_v1, 4  ;;  %2091 = vmatprep.subr.mxu0 %v2329_v16 }
  0xf1   :  { %v1185_v46 = vadd.f32 %v1170_v19, %v1150_v38  ;;  %2049 = vmatprep.mubr.msk.f32.mxu0 %vm423_vm1, %v2536_v37  ;;  %v1075_v13 = vmul.f32 %v1027_v61, %v2427_v50  ;;  %v1116_v58 = vsel %vm258_vm0, %v1113_v47, %v1115_v40  ;;  %v1171_v52 = vmul.f32 %v1027_v61, %v2435_v62 }
  0xf2   :  { %v1199_v29 = vadd.f32 %v2447_v24, %v1184_v32  ;;  %v1050_v2 = vmul.f32 %v1022_v59, %v2430_v56  ;;  %v1237_v28 = vsel %vm258_vm0, %v1235_v51, %v1236_v10  ;;  %v1151_v0 = vadd.f32 %v1116_v58, %v1048_v48  ;;  %v1057_v48 = vpop.permute.xlu1 %1056  ;;  %v2745_v51 = vpop.permute.xlu0 %1061  ;;  %2092 = vmatpush3.msra.mxu0 %v2329_v16 }
  0xf3   :  { %v2724_v43 = vmax.f32 %v1197_v18, 0.0  ;;  %2069 = vmatprep.mubr.msk.f32.mxu1 %vm423_vm1, %v1237_v28  ;;  %v1051_v37 = vmul.f32 %v1027_v61, %v2430_v56  ;;  %v1117_v15 = vrot.slane %v1075_v13, 4  ;;  %v1076_v47 = vmul.f32 %v1032_v26, %v2427_v50  ;;  %2093 = vmatprep.subr.mxu0 %v2353_v22 }
  0xf4   :  { %v2730_v12 = vmax.f32 %v1198_v6, 0.0  ;;  %v1200_v59 = vadd.f32 %v2447_v24, %v1185_v46  ;;  %v1186_v11 = vadd.f32 %v1171_v52, %v1151_v0  ;;  %v1239_v14 = vsel %vm258_vm0, %v1236_v10, %v1238_v55  ;;  %2050 = vmatmul.mubr.msk.f32.gmra.mxu0 %vm423_vm1, %v2560_v53 }
  0xf5   :  { %v2738_v18 = vmax.f32 %v1199_v29, 0.0  ;;  %v1052_v61 = vmul.f32 %v1032_v26, %v2430_v56  ;;  %v1118_v38 = vsel %vm258_vm0, %v1115_v40, %v1117_v15  ;;  %v1119_v19 = vrot.slane %v1076_v47, 4  ;;  %2070 = vmatmul.mubr.msk.f32.vlgmr.msra.gmra.mxu1 %vm423_vm1, %v1239_v14  ;;  %2052 = vmatprep.mubr.msk.f32.mxu0 %vm423_vm1, %v2569_v42 }
  0xf6   :  { %v1152_v6 = vadd.f32 %v1118_v38, %v1049_v17  ;;  %v1172_v32 = vmul.f32 %v1032_v26, %v2435_v62  ;;  %2114 = vmatpush3.msra.mxu1 %v2382_v31  ;;  %v1077_v53 = vmul.f32 %v2705_v44, %v2427_v50  ;;  %v1173_v10 = vmul.f32 %v2705_v44, %v2435_v62 }
  0xf7   :  { %v1201_v40 = vadd.f32 %v2447_v24, %v1186_v11  ;;  %v1120_v46 = vsel %vm258_vm0, %v1117_v15, %v1119_v19  ;;  %v2756_v13 = vmul.f32 %v1057_v48, %v2427_v50  ;;  %v1240_v42 = vrot.slane %v2708_v34, 4  ;;  %2115 = vmatprep.subr.mxu1 %v2502_v63  ;;  %v323_v15 = vpop.permute.xlu1 %322  ;;  %v967_v11 = vpop.permute.xlu0 %966  ;;  %2094 = vmatpush3.msra.mxu0 %v2353_v22 }
  0xf8   :  { %v2761_v31 = vmax.f32 %v1200_v59, 0.0  ;;  %v1187_v17 = vadd.f32 %v1172_v32, %v1152_v6  ;;  %v1121_v26 = vrot.slane %v1077_v53, 4  ;;  %v1153_v58 = vadd.f32 %v1120_v46, %v1050_v2  ;;  %2053 = vmatmul.mubr.msk.f32.gmra.mxu0 %vm423_vm1, %v2579_v4  ;;  %2116 = vmatpush3.msra.mxu1 %v2502_v63 }
  0xf9   :  { %v1123_v52 = vrot.slane %v2756_v13, 4  ;;  %v1174_v29 = vmul.f32 %v1057_v48, %v2435_v62  ;;  %v1241_v28 = vsel %vm258_vm0, %v1238_v55, %v1240_v42  ;;  %v1242_v16 = vrot.slane %v2724_v43, 4  ;;  %2055 = vmatprep.mubr.msk.f32.mxu0 %vm423_vm1, %v2596_v20  ;;  %2117 = vmatprep.subr.mxu1 %v2548_v9 }
  0xfa   :  { %v1202_v2 = vadd.f32 %v2447_v24, %v1187_v17  ;;  %v1188_v4 = vadd.f32 %v1173_v10, %v1153_v58  ;;  %v1122_v63 = vsel %vm258_vm0, %v1119_v19, %v1121_v26  ;;  %2072 = vmatprep.mubr.msk.f32.mxu1 %vm423_vm1, %v1241_v28  ;;  %v1175_v0 = vmul.f32 %v2745_v51, %v2435_v62 }
  0xfb   :  { %v2780_v47 = vmax.f32 %v1201_v40, 0.0  ;;  %v1154_v55 = vadd.f32 %v1122_v63, %v1051_v37  ;;  %v1243_v59 = vsel %vm258_vm0, %v1240_v42, %v1242_v16  ;;  %v1124_v20 = vsel %vm258_vm0, %v1121_v26, %v1123_v52  ;;  %2118 = vmatpush3.msra.mxu1 %v2548_v9 }
  0xfc   :  { %v2788_v14 = vmax.f32 %v1202_v2, 0.0  ;;  %v1203_v48 = vadd.f32 %v2447_v24, %v1188_v4  ;;  %2073 = vmatmul.mubr.msk.f32.gmra.mxu1 %vm423_vm1, %v1243_v59  ;;  %v1155_v38 = vadd.f32 %v1124_v20, %v1052_v61  ;;  %v289_v37 = vsel %vm258_vm0, %v286_v33, %v288_v5  ;;  %2056 = vmatmul.mubr.msk.f32.gmra.mxu0 %vm423_vm1, %v382_v25 }
  0xfd   :  { %v1189_v9 = vadd.f32 %v1174_v29, %v1154_v55  ;;  %v319_v19 = vadd.f32 %v289_v37, %v2529_v8  ;;  %v339_v6 = vmul.f32 %v323_v15, %v2435_v62  ;;  %v1244_v32 = vrot.slane %v2730_v12, 4  ;;  %2058 = vmatprep.mubr.msk.f32.mxu0 %vm423_vm1, %v383_v60  ;;  %2119 = vmatprep.subr.mxu1 %v2577_v3 }
  0xfe   :  { %v2807_v30 = vmax.f32 %v1203_v48, 0.0  ;;  %v1190_v33 = vadd.f32 %v1175_v0, %v1155_v38  ;;  %v1246_v39 = vrot.slane %v2738_v18, 4  ;;  %v1039_v5 = vmul.f32 %v967_v11, %v2430_v56  ;;  %2120 = vmatpush3.msra.mxu1 %v2577_v3 }
  0xff   :  { %v2813_v8 = vadd.f32 %v2447_v24, %v1189_v9  ;;  %v354_v7 = vadd.f32 %v339_v6, %v319_v19  ;;  %v1245_v25 = vsel %vm258_vm0, %v1242_v16, %v1244_v32  ;;  %v1098_v22 = vsel %vm258_vm0, %v1096_v36, %v1097_v21 }
 0x100   :  { %v1162_v23 = vmul.f32 %v2545_v41, %v2435_v62  ;;  %v2825_v60 = vadd.f32 %v2447_v24, %v1190_v33  ;;  %2075 = vmatprep.mubr.msk.f32.mxu1 %vm423_vm1, %v1245_v25  ;;  %v1247_v61 = vsel %vm258_vm0, %v1244_v32, %v1246_v39  ;;  %v1142_v53 = vadd.f32 %v1098_v22, %v1039_v5  ;;  %v2914_v33 = vld [vmem:[#allocation7] ss:$0 sm:$0xff] }
 0x101   :  { %v1219_v10 = vmax.f32 %v2813_v8, 0.0  ;;  %v369_v57 = vadd.f32 %v2447_v24, %v354_v7  ;;  %2076 = vmatmul.mubr.msk.f32.gmra.mxu1 %vm423_vm1, %v1247_v61  ;;  %v1248_v3 = vrot.slane %v2761_v31, 4  ;;  %v1250_v54 = vrot.slane %v2780_v47, 4 }
 0x102   :  { %v1177_v21 = vadd.f32 %v1162_v23, %v1142_v53  ;;  %v1220_v41 = vmax.f32 %v2825_v60, 0.0  ;;  %v1252_v40 = vrot.slane %v2788_v14, 4  ;;  %v1254_v46 = vrot.slane %v2807_v30, 4 }
 0x103   :  { %v384_v36 = vmax.f32 %v369_v57, 0.0  ;;  %v1249_v17 = vsel %vm258_vm0, %v1246_v39, %v1248_v3  ;;  %v1251_v26 = vsel %vm258_vm0, %v1248_v3, %v1250_v54  ;;  %v1256_v58 = vrot.slane %v1219_v10, 4 }
 0x104   :  { %v1192_v42 = vadd.f32 %v2447_v24, %v1177_v21  ;;  %2078 = vmatprep.mubr.msk.f32.mxu1 %vm423_vm1, %v1249_v17  ;;  %v1253_v29 = vsel %vm258_vm0, %v1250_v54, %v1252_v40  ;;  %v1255_v16 = vsel %vm258_vm0, %v1252_v40, %v1254_v46  ;;  %v1258_v2 = vrot.slane %v1220_v41, 4 }
 0x105   :  { %2059 = vmatmul.mubr.msk.f32.gmra.mxu0 %vm423_vm1, %v384_v36  ;;  %2079 = vmatmul.mubr.msk.f32.gmra.mxu1 %vm423_vm1, %v1251_v26  ;;  %v1257_v4 = vsel %vm258_vm0, %v1254_v46, %v1256_v58  ;;  %v1079_v0 = vmul.f32 %v2745_v51, %v2427_v50  ;;  %v1160_v50 = vpop.permute.xlu1 %1159 }
 0x106   :  { %v1207_v28 = vmax.f32 %v1192_v42, 0.0  ;;  %2081 = vmatprep.mubr.msk.f32.mxu1 %vm423_vm1, %v1253_v29  ;;  %v1259_v63 = vsel %vm258_vm0, %v1256_v58, %v1258_v2 }
 0x107   :  { %v1125_v35 = vrot.slane %v1079_v0, 4 }
 0x108   :  { %2095 = vmatprep.mubr.msk.f32.mxu0 %vm423_vm1, %v1207_v28 }
 0x109   :  { %2096 = vmatmul.mubr.msk.f32.vlgmr.msra.gmra.mxu0 %vm423_vm1, %v1208_v45  ;;  %2082 = vmatmul.mubr.msk.f32.gmra.mxu1 %vm423_vm1, %v1255_v16  ;;  %v1126_v49 = vsel %vm258_vm0, %v1123_v52, %v1125_v35  ;;  %v1176_v45 = vmul.f32 %v1160_v50, %v2435_v62 }
 0x10a   :  { %2098 = vmatprep.mubr.msk.f32.mxu0 %vm423_vm1, %v1209_v1  ;;  %2084 = vmatprep.mubr.msk.f32.mxu1 %vm423_vm1, %v1257_v4  ;;  %v1053_v1 = vmul.f32 %v2705_v44, %v2430_v56 }
 0x10d   :  { %2099 = vmatmul.mubr.msk.f32.gmra.mxu0 %vm423_vm1, %v2678_v27  ;;  %2085 = vmatmul.mubr.msk.f32.gmra.mxu1 %vm423_vm1, %v1259_v63 }
 0x10e   :  { %2101 = vmatprep.mubr.msk.f32.mxu0 %vm423_vm1, %v2708_v34  ;;  %2121 = vmatprep.mubr.msk.f32.mxu1 %vm423_vm1, %v2678_v27  ;;  %v1156_v27 = vadd.f32 %v1126_v49, %v1053_v1 }
 0x110   :  { %v1191_v56 = vadd.f32 %v1176_v45, %v1156_v27 }
 0x111   :  { %2102 = vmatmul.mubr.msk.f32.gmra.mxu0 %vm423_vm1, %v2724_v43  ;;  %2122 = vmatmul.mubr.msk.f32.vlgmr.msra.gmra.mxu1 %vm423_vm1, %v2708_v34 }
 0x112   :  { %2104 = vmatprep.mubr.msk.f32.mxu0 %vm423_vm1, %v2730_v12  ;;  %2124 = vmatprep.mubr.msk.f32.mxu1 %vm423_vm1, %v2724_v43  ;;  %v1206_v62 = vadd.f32 %v2447_v24, %v1191_v56 }
 0x114   :  { %v1221_v44 = vmax.f32 %v1206_v62, 0.0 }
 0x115   :  { %2105 = vmatmul.mubr.msk.f32.gmra.mxu0 %vm423_vm1, %v2738_v18  ;;  %2125 = vmatmul.mubr.msk.f32.gmra.mxu1 %vm423_vm1, %v2730_v12 }
 0x116   :  { %2107 = vmatprep.mubr.msk.f32.mxu0 %vm423_vm1, %v2761_v31  ;;  %2127 = vmatprep.mubr.msk.f32.mxu1 %vm423_vm1, %v2738_v18 }
 0x119   :  { %2108 = vmatmul.mubr.msk.f32.gmra.mxu0 %vm423_vm1, %v2780_v47  ;;  %2128 = vmatmul.mubr.msk.f32.gmra.mxu1 %vm423_vm1, %v2761_v31 }
 0x11a   :  { %2110 = vmatprep.mubr.msk.f32.mxu0 %vm423_vm1, %v2788_v14  ;;  %2130 = vmatprep.mubr.msk.f32.mxu1 %vm423_vm1, %v2780_v47 }
 0x11d   :  { %2111 = vmatmul.mubr.msk.f32.gmra.mxu0 %vm423_vm1, %v2807_v30  ;;  %2131 = vmatmul.mubr.msk.f32.gmra.mxu1 %vm423_vm1, %v2788_v14 }
 0x11e   :  { %2133 = vmatprep.mubr.msk.f32.mxu1 %vm423_vm1, %v2807_v30 }
 0x121   :  { %2134 = vmatmul.mubr.msk.f32.gmra.mxu1 %vm423_vm1, %v1219_v10 }
 0x122   :  { %2136 = vmatprep.mubr.msk.f32.mxu1 %vm423_vm1, %v1220_v41 }
 0x125   :  { %2137 = vmatmul.mubr.msk.f32.gmra.mxu1 %vm423_vm1, %v1221_v44 }
 0x18e   :  { %v1993_v34 = vpop.f32.mrf.mxu0 }
 0x190   :  { %v2019_v43 = vpop.f32.mrf.mxu1  ;;  %v514_v18 = vpop.f32.mrf.mxu0 }
 0x191   :  { %v670_v6 = vadd.f32 %v2019_v43, %v1993_v34 }
 0x192   :  { %v664_v12 = vpop.f32.mrf.mxu1 }
 0x193   :  { %v665_v7 = vadd.f32 %v664_v12, %v514_v18 }
 0x194   :  { %v2022_v51 = vpop.f32.mrf.mxu1 }
 0x196   :  { %v1996_v13 = vpop.f32.mrf.mxu0  ;;  %v674_v31 = vpop.f32.mrf.mxu1 }
 0x197   :  { %v680_v21 = vadd.f32 %v2022_v51, %v1996_v13 }
 0x198   :  { %v524_v52 = vpop.f32.mrf.mxu0  ;;  %v2025_v15 = vpop.f32.mrf.mxu1 }
 0x199   :  { %v675_v23 = vadd.f32 %v674_v31, %v524_v52 }
 0x19a   :  { %v684_v55 = vpop.f32.mrf.mxu1 }
 0x19b   :  { %v1999_v47 = vpop.f32.mrf.mxu0 }
 0x19c   :  { %v2028_v24 = vpop.f32.mrf.mxu1  ;;  %v690_v53 = vadd.f32 %v2025_v15, %v1999_v47 }
 0x19d   :  { %v534_v59 = vpop.f32.mrf.mxu0 }
 0x19e   :  { %v694_v14 = vpop.f32.mrf.mxu1  ;;  %v685_v41 = vadd.f32 %v684_v55, %v534_v59 }
 0x1a0   :  { %v2002_v20 = vpop.f32.mrf.mxu0  ;;  %v2908_v37 = vpop.f32.mrf.mxu1 }
 0x1a1   :  { %v700_v58 = vadd.f32 %v2028_v24, %v2002_v20 }
 0x1a2   :  { %v544_v11 = vpop.f32.mrf.mxu0  ;;  %v704_v32 = vpop.f32.mrf.mxu1 }
 0x1a3   :  { %v695_v43 = vadd.f32 %v694_v14, %v544_v11 }
 0x1a4   :  { %v2906_v48 = vpop.f32.mrf.mxu0  ;;  %v2916_v8 = vpop.f32.mrf.mxu1 }
 0x1a6   :  { %v554_v38 = vpop.f32.mrf.mxu0  ;;  %v2919_v10 = vpop.f32.mrf.mxu1 }
 0x1a7   :  { %v705_v12 = vadd.f32 %v704_v32, %v554_v38 }
 0x1a8   :  { %v2910_v9 = vpop.f32.mrf.mxu0 }
 0x1aa   :  { %v2912_v19 = vpop.f32.mrf.mxu0 }
 0x1ac   :  { %v2045_v30 = vpop.f32.mrf.mxu0 }
 0x1ad   :  { %v856_v39 = vadd.f32 %v2045_v30, %v670_v6 }
 0x1ae   :  { %v796_v5 = vpop.f32.mrf.mxu0 }
 0x1af   :  { %v868_v25 = vadd.f32 %v2914_v33, %v856_v39  ;;  %v855_v60 = vadd.f32 %v796_v5, %v665_v7 }
 0x1b0   :  { %v2048_v22 = vpop.f32.mrf.mxu0 }
 0x1b1   :  { %v880_v3 = vmax.f32 %v868_v25, 0.0  ;;  %v867_v42 = vadd.f32 %v2914_v33, %v855_v60  ;;  %v858_v17 = vadd.f32 %v2048_v22, %v680_v21  ;;  %v720_v60 = vadd.f32 %v2916_v8, %v2910_v9 }
 0x1b2   :  { %v806_v61 = vpop.f32.mrf.mxu0 }
 0x1b3   :  { %v857_v57 = vadd.f32 %v806_v61, %v675_v23  ;;  %v893_v2 = vrot.slane %v880_v3, 4  ;;  %v879_v1 = vmax.f32 %v867_v42, 0.0  ;;  %v870_v27 = vadd.f32 %v2914_v33, %v858_v17 }
 0x1b4   :  { %v2051_v54 = vpop.f32.mrf.mxu0  ;;  %v710_v61 = vadd.f32 %v2908_v37, %v2906_v48 }
 0x1b5   :  { %v869_v36 = vadd.f32 %v2914_v33, %v857_v57  ;;  %v2922_v40 = vpop.f32.mrf.mxu1  ;;  %v860_v46 = vadd.f32 %v2051_v54, %v690_v53  ;;  %v882_v55 = vmax.f32 %v870_v27, 0.0 }
 0x1b6   :  { %v816_v26 = vpop.f32.mrf.mxu0 }
 0x1b7   :  { %v881_v29 = vmax.f32 %v869_v36, 0.0  ;;  %v872_v28 = vadd.f32 %v2914_v33, %v860_v46  ;;  %v859_v16 = vadd.f32 %v816_v26, %v685_v41  ;;  %v2926_v4 = vpop.f32.mrf.mxu1 }
 0x1b8   :  { %v2054_v63 = vpop.f32.mrf.mxu0 }
 0x1b9   :  { %v894_v0 = vrot.slane %v881_v29, 4  ;;  %v884_v35 = vmax.f32 %v872_v28, 0.0  ;;  %v871_v50 = vadd.f32 %v2914_v33, %v859_v16  ;;  %v862_v49 = vadd.f32 %v2054_v63, %v700_v58 }
 0x1ba   :  { %v826_v45 = vpop.f32.mrf.mxu0 }
 0x1bb   :  { %v895_v56 = vsel %vm258_vm0, %v893_v2, %v894_v0  ;;  %v899_v62 = vadd.f32 %v894_v0, %v880_v3  ;;  %v909_v44 = vrot.slane %v884_v35, 4  ;;  %v883_v34 = vmax.f32 %v871_v50, 0.0 }
 0x1bc   :  { %v898_v18 = vadd.f32 %v895_v56, %v879_v1  ;;  %v2931_v51 = vpop.f32.mrf.mxu1  ;;  %v2057_v13 = vpop.f32.mrf.mxu0  ;;  %v874_v47 = vadd.f32 %v2914_v33, %v862_v49  ;;  %v861_v24 = vadd.f32 %v826_v45, %v695_v43  ;;  %v715_v3 = vadd.f32 %v2919_v10, %v2912_v19 }
 0x1bd   :  { %v901_v31 = vmul.f32 0.5, %v899_v62  ;;  %v908_v52 = vrot.slane %v883_v34, 4  ;;  %v914_v15 = vadd.f32 %v909_v44, %v883_v34  ;;  %v864_v46 = vadd.f32 %v2057_v13, %v710_v61 }
 0x1be   :  { %v900_v59 = vmul.f32 0.5, %v898_v18  ;;  %v2934_v20 = vpop.f32.mrf.mxu1  ;;  %v836_v6 = vpop.f32.mrf.mxu0  ;;  %v886_v30 = vmax.f32 %v874_v47, 0.0  ;;  %v873_v25 = vadd.f32 %v2914_v33, %v861_v24 }
 0x1bf   :  { %905 = vst.msk [vmem:[%s3048_s5 + $0x8] sm:$0xf] %vm904_vm3, %v901_v31  ;;  %v910_v11 = vsel %vm258_vm0, %v908_v52, %v909_v44  ;;  %v916_v14 = vmul.f32 0.5, %v914_v15  ;;  %v863_v38 = vadd.f32 %v836_v6, %v705_v12  ;;  %v876_v10 = vadd.f32 %v2914_v33, %v864_v46 }
 0x1c0   :  { %903 = vst.msk [vmem:[%s3048_s5] sm:$0xff] %vm902_vm2, %v900_v59  ;;  %v913_v32 = vadd.f32 %v910_v11, %v882_v55  ;;  %v921_v53 = vrot.slane %v886_v30, 4  ;;  %v885_v54 = vmax.f32 %v873_v25, 0.0 }
 0x1c1   :  { %918 = vst.msk [vmem:[%s3048_s5 + $0x14] sm:$0xf] %vm904_vm3, %v916_v14  ;;  %v2077_v39 = vpop.f32.mrf.mxu1  ;;  %v875_v5 = vadd.f32 %v2914_v33, %v863_v38  ;;  %v888_v56 = vmax.f32 %v876_v10, 0.0 }
 0x1c2   :  { %v915_v7 = vmul.f32 0.5, %v913_v32 }
 0x1c3   :  { %v887_v22 = vmax.f32 %v875_v5, 0.0  ;;  %v1370_v23 = vpop.f32.mrf.mxu1 }
 0x1c4   :  { %917 = vst.msk [vmem:[%s3048_s5 + $0xc] sm:$0xff] %vm902_vm2, %v915_v7 }
 0x1c5   :  { %v922_v57 = vrot.slane %v887_v22, 4  ;;  %v2060_v21 = vpop.f32.mrf.mxu0  ;;  %v2080_v41 = vpop.f32.mrf.mxu1 }
 0x1c6   :  { %v866_v36 = vadd.f32 %v2060_v21, %v720_v60 }
 0x1c7   :  { %v923_v9 = vsel %vm258_vm0, %v921_v53, %v922_v57  ;;  %v927_v8 = vadd.f32 %v922_v57, %v886_v30  ;;  %v846_v42 = vpop.f32.mrf.mxu0  ;;  %v2962_v26 = vpop.f32.mrf.mxu1 }
 0x1c8   :  { %v926_v17 = vadd.f32 %v923_v9, %v885_v54  ;;  %v878_v58 = vadd.f32 %v2914_v33, %v866_v36  ;;  %v865_v48 = vadd.f32 %v846_v42, %v715_v3 }
 0x1c9   :  { %v929_v37 = vmul.f32 0.5, %v927_v8  ;;  %v2097_v29 = vpop.f32.mrf.mxu0  ;;  %v2965_v2 = vpop.f32.mrf.mxu1 }
 0x1ca   :  { %v928_v28 = vmul.f32 0.5, %v926_v17  ;;  %v890_v16 = vmax.f32 %v878_v58, 0.0  ;;  %v877_v19 = vadd.f32 %v2914_v33, %v865_v48  ;;  %v1506_v62 = vadd.f32 %v2097_v29, %v2922_v40 }
 0x1cb   :  { %931 = vst.msk [vmem:[%s3048_s5 + $0x20] sm:$0xf] %vm904_vm3, %v929_v37  ;;  %v1500_v63 = vpop.f32.mrf.mxu0  ;;  %v1390_v50 = vpop.f32.mrf.mxu1 }
 0x1cc   :  { %930 = vst.msk [vmem:[%s3048_s5 + $0x18] sm:$0xff] %vm902_vm2, %v928_v28  ;;  %v935_v0 = vrot.slane %v890_v16, 4  ;;  %v889_v35 = vmax.f32 %v877_v19, 0.0  ;;  %v1501_v55 = vadd.f32 %v1500_v63, %v2926_v4 }
 0x1cd   :  { %v2100_v49 = vpop.f32.mrf.mxu0  ;;  %v2086_v45 = vpop.f32.mrf.mxu1 }
 0x1ce   :  { %v934_v1 = vrot.slane %v889_v35, 4  ;;  %v940_v27 = vadd.f32 %v935_v0, %v889_v35  ;;  %v1516_v32 = vadd.f32 %v2100_v49, %v2931_v51 }
 0x1cf   :  { %v1510_v44 = vpop.f32.mrf.mxu0  ;;  %v2979_v12 = vpop.f32.mrf.mxu1 }
 0x1d0   :  { %v936_v34 = vsel %vm258_vm0, %v934_v1, %v935_v0  ;;  %v942_v43 = vmul.f32 0.5, %v940_v27  ;;  %v1511_v59 = vadd.f32 %v1510_v44, %v2934_v20 }
 0x1d1   :  { %v939_v18 = vadd.f32 %v936_v34, %v888_v56  ;;  %v2103_v13 = vpop.f32.mrf.mxu0  ;;  %v2123_v31 = vpop.f32.mrf.mxu1 }
 0x1d2   :  { %944 = vst.msk [vmem:[%s3048_s5 + $0x2c] sm:$0xf] %vm904_vm3, %v942_v43  ;;  %v1692_v15 = vadd.f32 %v2123_v31, %v1506_v62  ;;  %v1526_v14 = vadd.f32 %v2103_v13, %v2077_v39 }
 0x1d3   :  { %v941_v52 = vmul.f32 0.5, %v939_v18  ;;  %v1520_v47 = vpop.f32.mrf.mxu0  ;;  %v1632_v40 = vpop.f32.mrf.mxu1 }
 0x1d4   :  { %v1704_v6 = vadd.f32 %v2914_v33, %v1692_v15  ;;  %v1691_v30 = vadd.f32 %v1632_v40, %v1501_v55  ;;  %v1521_v4 = vadd.f32 %v1520_v47, %v1370_v23 }
 0x1d5   :  { %943 = vst.msk [vmem:[%s3048_s5 + $0x24] sm:$0xff] %vm902_vm2, %v941_v52  ;;  %v2106_v24 = vpop.f32.mrf.mxu0  ;;  %v2126_v11 = vpop.f32.mrf.mxu1 }
 0x1d6   :  { %v1716_v22 = vmax.f32 %v1704_v6, 0.0  ;;  %v1536_v57 = vadd.f32 %v2106_v24, %v2080_v41  ;;  %v1703_v21 = vadd.f32 %v2914_v33, %v1691_v30  ;;  %v1694_v3 = vadd.f32 %v2126_v11, %v1516_v32 }
 0x1d7   :  { %v1530_v38 = vpop.f32.mrf.mxu0  ;;  %v1642_v5 = vpop.f32.mrf.mxu1 }
 0x1d8   :  { %v1693_v7 = vadd.f32 %v1642_v5, %v1511_v59  ;;  %v1729_v46 = vrot.slane %v1716_v22, 4  ;;  %v1715_v48 = vmax.f32 %v1703_v21, 0.0  ;;  %v1706_v41 = vadd.f32 %v2914_v33, %v1694_v3 }
 0x1d9   :  { %v2109_v25 = vpop.f32.mrf.mxu0  ;;  %v2129_v60 = vpop.f32.mrf.mxu1  ;;  %v1531_v37 = vadd.f32 %v1530_v38, %v2962_v26 }
 0x1da   :  { %v1705_v61 = vadd.f32 %v2914_v33, %v1693_v7  ;;  %v1696_v53 = vadd.f32 %v2129_v60, %v1526_v14  ;;  %v1718_v34 = vmax.f32 %v1706_v41, 0.0  ;;  %v1546_v26 = vadd.f32 %v2109_v25, %v2965_v2 }
 0x1db   :  { %v1540_v20 = vpop.f32.mrf.mxu0  ;;  %v1652_v54 = vpop.f32.mrf.mxu1 }
 0x1dc   :  { %v1717_v39 = vmax.f32 %v1705_v61, 0.0  ;;  %v1708_v36 = vadd.f32 %v2914_v33, %v1696_v53  ;;  %v1695_v51 = vadd.f32 %v1652_v54, %v1521_v4  ;;  %v1541_v28 = vadd.f32 %v1540_v20, %v1390_v50 }
 0x1dd   :  { %v2132_v9 = vpop.f32.mrf.mxu1  ;;  %v2112_v8 = vpop.f32.mrf.mxu0 }
 0x1de   :  { %v1730_v23 = vrot.slane %v1717_v39, 4  ;;  %v1720_v42 = vmax.f32 %v1708_v36, 0.0  ;;  %v1707_v17 = vadd.f32 %v2914_v33, %v1695_v51  ;;  %v1698_v58 = vadd.f32 %v2132_v9, %v1536_v57 }
 0x1df   :  { %v1662_v29 = vpop.f32.mrf.mxu1  ;;  %v1556_v49 = vadd.f32 %v2112_v8, %v2086_v45  ;;  %v1550_v1 = vpop.f32.mrf.mxu0 }
 0x1e0   :  { %v1731_v16 = vsel %vm258_vm0, %v1729_v46, %v1730_v23  ;;  %v1735_v19 = vadd.f32 %v1730_v23, %v1716_v22  ;;  %v1744_v10 = vrot.slane %v1720_v42, 4  ;;  %v1719_v63 = vmax.f32 %v1707_v17, 0.0 }
 0x1e1   :  { %v1734_v0 = vadd.f32 %v1731_v16, %v1715_v48  ;;  %v2135_v35 = vpop.f32.mrf.mxu1  ;;  %v1710_v44 = vadd.f32 %v2914_v33, %v1698_v58  ;;  %v1697_v18 = vadd.f32 %v1662_v29, %v1531_v37  ;;  %v1551_v52 = vadd.f32 %v1550_v1, %v2979_v12 }
 0x1e2   :  { %v1737_v27 = vmul.f32 0.5, %v1735_v19  ;;  %v1743_v56 = vrot.slane %v1719_v63, 4  ;;  %v1749_v62 = vadd.f32 %v1744_v10, %v1719_v63  ;;  %v1700_v12 = vadd.f32 %v2135_v35, %v1546_v26 }
 0x1e3   :  { %v1736_v43 = vmul.f32 0.5, %v1734_v0  ;;  %v1672_v50 = vpop.f32.mrf.mxu1  ;;  %v1722_v47 = vmax.f32 %v1710_v44, 0.0  ;;  %v1709_v24 = vadd.f32 %v2914_v33, %v1697_v18 }
 0x1e4   :  { %1880 = vst.msk [vmem:[%s3048_s5 + $0x38] sm:$0xf] %vm904_vm3, %v1737_v27  ;;  %v1745_v13 = vsel %vm258_vm0, %v1743_v56, %v1744_v10  ;;  %v1751_v45 = vmul.f32 0.5, %v1749_v62  ;;  %v1699_v31 = vadd.f32 %v1672_v50, %v1541_v28  ;;  %v1712_v25 = vadd.f32 %v2914_v33, %v1700_v12 }
 0x1e5   :  { %1879 = vst.msk [vmem:[%s3048_s5 + $0x30] sm:$0xff] %vm902_vm2, %v1736_v43  ;;  %v1748_v15 = vadd.f32 %v1745_v13, %v1718_v34  ;;  %v2138_v2 = vpop.f32.mrf.mxu1  ;;  %v1756_v32 = vrot.slane %v1722_v47, 4  ;;  %v1721_v4 = vmax.f32 %v1709_v24, 0.0 }
 0x1e6   :  { %1882 = vst.msk [vmem:[%s3048_s5 + $0x44] sm:$0xf] %vm904_vm3, %v1751_v45  ;;  %v1711_v55 = vadd.f32 %v2914_v33, %v1699_v31  ;;  %v1702_v40 = vadd.f32 %v2138_v2, %v1556_v49  ;;  %v1724_v54 = vmax.f32 %v1712_v25, 0.0 }
 0x1e7   :  { %v1750_v59 = vmul.f32 0.5, %v1748_v15  ;;  %v1682_v6 = vpop.f32.mrf.mxu1 }
 0x1e8   :  { %v1723_v11 = vmax.f32 %v1711_v55, 0.0  ;;  %v1714_v14 = vadd.f32 %v2914_v33, %v1702_v40  ;;  %v1701_v38 = vadd.f32 %v1682_v6, %v1551_v52 }
 0x1e9   :  { %1881 = vst.msk [vmem:[%s3048_s5 + $0x3c] sm:$0xff] %vm902_vm2, %v1750_v59 }
 0x1ea   :  { %v1757_v30 = vrot.slane %v1723_v11, 4  ;;  %v1726_v5 = vmax.f32 %v1714_v14, 0.0  ;;  %v1713_v7 = vadd.f32 %v2914_v33, %v1701_v38 }
 0x1ec   :  { %v1758_v22 = vsel %vm258_vm0, %v1756_v32, %v1757_v30  ;;  %v1762_v60 = vadd.f32 %v1757_v30, %v1722_v47  ;;  %v1770_v61 = vrot.slane %v1726_v5, 4  ;;  %v1725_v53 = vmax.f32 %v1713_v7, 0.0 }
 0x1ed   :  { %v1761_v57 = vadd.f32 %v1758_v22, %v1721_v4 }
 0x1ee   :  { %v1764_v20 = vmul.f32 0.5, %v1762_v60  ;;  %v1769_v21 = vrot.slane %v1725_v53, 4  ;;  %v1775_v3 = vadd.f32 %v1770_v61, %v1725_v53 }
 0x1ef   :  { %v1763_v39 = vmul.f32 0.5, %v1761_v57 }
 0x1f0   :  { %1884 = vst.msk [vmem:[%s3048_s5 + $0x50] sm:$0xf] %vm904_vm3, %v1764_v20  ;;  %v1771_v36 = vsel %vm258_vm0, %v1769_v21, %v1770_v61  ;;  %v1777_v51 = vmul.f32 0.5, %v1775_v3 }
 0x1f1   :  { %1883 = vst.msk [vmem:[%s3048_s5 + $0x48] sm:$0xff] %vm902_vm2, %v1763_v39  ;;  %v1774_v33 = vadd.f32 %v1771_v36, %v1724_v54 }
 0x1f2   :  { %1886 = vst.msk [vmem:[%s3048_s5 + $0x5c] sm:$0xf] %vm904_vm3, %v1777_v51 }
 0x1f3   :  { %v1776_v46 = vmul.f32 0.5, %v1774_v33 }
 0x1f5   :  { %1885 = vst.msk [vmem:[%s3048_s5 + $0x54] sm:$0xff] %vm902_vm2, %v1776_v46 }
 0x1f6   :  { %1784 = vsyncpa [#allocation3], 1 }
 0x1f7   :  { %1785 = vsyncpa [#allocation5], 1 }
 0x1f8   :  { %1786 = vsyncpa [#allocation8], 1 }

// kernel: forward_pallas.3
= control target key start
LH: loop header
LB: loop body
LE: loop exit
PB: predicated region body
PF: predicated region fallthrough
CT: control target
= control target key end

     0   :  { %s3685_s21 = smov 0   ;;  %s4175_s0 = inlined_call_operand.vmem [shape: f32[2,3072], index: 0, kind: input, shape index: {}]   ;;  %s4176_s1 = inlined_call_operand.vmem [shape: bf16[2,3072,64], index: 1, kind: input, shape index: {}]   ;;  %s4177_s2 = inlined_call_operand.vmem [shape: f32[2,1,64], index: 2, kind: input, shape index: {}]   ;;  %s4178_s3 = inlined_call_operand.vmem [shape: f32[2,1,64], index: 3, kind: input, shape index: {}]   ;;  %s4179_s4 = inlined_call_operand.vmem [shape: bf16[2,64,2], index: 4, kind: input, shape index: {}]   ;;  %s4180_s5 = inlined_call_operand.vmem [shape: f32[1,2], index: 5, kind: input, shape index: {}]   ;;  %s4181_s6 = inlined_call_operand.vmem [shape: f32[2,2,2], index: 6, kind: output, shape index: {}]  }
   0x1 LB: > { %s2922_s22 = sadd.s32 4294967295, %s3644_s21   ;;  %p2926_p0 = scmp.ge.s32.totalorder %s3644_s21, 1  ;;  %s3644_s21 = sphi %s3685_s21, %s16_s21  }
   0x2   : > { %p238_p1 = scmp.lt.s32.totalorder %s3644_s21, 3 }
   0x4   : > { %p239_p2 = pnand %p2926_p0, %p238_p1 }
   0x5   : > { %p278_p3 = scmp.lt.s32.totalorder (!%p239_p2), %s2922_s22, 1 }
   0x6   : > { %242 = sbr.rel (%p239_p2) target bundleno = 633 (0x279), region = 44 }
   0xb   : > { %v315_v0 = vlaneseq  ;;  %v3646_v1 = vmov 1983009808   ;;  %s4183_s22 = smov (!%p278_p3, %s2922_s22), 1  ;;  %v299_v3 = vld [vmem:[%s4175_s0] sm:$0xff]  ;;  %vm437_vm0 = vcmask 1041408   ;;  %v300_v8 = vld [vmem:[%s4175_s0 + $0x8] sm:$0xff] }
   0xc   : > { %v313_v2 = vunpack.c.l.s4 %v3646_v1  ;;  %v311_v6 = vcombine.high %v299_v3, %v299_v3  ;;  %s3415_s25 = smul.u32 1536, %s4183_s22  ;;  %v328_v13 = vcombine.high %v300_v8, %v300_v8  ;;  %v301_v26 = vld [vmem:[%s4175_s0 + $0x10] sm:$0xff]  ;;  %v302_v49 = vld [vmem:[%s4175_s0 + $0x18] sm:$0xff]  ;;  %s3133_s29 = sshll.u32 %s4183_s22, 5  ;;  %vm3649_vm1 = vmmov 0  }
   0xd   : > { %v3698_v4 = vshrl.u32 %v315_v0, 7  ;;  %v345_v40 = vcombine.high %v301_v26, %v301_v26  ;;  %v362_v63 = vcombine.high %v302_v49, %v302_v49  ;;  %s293_s8 = scalar_lea.vmem %s4179_s4, %s3133_s29  ;;  %s285_s11 = scalar_lea.vmem %s4177_s2, %s4183_s22  ;;  %vm2793_vm2 = vcmask 523264  }
   0xe   : > { %v314_v5 = vunpack.c.0.s8 %v313_v2  ;;  %s3707_s28 = scalar_lea.vmem %s4176_s1, %s3415_s25  ;;  %s288_s14 = scalar_lea.vmem %s4178_s3, %s4183_s22  ;;  %vm2837_vm3 = vcmask 9216  }
   0xf   : > { %v3428_v9 = vld [vmem:[%s3707_s28 + $0x78] sm:$0xff]   ;;  %v3432_v20 = vld [vmem:[%s3707_s28 + $0x70] sm:$0xff]   ;;  %v3436_v34 = vld [vmem:[%s3707_s28 + $0x68] sm:$0xff]   ;;  %s2930_s15 = sshll.u32 %s4183_s22, 1 }
  0x10   : > { %v3702_v7 = vsub.s32 %v314_v5, %v3698_v4  ;;  %v3429_v12 = vld [vmem:[%s3707_s28 + $0x38] sm:$0xff]   ;;  %3134 = vmatprep.subr.bf16.mxu0 %v3428_v9  ;;  %v3433_v24 = vld [vmem:[%s3707_s28 + $0x30] sm:$0xff]   ;;  %v3437_v36 = vld [vmem:[%s3707_s28 + $0x28] sm:$0xff]   ;;  %s297_s20 = scalar_lea.vmem %s4181_s6, %s2930_s15 }
  0x11   : > { %v3430_v14 = vld [vmem:[%s3707_s28 + $0xf8] sm:$0xff]   ;;  %3135 = vmatpush3.bf16.msra.mxu0 %v3429_v12  ;;  %v3434_v28 = vld [vmem:[%s3707_s28 + $0xf0] sm:$0xff]   ;;  %v3438_v38 = vld [vmem:[%s3707_s28 + $0xe8] sm:$0xff]  }
  0x12   : > { %v3714_v10 = vrot.slane %v299_v3, %v3702_v7  ;;  %v3717_v11 = vrot.slane %v311_v6, %v3702_v7  ;;  %v3728_v18 = vrot.slane %v300_v8, %v3702_v7  ;;  %v3431_v19 = vld [vmem:[%s3707_s28 + $0xb8] sm:$0xff]   ;;  %3156 = vmatprep.subr.bf16.mxu1 %v3430_v14  ;;  %3136 = vmatprep.subr.bf16.mxu0 %v3432_v20  ;;  %v3435_v32 = vld [vmem:[%s3707_s28 + $0xb0] sm:$0xff]   ;;  %v3439_v43 = vld [vmem:[%s3707_s28 + $0xa8] sm:$0xff]  }
  0x13   : > { %3157 = vmatpush3.bf16.msra.mxu1 %v3431_v19  ;;  %v3741_v29 = vrot.slane %v328_v13, %v3702_v7  ;;  %v3759_v41 = vrot.slane %v301_v26, %v3702_v7  ;;  %v3440_v45 = vld [vmem:[%s3707_s28 + $0x60] sm:$0xff]   ;;  %v3773_v51 = vrot.slane %v345_v40, %v3702_v7  ;;  %v3444_v56 = vld [vmem:[%s3707_s28 + $0x58] sm:$0xff]   ;;  %v3794_v0 = vrot.slane %v302_v49, %v3702_v7  ;;  %v3448_v3 = vld [vmem:[%s3707_s28 + $0x50] sm:$0xff]  }
  0x14   : > { %v326_v15 = vcombine.high %v3714_v10, %v3714_v10  ;;  %v438_v16 = vsel %vm437_vm0, %v3714_v10, 0.0  ;;  %v327_v17 = vcombine.high %v3717_v11, %v3717_v11  ;;  %v441_v27 = vsel %vm437_vm0, %v3717_v11, 0.0  ;;  %3158 = vmatprep.subr.bf16.mxu1 %v3434_v28  ;;  %v3441_v47 = vld [vmem:[%s3707_s28 + $0x20] sm:$0xff]   ;;  %v3445_v58 = vld [vmem:[%s3707_s28 + $0x18] sm:$0xff]   ;;  %v3449_v6 = vld [vmem:[%s3707_s28 + $0x10] sm:$0xff]  }
  0x15   : > { %v3745_v30 = vcombine.high %v3728_v18, %v3728_v18  ;;  %3137 = vmatpush3.bf16.msra.mxu0 %v3433_v24  ;;  %v445_v35 = vsel %vm437_vm0, %v3728_v18, 0.0  ;;  %v3756_v39 = vcombine.high %v3741_v29, %v3741_v29  ;;  %v449_v46 = vsel %vm437_vm0, %v3741_v29, 0.0  ;;  %v3442_v50 = vld [vmem:[%s3707_s28 + $0xe0] sm:$0xff]   ;;  %v3446_v60 = vld [vmem:[%s3707_s28 + $0xd8] sm:$0xff]   ;;  %v3450_v12 = vld [vmem:[%s3707_s28 + $0xd0] sm:$0xff]  }
  0x16   : > { %v439_v21 = vsel %vm437_vm0, %v326_v15, 0.0  ;;  %v694_v22 = vpack.c.bf16 %v326_v15, %v326_v15  ;;  %v696_v23 = vpack.c.bf16 %v327_v17, %v327_v17  ;;  %v443_v31 = vsel %vm437_vm0, %v327_v17, 0.0  ;;  %3138 = vmatprep.subr.bf16.mxu0 %v3436_v34  ;;  %v3443_v54 = vld [vmem:[%s3707_s28 + $0xa0] sm:$0xff]   ;;  %v3447_v1 = vld [vmem:[%s3707_s28 + $0x98] sm:$0xff]   ;;  %v3452_v19 = vld [vmem:[%s3707_s28 + $0x48] sm:$0xff]  }
  0x17   : > { %v440_v25 = vadd.f32 %v439_v21, %v438_v16  ;;  %3159 = vmatpush3.bf16.msra.mxu1 %v3435_v32  ;;  %v447_v42 = vsel %vm437_vm0, %v3745_v30, 0.0  ;;  %v3777_v52 = vcombine.high %v3759_v41, %v3759_v41  ;;  %v451_v53 = vsel %vm437_vm0, %v3756_v39, 0.0  ;;  %v303_v9 = vld [vmem:[%s4175_s0 + $0x20] sm:$0xff]  ;;  %v3451_v16 = vld [vmem:[%s3707_s28 + $0x90] sm:$0xff]   ;;  %v3453_v21 = vld [vmem:[%s3707_s28 + $0x8] sm:$0xff]  }
  0x18   : > { %2285 = vmatprep.mubr.bf16.mxu0 %v694_v22  ;;  %2325 = vmatprep.mubr.bf16.mxu1 %v696_v23  ;;  %v453_v57 = vsel %vm437_vm0, %v3759_v41, 0.0  ;;  %v3789_v61 = vcombine.high %v3773_v51, %v3773_v51  ;;  %v457_v5 = vsel %vm437_vm0, %v3773_v51, 0.0  ;;  %v3808_v14 = vrot.slane %v362_v63, %v3702_v7  ;;  %v3454_v23 = vld [vmem:[%s3707_s28 + $0xc8] sm:$0xff]   ;;  %v3456_v32 = vld [vmem:[%s3707_s28 + $0x40] sm:$0xff]   ;;  %v3461_v49 = vld [vmem:[%s3707_s28 + $0x138] sm:$0xff]  }
  0x19   : > { %v442_v33 = vadd.f32 %v441_v27, %v440_v25  ;;  %3139 = vmatpush3.bf16.msra.mxu0 %v3437_v36  ;;  %3160 = vmatprep.subr.bf16.mxu1 %v3438_v38  ;;  %v455_v62 = vsel %vm437_vm0, %v3777_v52, 0.0  ;;  %v3812_v15 = vcombine.high %v3794_v0, %v3794_v0  ;;  %v461_v20 = vsel %vm437_vm0, %v3794_v0, 0.0  ;;  %v3455_v28 = vld [vmem:[%s3707_s28 + $0x88] sm:$0xff]   ;;  %v3457_v34 = vld [vmem:[%s3707_s28] sm:$0xff]   ;;  %v3469_v63 = vld [vmem:[%s3707_s28 + $0x1f0] sm:$0xff]  }
  0x1a   : > { %3140 = vmatprep.subr.bf16.mxu0 %v3440_v45  ;;  %v459_v13 = vsel %vm437_vm0, %v3789_v61, 0.0  ;;  %v3822_v24 = vcombine.high %v3808_v14, %v3808_v14  ;;  %v379_v25 = vcombine.high %v303_v9, %v303_v9  ;;  %v3825_v26 = vrot.slane %v303_v9, %v3702_v7 }
  0x1b   : > { %v444_v37 = vadd.f32 %v443_v31, %v442_v33  ;;  %3161 = vmatpush3.bf16.msra.mxu1 %v3439_v43  ;;  %v463_v27 = vsel %vm437_vm0, %v3812_v15, 0.0  ;;  %v465_v33 = vsel %vm437_vm0, %v3808_v14, 0.0  ;;  %v693_v38 = vpack.c.bf16 %v3714_v10, %v3714_v10  ;;  %v3460_v10 = vld [vmem:[%s3707_s28 + $0x178] sm:$0xff]  }
  0x1c   : > { %3162 = vmatprep.subr.bf16.mxu1 %v3442_v50  ;;  %v3841_v40 = vrot.slane %v379_v25, %v3702_v7  ;;  %v467_v43 = vsel %vm437_vm0, %v3822_v24, 0.0  ;;  %v3476_v25 = vld [vmem:[%s3707_s28 + $0x120] sm:$0xff]  }
  0x1d   : > { %v446_v44 = vadd.f32 %v445_v35, %v444_v37  ;;  %3141 = vmatpush3.bf16.msra.mxu0 %v3441_v47  ;;  %v304_v35 = vld [vmem:[%s4175_s0 + $0x28] sm:$0xff]  ;;  %v3458_v37 = vld [vmem:[%s3707_s28 + $0xc0] sm:$0xff]   ;;  %v695_v47 = vpack.c.bf16 %v3717_v11, %v3717_v11 }
  0x1e   : > { %3142 = vmatprep.subr.bf16.mxu0 %v3444_v56  ;;  %v3866_v11 = vrot.slane %v304_v35, %v3702_v7 }
  0x1f   : > { %v448_v48 = vadd.f32 %v447_v42, %v446_v44  ;;  %3163 = vmatpush3.bf16.msra.mxu1 %v3443_v54  ;;  %v3845_v42 = vcombine.high %v3825_v26, %v3825_v26  ;;  %v3459_v44 = vld [vmem:[%s3707_s28 + $0x80] sm:$0xff]   ;;  %v3863_v54 = vcombine.high %v3841_v40, %v3841_v40 }
  0x20   : > { %3164 = vmatprep.subr.bf16.mxu1 %v3446_v60  ;;  %v3468_v60 = vld [vmem:[%s3707_s28 + $0x130] sm:$0xff]   ;;  %v477_v9 = vsel %vm437_vm0, %v3866_v11, 0.0 }
  0x21   : > { %v450_v55 = vadd.f32 %v449_v46, %v448_v48  ;;  %3143 = vmatpush3.bf16.msra.mxu0 %v3445_v58  ;;  %v698_v46 = vpack.c.bf16 %v3745_v30, %v3745_v30  ;;  %v469_v48 = vsel %vm437_vm0, %v3825_v26, 0.0  ;;  %v3465_v30 = vld [vmem:[%s3707_s28 + $0x1f8] sm:$0xff]   ;;  %v471_v56 = vsel %vm437_vm0, %v3845_v42, 0.0 }
  0x22   : > { %3144 = vmatprep.subr.bf16.mxu0 %v3448_v3  ;;  %v475_v3 = vsel %vm437_vm0, %v3863_v54, 0.0 }
  0x23   : > { %v452_v59 = vadd.f32 %v451_v53, %v450_v55  ;;  %3165 = vmatpush3.bf16.msra.mxu1 %v3447_v1  ;;  %v700_v53 = vpack.c.bf16 %v3756_v39, %v3756_v39  ;;  %v396_v55 = vcombine.high %v304_v35, %v304_v35  ;;  %v3467_v39 = vld [vmem:[%s3707_s28 + $0x170] sm:$0xff]  }
  0x24   : > { %3166 = vmatprep.subr.bf16.mxu1 %v3450_v12  ;;  %v3472_v12 = vld [vmem:[%s3707_s28 + $0x128] sm:$0xff]  }
  0x25   : > { %v454_v2 = vadd.f32 %v453_v57, %v452_v59  ;;  %3145 = vmatpush3.bf16.msra.mxu0 %v3449_v6  ;;  %v3466_v57 = vld [vmem:[%s3707_s28 + $0x1b8] sm:$0xff]   ;;  %v473_v59 = vsel %vm437_vm0, %v3841_v40, 0.0  ;;  %v3877_v1 = vrot.slane %v396_v55, %v3702_v7  ;;  %v697_v55 = vpack.c.bf16 %v3728_v18, %v3728_v18 }
  0x26   : > { %3146 = vmatprep.subr.bf16.mxu0 %v3452_v19  ;;  %v3500_v18 = vld [vmem:[%s3707_s28 + $0x2f8] sm:$0xff]  }
  0x27   : > { %v456_v8 = vadd.f32 %v455_v62, %v454_v2  ;;  %3167 = vmatpush3.bf16.msra.mxu1 %v3451_v16  ;;  %v3881_v2 = vcombine.high %v3866_v11, %v3866_v11  ;;  %v3473_v16 = vld [vmem:[%s3707_s28 + $0x1e8] sm:$0xff]  }
  0x28   : > { %3168 = vmatprep.subr.bf16.mxu1 %v3454_v23  ;;  %v481_v23 = vsel %vm437_vm0, %v3877_v1, 0.0 }
  0x29   : > { %v458_v17 = vadd.f32 %v457_v5, %v456_v8  ;;  %3147 = vmatpush3.bf16.msra.mxu0 %v3453_v21  ;;  %v3470_v5 = vld [vmem:[%s3707_s28 + $0x1b0] sm:$0xff]   ;;  %v3471_v8 = vld [vmem:[%s3707_s28 + $0x168] sm:$0xff]   ;;  %v479_v19 = vsel %vm437_vm0, %v3881_v2, 0.0 }
  0x2a   : > { %3148 = vmatprep.subr.bf16.mxu0 %v3456_v32  ;;  %v3478_v32 = vld [vmem:[%s3707_s28 + $0x1a0] sm:$0xff]  }
  0x2b   : > { %v460_v22 = vadd.f32 %v459_v13, %v458_v17  ;;  %3169 = vmatpush3.bf16.msra.mxu1 %v3455_v28  ;;  %v3893_v17 = vcombine.high %v3877_v1, %v3877_v1  ;;  %v3477_v28 = vld [vmem:[%s3707_s28 + $0x1e0] sm:$0xff]  }
  0x2c   : > { %3170 = vmatprep.subr.bf16.mxu1 %v3458_v37  ;;  %v3484_v37 = vld [vmem:[%s3707_s28 + $0x1d8] sm:$0xff]  }
  0x2d   : > { %v462_v31 = vadd.f32 %v461_v20, %v460_v22  ;;  %3149 = vmatpush3.bf16.msra.mxu0 %v3457_v34  ;;  %v3474_v20 = vld [vmem:[%s3707_s28 + $0x1a8] sm:$0xff]   ;;  %v3475_v22 = vld [vmem:[%s3707_s28 + $0x160] sm:$0xff]   ;;  %v3482_v34 = vld [vmem:[%s3707_s28 + $0x158] sm:$0xff]  }
  0x2e   : > { %3178 = vmatprep.subr.bf16.mxu0 %v3460_v10  ;;  %v3490_v10 = vld [vmem:[%s3707_s28 + $0x148] sm:$0xff]  }
  0x2f   : > { %v464_v36 = vadd.f32 %v463_v27, %v462_v31  ;;  %3171 = vmatpush3.bf16.msra.mxu1 %v3459_v44  ;;  %v483_v31 = vsel %vm437_vm0, %v3893_v17, 0.0  ;;  %v3487_v44 = vld [vmem:[%s3707_s28 + $0x110] sm:$0xff]  }
  0x30   : > { %2286 = vmatmul.mubr.bf16.vlgmr.msra.gmra.mxu0 %v693_v38  ;;  %3200 = vmatprep.subr.bf16.mxu1 %v3465_v30  ;;  %v3485_v38 = vld [vmem:[%s3707_s28 + $0x198] sm:$0xff]   ;;  %v3496_v30 = vld [vmem:[%s3707_s28 + $0x1c0] sm:$0xff]  }
  0x31   : > { %v466_v45 = vadd.f32 %v465_v33, %v464_v36  ;;  %3179 = vmatpush3.bf16.msra.mxu0 %v3461_v49  ;;  %2365 = vmatprep.mubr.bf16.mxu0 %v698_v46  ;;  %v3483_v36 = vld [vmem:[%s3707_s28 + $0x118] sm:$0xff]   ;;  %v3489_v46 = vld [vmem:[%s3707_s28 + $0x190] sm:$0xff]   ;;  %v3493_v49 = vld [vmem:[%s3707_s28 + $0x188] sm:$0xff]  }
  0x32   : > { %2326 = vmatmul.mubr.bf16.vlgmr.msra.gmra.mxu1 %v695_v47  ;;  %3180 = vmatprep.subr.bf16.mxu0 %v3467_v39  ;;  %v3491_v47 = vld [vmem:[%s3707_s28 + $0x108] sm:$0xff]   ;;  %v699_v39 = vpack.c.bf16 %v3741_v29, %v3741_v29  ;;  %v3502_v29 = vld [vmem:[%s3707_s28 + $0x270] sm:$0xff]  }
  0x33   : > { %v468_v50 = vadd.f32 %v467_v43, %v466_v45  ;;  %3201 = vmatpush3.bf16.msra.mxu1 %v3466_v57  ;;  %2405 = vmatprep.mubr.bf16.mxu1 %v700_v53  ;;  %v3486_v43 = vld [vmem:[%s3707_s28 + $0x150] sm:$0xff]   ;;  %v3495_v53 = vld [vmem:[%s3707_s28 + $0x100] sm:$0xff]   ;;  %v702_v57 = vpack.c.bf16 %v3777_v52, %v3777_v52  ;;  %v3501_v52 = vld [vmem:[%s3707_s28 + $0x2b8] sm:$0xff]  }
  0x34   : > { %3202 = vmatprep.subr.bf16.mxu1 %v3469_v63  ;;  %v3488_v45 = vld [vmem:[%s3707_s28 + $0x1d0] sm:$0xff]  }
  0x35   : > { %v470_v58 = vadd.f32 %v469_v48, %v468_v50  ;;  %3181 = vmatpush3.bf16.msra.mxu0 %v3468_v60  ;;  %v3492_v48 = vld [vmem:[%s3707_s28 + $0x1c8] sm:$0xff]   ;;  %v3494_v50 = vld [vmem:[%s3707_s28 + $0x140] sm:$0xff]   ;;  %v704_v60 = vpack.c.bf16 %v3789_v61, %v3789_v61  ;;  %v3504_v61 = vld [vmem:[%s3707_s28 + $0x2f0] sm:$0xff]  }
  0x36   : > { %3182 = vmatprep.subr.bf16.mxu0 %v3471_v8  ;;  %v3505_v63 = vld [vmem:[%s3707_s28 + $0x2b0] sm:$0xff]   ;;  %v3509_v8 = vld [vmem:[%s3707_s28 + $0x2a8] sm:$0xff]  }
  0x37   : > { %v472_v62 = vadd.f32 %v471_v56, %v470_v58  ;;  %3203 = vmatpush3.bf16.msra.mxu1 %v3470_v5  ;;  %v3497_v56 = vld [vmem:[%s3707_s28 + $0x180] sm:$0xff]   ;;  %v3498_v58 = vld [vmem:[%s3707_s28 + $0x278] sm:$0xff]   ;;  %v3507_v5 = vld [vmem:[%s3707_s28 + $0x228] sm:$0xff]  }
  0x38   : > { %3204 = vmatprep.subr.bf16.mxu1 %v3473_v16  ;;  %v3513_v16 = vld [vmem:[%s3707_s28 + $0x2a0] sm:$0xff]  }
  0x39   : > { %v474_v6 = vadd.f32 %v473_v59, %v472_v62  ;;  %3183 = vmatpush3.bf16.msra.mxu0 %v3472_v12  ;;  %v3499_v59 = vld [vmem:[%s3707_s28 + $0x238] sm:$0xff]   ;;  %v3503_v62 = vld [vmem:[%s3707_s28 + $0x230] sm:$0xff]   ;;  %v3511_v12 = vld [vmem:[%s3707_s28 + $0x220] sm:$0xff]  }
  0x3a   : > { %3184 = vmatprep.subr.bf16.mxu0 %v3475_v22  ;;  %v3517_v22 = vld [vmem:[%s3707_s28 + $0x298] sm:$0xff]  }
  0x3b   : > { %v476_v13 = vadd.f32 %v475_v3, %v474_v6  ;;  %3205 = vmatpush3.bf16.msra.mxu1 %v3474_v20  ;;  %v3506_v3 = vld [vmem:[%s3707_s28 + $0x268] sm:$0xff]   ;;  %v3515_v20 = vld [vmem:[%s3707_s28 + $0x218] sm:$0xff]  }
  0x3c   : > { %3206 = vmatprep.subr.bf16.mxu1 %v3477_v28  ;;  %v3508_v6 = vld [vmem:[%s3707_s28 + $0x2e8] sm:$0xff]   ;;  %v3521_v28 = vld [vmem:[%s3707_s28 + $0x290] sm:$0xff]  }
  0x3d   : > { %v478_v21 = vadd.f32 %v477_v9, %v476_v13  ;;  %3185 = vmatpush3.bf16.msra.mxu0 %v3476_v25  ;;  %v3510_v9 = vld [vmem:[%s3707_s28 + $0x260] sm:$0xff]   ;;  %v3519_v25 = vld [vmem:[%s3707_s28 + $0x210] sm:$0xff]  }
  0x3e   : > { %3186 = vmatprep.subr.bf16.mxu0 %v3482_v34  ;;  %v3512_v13 = vld [vmem:[%s3707_s28 + $0x2e0] sm:$0xff]   ;;  %v3525_v34 = vld [vmem:[%s3707_s28 + $0x288] sm:$0xff]  }
  0x3f   : > { %v480_v27 = vadd.f32 %v479_v19, %v478_v21  ;;  %3207 = vmatpush3.bf16.msra.mxu1 %v3478_v32  ;;  %v3514_v19 = vld [vmem:[%s3707_s28 + $0x258] sm:$0xff]   ;;  %v3523_v32 = vld [vmem:[%s3707_s28 + $0x208] sm:$0xff]  }
  0x40   : > { %3208 = vmatprep.subr.bf16.mxu1 %v3484_v37  ;;  %v3516_v21 = vld [vmem:[%s3707_s28 + $0x2d8] sm:$0xff]   ;;  %v3528_v37 = vld [vmem:[%s3707_s28 + $0x2c0] sm:$0xff]  }
  0x41   : > { %v482_v33 = vadd.f32 %v481_v23, %v480_v27  ;;  %3187 = vmatpush3.bf16.msra.mxu0 %v3483_v36  ;;  %v3518_v23 = vld [vmem:[%s3707_s28 + $0x250] sm:$0xff]   ;;  %v3527_v36 = vld [vmem:[%s3707_s28 + $0x200] sm:$0xff]  }
  0x42   : > { %3188 = vmatprep.subr.bf16.mxu0 %v3486_v43  ;;  %v3520_v27 = vld [vmem:[%s3707_s28 + $0x2d0] sm:$0xff]   ;;  %v3529_v43 = vld [vmem:[%s3707_s28 + $0x280] sm:$0xff]  }
  0x43   : > { %v484_v35 = vadd.f32 %v483_v31, %v482_v33  ;;  %3209 = vmatpush3.bf16.msra.mxu1 %v3485_v38  ;;  %v3522_v31 = vld [vmem:[%s3707_s28 + $0x248] sm:$0xff]   ;;  %v701_v38 = vpack.c.bf16 %v3759_v41, %v3759_v41  ;;  %v3532_v41 = vld [vmem:[%s3707_s28 + $0x3f8] sm:$0xff]  }
  0x44   : > { %3210 = vmatprep.subr.bf16.mxu1 %v3488_v45  ;;  %v3524_v33 = vld [vmem:[%s3707_s28 + $0x2c8] sm:$0xff]   ;;  %v3530_v45 = vld [vmem:[%s3707_s28 + $0x378] sm:$0xff]  }
  0x45   : > { %485 = vadd.xlane.f32.xlu0 %v484_v35  ;;  %3189 = vmatpush3.bf16.msra.mxu0 %v3487_v44  ;;  %v3526_v35 = vld [vmem:[%s3707_s28 + $0x240] sm:$0xff]   ;;  %v706_v44 = vpack.c.bf16 %v3812_v15, %v3812_v15  ;;  %v3533_v15 = vld [vmem:[%s3707_s28 + $0x3b8] sm:$0xff]  }
  0x46   : > { %3190 = vmatprep.subr.bf16.mxu0 %v3490_v10  ;;  %v3531_v10 = vld [vmem:[%s3707_s28 + $0x338] sm:$0xff]  }
  0x47   : > { %3211 = vmatpush3.bf16.msra.mxu1 %v3489_v46  ;;  %v703_v46 = vpack.c.bf16 %v3773_v51, %v3773_v51  ;;  %v3534_v51 = vld [vmem:[%s3707_s28 + $0x370] sm:$0xff]  }
  0x48   : > { %3212 = vmatprep.subr.bf16.mxu1 %v3492_v48  ;;  %v3535_v48 = vld [vmem:[%s3707_s28 + $0x330] sm:$0xff]  }
  0x49   : > { %3191 = vmatpush3.bf16.msra.mxu0 %v3491_v47  ;;  %v708_v47 = vpack.c.bf16 %v3822_v24, %v3822_v24  ;;  %v3536_v24 = vld [vmem:[%s3707_s28 + $0x3f0] sm:$0xff]  }
  0x4a   : > { %3192 = vmatprep.subr.bf16.mxu0 %v3494_v50  ;;  %v3538_v50 = vld [vmem:[%s3707_s28 + $0x368] sm:$0xff]  }
  0x4b   : > { %3213 = vmatpush3.bf16.msra.mxu1 %v3493_v49  ;;  %v3537_v49 = vld [vmem:[%s3707_s28 + $0x3b0] sm:$0xff]  }
  0x4c   : > { %3214 = vmatprep.subr.bf16.mxu1 %v3496_v30  ;;  %v3540_v30 = vld [vmem:[%s3707_s28 + $0x3e8] sm:$0xff]  }
  0x4d   : > { %3193 = vmatpush3.bf16.msra.mxu0 %v3495_v53  ;;  %v3539_v53 = vld [vmem:[%s3707_s28 + $0x328] sm:$0xff]  }
  0x4e   : > { %3222 = vmatprep.subr.bf16.mxu0 %v3498_v58  ;;  %v3544_v58 = vld [vmem:[%s3707_s28 + $0x3e0] sm:$0xff]  }
  0x4f   : > { %3215 = vmatpush3.bf16.msra.mxu1 %v3497_v56  ;;  %v3542_v56 = vld [vmem:[%s3707_s28 + $0x360] sm:$0xff]  }
  0x50   : > { %2366 = vmatmul.mubr.bf16.vlgmr.msra.gmra.mxu0 %v697_v55  ;;  %3244 = vmatprep.subr.bf16.mxu1 %v3500_v18  ;;  %v3541_v55 = vld [vmem:[%s3707_s28 + $0x3a8] sm:$0xff]   ;;  %v3548_v18 = vld [vmem:[%s3707_s28 + $0x3d8] sm:$0xff]  }
  0x51   : > { %3223 = vmatpush3.bf16.msra.mxu0 %v3499_v59  ;;  %2445 = vmatprep.mubr.bf16.mxu0 %v702_v57  ;;  %v3543_v57 = vld [vmem:[%s3707_s28 + $0x320] sm:$0xff]   ;;  %v3546_v59 = vld [vmem:[%s3707_s28 + $0x358] sm:$0xff]  }
  0x52   : > { %2406 = vmatmul.mubr.bf16.vlgmr.msra.gmra.mxu1 %v699_v39  ;;  %3224 = vmatprep.subr.bf16.mxu0 %v3502_v29  ;;  %v3545_v39 = vld [vmem:[%s3707_s28 + $0x3a0] sm:$0xff]   ;;  %v3550_v29 = vld [vmem:[%s3707_s28 + $0x350] sm:$0xff]  }
  0x53   : > { %3245 = vmatpush3.bf16.msra.mxu1 %v3501_v52  ;;  %2485 = vmatprep.mubr.bf16.mxu1 %v704_v60  ;;  %v3547_v60 = vld [vmem:[%s3707_s28 + $0x318] sm:$0xff]  }
  0x54   : > { %3246 = vmatprep.subr.bf16.mxu1 %v3504_v61  ;;  %v3549_v52 = vld [vmem:[%s3707_s28 + $0x398] sm:$0xff]   ;;  %v3552_v61 = vld [vmem:[%s3707_s28 + $0x3d0] sm:$0xff]  }
  0x55   : > { %3225 = vmatpush3.bf16.msra.mxu0 %v3503_v62  ;;  %v3551_v62 = vld [vmem:[%s3707_s28 + $0x310] sm:$0xff]  }
  0x56   : > { %3226 = vmatprep.subr.bf16.mxu0 %v3506_v3  ;;  %v3554_v3 = vld [vmem:[%s3707_s28 + $0x348] sm:$0xff]  }
  0x57   : > { %3247 = vmatpush3.bf16.msra.mxu1 %v3505_v63  ;;  %v3553_v63 = vld [vmem:[%s3707_s28 + $0x390] sm:$0xff]  }
  0x58   : > { %3248 = vmatprep.subr.bf16.mxu1 %v3508_v6  ;;  %v3556_v6 = vld [vmem:[%s3707_s28 + $0x3c8] sm:$0xff]  }
  0x59   : > { %3227 = vmatpush3.bf16.msra.mxu0 %v3507_v5  ;;  %v3555_v5 = vld [vmem:[%s3707_s28 + $0x308] sm:$0xff]  }
  0x5a   : > { %3228 = vmatprep.subr.bf16.mxu0 %v3510_v9  ;;  %v3558_v9 = vld [vmem:[%s3707_s28 + $0x340] sm:$0xff]  }
  0x5b   : > { %3249 = vmatpush3.bf16.msra.mxu1 %v3509_v8  ;;  %v3557_v8 = vld [vmem:[%s3707_s28 + $0x388] sm:$0xff]  }
  0x5c   : > { %3250 = vmatprep.subr.bf16.mxu1 %v3512_v13  ;;  %v3560_v13 = vld [vmem:[%s3707_s28 + $0x3c0] sm:$0xff]  }
  0x5d   : > { %3229 = vmatpush3.bf16.msra.mxu0 %v3511_v12  ;;  %v3559_v12 = vld [vmem:[%s3707_s28 + $0x300] sm:$0xff]  }
  0x5e   : > { %3230 = vmatprep.subr.bf16.mxu0 %v3514_v19  ;;  %v3561_v19 = vld [vmem:[%s3707_s28 + $0x380] sm:$0xff]  }
  0x5f   : > { %3251 = vmatpush3.bf16.msra.mxu1 %v3513_v16  ;;  %v705_v16 = vpack.c.bf16 %v3794_v0, %v3794_v0  ;;  %v3564_v0 = vld [vmem:[%s3707_s28 + $0x4f8] sm:$0xff]  }
  0x60   : > { %3252 = vmatprep.subr.bf16.mxu1 %v3516_v21  ;;  %v3562_v21 = vld [vmem:[%s3707_s28 + $0x478] sm:$0xff]  }
  0x61   : > { %3231 = vmatpush3.bf16.msra.mxu0 %v3515_v20  ;;  %v710_v20 = vpack.c.bf16 %v3845_v42, %v3845_v42  ;;  %v3565_v42 = vld [vmem:[%s3707_s28 + $0x4b8] sm:$0xff]  }
  0x62   : > { %3232 = vmatprep.subr.bf16.mxu0 %v3518_v23  ;;  %v3563_v23 = vld [vmem:[%s3707_s28 + $0x438] sm:$0xff]  }
  0x63   : > { %3253 = vmatpush3.bf16.msra.mxu1 %v3517_v22  ;;  %v707_v22 = vpack.c.bf16 %v3808_v14, %v3808_v14  ;;  %v3566_v14 = vld [vmem:[%s3707_s28 + $0x470] sm:$0xff]  }
  0x64   : > { %3254 = vmatprep.subr.bf16.mxu1 %v3520_v27  ;;  %v3567_v27 = vld [vmem:[%s3707_s28 + $0x430] sm:$0xff]  }
  0x65   : > { %3233 = vmatpush3.bf16.msra.mxu0 %v3519_v25  ;;  %v712_v25 = vpack.c.bf16 %v3863_v54, %v3863_v54  ;;  %v3568_v54 = vld [vmem:[%s3707_s28 + $0x4f0] sm:$0xff]  }
  0x66   : > { %3234 = vmatprep.subr.bf16.mxu0 %v3522_v31  ;;  %v3570_v31 = vld [vmem:[%s3707_s28 + $0x468] sm:$0xff]  }
  0x67   : > { %3255 = vmatpush3.bf16.msra.mxu1 %v3521_v28  ;;  %v3569_v28 = vld [vmem:[%s3707_s28 + $0x4b0] sm:$0xff]  }
  0x68   : > { %3256 = vmatprep.subr.bf16.mxu1 %v3524_v33  ;;  %v3572_v33 = vld [vmem:[%s3707_s28 + $0x4e8] sm:$0xff]  }
  0x69   : > { %3235 = vmatpush3.bf16.msra.mxu0 %v3523_v32  ;;  %v3571_v32 = vld [vmem:[%s3707_s28 + $0x428] sm:$0xff]  }
  0x6a   : > { %3236 = vmatprep.subr.bf16.mxu0 %v3526_v35  ;;  %v3574_v35 = vld [vmem:[%s3707_s28 + $0x460] sm:$0xff]  }
  0x6b   : > { %3257 = vmatpush3.bf16.msra.mxu1 %v3525_v34  ;;  %v3573_v34 = vld [vmem:[%s3707_s28 + $0x4a8] sm:$0xff]  }
  0x6c   : > { %3258 = vmatprep.subr.bf16.mxu1 %v3528_v37  ;;  %v3576_v37 = vld [vmem:[%s3707_s28 + $0x4e0] sm:$0xff]  }
  0x6d   : > { %3237 = vmatpush3.bf16.msra.mxu0 %v3527_v36  ;;  %v3575_v36 = vld [vmem:[%s3707_s28 + $0x420] sm:$0xff]  }
  0x6e   : > { %3266 = vmatprep.subr.bf16.mxu0 %v3530_v45  ;;  %v3580_v45 = vld [vmem:[%s3707_s28 + $0x4d8] sm:$0xff]  }
  0x6f   : > { %3259 = vmatpush3.bf16.msra.mxu1 %v3529_v43  ;;  %v3578_v43 = vld [vmem:[%s3707_s28 + $0x458] sm:$0xff]  }
  0x70   : > { %2446 = vmatmul.mubr.bf16.vlgmr.msra.gmra.mxu0 %v701_v38  ;;  %3288 = vmatprep.subr.bf16.mxu1 %v3532_v41  ;;  %v3577_v38 = vld [vmem:[%s3707_s28 + $0x4a0] sm:$0xff]   ;;  %v3584_v41 = vld [vmem:[%s3707_s28 + $0x4d0] sm:$0xff]  }
  0x71   : > { %3267 = vmatpush3.bf16.msra.mxu0 %v3531_v10  ;;  %2525 = vmatprep.mubr.bf16.mxu0 %v706_v44  ;;  %v3579_v44 = vld [vmem:[%s3707_s28 + $0x418] sm:$0xff]   ;;  %v3582_v10 = vld [vmem:[%s3707_s28 + $0x450] sm:$0xff]  }
  0x72   : > { %2486 = vmatmul.mubr.bf16.vlgmr.msra.gmra.mxu1 %v703_v46  ;;  %3268 = vmatprep.subr.bf16.mxu0 %v3534_v51  ;;  %v3581_v46 = vld [vmem:[%s3707_s28 + $0x498] sm:$0xff]   ;;  %v3586_v51 = vld [vmem:[%s3707_s28 + $0x448] sm:$0xff]  }
  0x73   : > { %3289 = vmatpush3.bf16.msra.mxu1 %v3533_v15  ;;  %2565 = vmatprep.mubr.bf16.mxu1 %v708_v47  ;;  %v3583_v47 = vld [vmem:[%s3707_s28 + $0x410] sm:$0xff]  }
  0x74   : > { %3290 = vmatprep.subr.bf16.mxu1 %v3536_v24  ;;  %v3585_v15 = vld [vmem:[%s3707_s28 + $0x490] sm:$0xff]   ;;  %v3588_v24 = vld [vmem:[%s3707_s28 + $0x4c8] sm:$0xff]  }
  0x75   : > { %3269 = vmatpush3.bf16.msra.mxu0 %v3535_v48  ;;  %v3587_v48 = vld [vmem:[%s3707_s28 + $0x408] sm:$0xff]  }
  0x76   : > { %3270 = vmatprep.subr.bf16.mxu0 %v3538_v50  ;;  %v3590_v50 = vld [vmem:[%s3707_s28 + $0x440] sm:$0xff]  }
  0x77   : > { %3291 = vmatpush3.bf16.msra.mxu1 %v3537_v49  ;;  %v3589_v49 = vld [vmem:[%s3707_s28 + $0x488] sm:$0xff]  }
  0x78   : > { %3292 = vmatprep.subr.bf16.mxu1 %v3540_v30  ;;  %v3592_v30 = vld [vmem:[%s3707_s28 + $0x4c0] sm:$0xff]  }
  0x79   : > { %3271 = vmatpush3.bf16.msra.mxu0 %v3539_v53  ;;  %v3591_v53 = vld [vmem:[%s3707_s28 + $0x400] sm:$0xff]  }
  0x7a   : > { %3272 = vmatprep.subr.bf16.mxu0 %v3542_v56  ;;  %v3593_v56 = vld [vmem:[%s3707_s28 + $0x480] sm:$0xff]  }
  0x7b   : > { %3293 = vmatpush3.bf16.msra.mxu1 %v3541_v55  ;;  %v709_v55 = vpack.c.bf16 %v3825_v26, %v3825_v26  ;;  %v3596_v26 = vld [vmem:[%s3707_s28 + $0x5f8] sm:$0xff]  }
  0x7c   : > { %3294 = vmatprep.subr.bf16.mxu1 %v3544_v58  ;;  %v3594_v58 = vld [vmem:[%s3707_s28 + $0x578] sm:$0xff]  }
  0x7d   : > { %3273 = vmatpush3.bf16.msra.mxu0 %v3543_v57  ;;  %v714_v57 = vpack.c.bf16 %v3881_v2, %v3881_v2  ;;  %v3597_v2 = vld [vmem:[%s3707_s28 + $0x5b8] sm:$0xff]  }
  0x7e   : > { %3274 = vmatprep.subr.bf16.mxu0 %v3546_v59  ;;  %v3595_v59 = vld [vmem:[%s3707_s28 + $0x538] sm:$0xff]  }
  0x7f   : > { %3295 = vmatpush3.bf16.msra.mxu1 %v3545_v39  ;;  %v711_v39 = vpack.c.bf16 %v3841_v40, %v3841_v40  ;;  %v3598_v40 = vld [vmem:[%s3707_s28 + $0x570] sm:$0xff]  }
  0x80   : > { %3296 = vmatprep.subr.bf16.mxu1 %v3548_v18  ;;  %v3599_v18 = vld [vmem:[%s3707_s28 + $0x530] sm:$0xff]  }
  0x81   : > { %3275 = vmatpush3.bf16.msra.mxu0 %v3547_v60  ;;  %v716_v60 = vpack.c.bf16 %v3893_v17, %v3893_v17  ;;  %v3600_v17 = vld [vmem:[%s3707_s28 + $0x5f0] sm:$0xff]  }
  0x82   : > { %3276 = vmatprep.subr.bf16.mxu0 %v3550_v29  ;;  %v3602_v29 = vld [vmem:[%s3707_s28 + $0x568] sm:$0xff]  }
  0x83   : > { %3297 = vmatpush3.bf16.msra.mxu1 %v3549_v52  ;;  %v3601_v52 = vld [vmem:[%s3707_s28 + $0x5b0] sm:$0xff]  }
  0x84   : > { %3298 = vmatprep.subr.bf16.mxu1 %v3552_v61  ;;  %v3604_v61 = vld [vmem:[%s3707_s28 + $0x5e8] sm:$0xff]  }
  0x85   : > { %3277 = vmatpush3.bf16.msra.mxu0 %v3551_v62  ;;  %v3603_v62 = vld [vmem:[%s3707_s28 + $0x528] sm:$0xff]  }
  0x86   : > { %3278 = vmatprep.subr.bf16.mxu0 %v3554_v3  ;;  %v3606_v3 = vld [vmem:[%s3707_s28 + $0x560] sm:$0xff]  }
  0x87   : > { %3299 = vmatpush3.bf16.msra.mxu1 %v3553_v63  ;;  %v3605_v63 = vld [vmem:[%s3707_s28 + $0x5a8] sm:$0xff]  }
  0x88   : > { %3300 = vmatprep.subr.bf16.mxu1 %v3556_v6  ;;  %v3608_v6 = vld [vmem:[%s3707_s28 + $0x5e0] sm:$0xff]  }
  0x89   : > { %3279 = vmatpush3.bf16.msra.mxu0 %v3555_v5  ;;  %v3607_v5 = vld [vmem:[%s3707_s28 + $0x520] sm:$0xff]  }
  0x8a   : > { %3280 = vmatprep.subr.bf16.mxu0 %v3558_v9  ;;  %v3610_v9 = vld [vmem:[%s3707_s28 + $0x558] sm:$0xff]  }
  0x8b   : > { %3301 = vmatpush3.bf16.msra.mxu1 %v3557_v8  ;;  %v3609_v8 = vld [vmem:[%s3707_s28 + $0x5a0] sm:$0xff]  }
  0x8c   : > { %3302 = vmatprep.subr.bf16.mxu1 %v3560_v13  ;;  %v3612_v13 = vld [vmem:[%s3707_s28 + $0x5d8] sm:$0xff]  }
  0x8d   : > { %3281 = vmatpush3.bf16.msra.mxu0 %v3559_v12  ;;  %v3611_v12 = vld [vmem:[%s3707_s28 + $0x518] sm:$0xff]  }
  0x8e   : > { %3310 = vmatprep.subr.bf16.mxu0 %v3562_v21  ;;  %v3616_v21 = vld [vmem:[%s3707_s28 + $0x5d0] sm:$0xff]  }
  0x8f   : > { %3303 = vmatpush3.bf16.msra.mxu1 %v3561_v19  ;;  %v3614_v19 = vld [vmem:[%s3707_s28 + $0x550] sm:$0xff]  }
  0x90   : > { %2526 = vmatmul.mubr.bf16.vlgmr.msra.gmra.mxu0 %v705_v16  ;;  %3332 = vmatprep.subr.bf16.mxu1 %v3564_v0  ;;  %v3613_v16 = vld [vmem:[%s3707_s28 + $0x598] sm:$0xff]  }
  0x91   : > { %3311 = vmatpush3.bf16.msra.mxu0 %v3563_v23  ;;  %2605 = vmatprep.mubr.bf16.mxu0 %v710_v20  ;;  %v3615_v20 = vld [vmem:[%s3707_s28 + $0x510] sm:$0xff]   ;;  %v3618_v23 = vld [vmem:[%s3707_s28 + $0x548] sm:$0xff]  }
  0x92   : > { %2566 = vmatmul.mubr.bf16.vlgmr.msra.gmra.mxu1 %v707_v22  ;;  %3312 = vmatprep.subr.bf16.mxu0 %v3566_v14  ;;  %v3617_v22 = vld [vmem:[%s3707_s28 + $0x590] sm:$0xff]   ;;  %v3620_v14 = vld [vmem:[%s3707_s28 + $0x5c8] sm:$0xff]  }
  0x93   : > { %3333 = vmatpush3.bf16.msra.mxu1 %v3565_v42  ;;  %2645 = vmatprep.mubr.bf16.mxu1 %v712_v25  ;;  %v3647_v25 = vmov 269488144   ;;  %v3619_v42 = vld [vmem:[%s3707_s28 + $0x508] sm:$0xff]  }
  0x94   : > { %3334 = vmatprep.subr.bf16.mxu1 %v3568_v54  ;;  %v490_v0 = vunpack.c.l.s4 %v3647_v25 }
  0x95   : > { %3313 = vmatpush3.bf16.msra.mxu0 %v3567_v27 }
  0x96   : > { %3314 = vmatprep.subr.bf16.mxu0 %v3570_v31  ;;  %v491_v27 = vunpack.c.0.s8 %v490_v0 }
  0x97   : > { %3335 = vmatpush3.bf16.msra.mxu1 %v3569_v28  ;;  %v3621_v28 = vld [vmem:[%s3707_s28 + $0x588] sm:$0xff]  }
  0x98   : > { %3336 = vmatprep.subr.bf16.mxu1 %v3572_v33  ;;  %v3623_v33 = vld [vmem:[%s3707_s28 + $0x500] sm:$0xff]  }
  0x99   : > { %3315 = vmatpush3.bf16.msra.mxu0 %v3571_v32  ;;  %v3622_v32 = vld [vmem:[%s3707_s28 + $0x540] sm:$0xff]  }
  0x9a   : > { %3316 = vmatprep.subr.bf16.mxu0 %v3574_v35  ;;  %v3624_v35 = vld [vmem:[%s3707_s28 + $0x5c0] sm:$0xff]  }
  0x9b   : > { %3337 = vmatpush3.bf16.msra.mxu1 %v3573_v34  ;;  %v494_v34 = vsub.s32 %v491_v27, %v3698_v4 }
  0x9c   : > { %3338 = vmatprep.subr.bf16.mxu1 %v3576_v37 }
  0x9d   : > { %3317 = vmatpush3.bf16.msra.mxu0 %v3575_v36  ;;  %v713_v36 = vpack.c.bf16 %v3866_v11, %v3866_v11 }
  0x9e   : > { %3318 = vmatprep.subr.bf16.mxu0 %v3578_v43  ;;  %v715_v43 = vpack.c.bf16 %v3877_v1, %v3877_v1 }
  0x9f   : > { %3339 = vmatpush3.bf16.msra.mxu1 %v3577_v38  ;;  %v3625_v38 = vld [vmem:[%s3707_s28 + $0x580] sm:$0xff]  }
  0xa0   : > { %3340 = vmatprep.subr.bf16.mxu1 %v3580_v45  ;;  %v3633_v45 = vld [vmem:[%s4175_s0 + $0x8] sm:$0xff] }
  0xa1   : > { %3319 = vmatpush3.bf16.msra.mxu0 %v3579_v44  ;;  %v3632_v44 = vld [vmem:[%s4175_s0] sm:$0xff] }
  0xa2   : > { %3320 = vmatprep.subr.bf16.mxu0 %v3582_v10 }
  0xa3   : > { %3341 = vmatpush3.bf16.msra.mxu1 %v3581_v46 }
  0xa4   : > { %3342 = vmatprep.subr.bf16.mxu1 %v3584_v41 }
  0xa5   : > { %3321 = vmatpush3.bf16.msra.mxu0 %v3583_v47 }
  0xa6   : > { %3322 = vmatprep.subr.bf16.mxu0 %v3586_v51  ;;  %v3634_v51 = vld [vmem:[%s4175_s0 + $0x10] sm:$0xff] }
  0xa7   : > { %3343 = vmatpush3.bf16.msra.mxu1 %v3585_v15 }
  0xa8   : > { %3344 = vmatprep.subr.bf16.mxu1 %v3588_v24 }
  0xa9   : > { %3323 = vmatpush3.bf16.msra.mxu0 %v3587_v48 }
  0xaa   : > { %3324 = vmatprep.subr.bf16.mxu0 %v3590_v50 }
  0xab   : > { %3345 = vmatpush3.bf16.msra.mxu1 %v3589_v49 }
  0xac   : > { %3346 = vmatprep.subr.bf16.mxu1 %v3592_v30 }
  0xad   : > { %3325 = vmatpush3.bf16.msra.mxu0 %v3591_v53 }
  0xae   : > { %3354 = vmatprep.subr.bf16.mxu0 %v3594_v58 }
  0xaf   : > { %3347 = vmatpush3.bf16.msra.mxu1 %v3593_v56 }
  0xb0   : > { %2606 = vmatmul.mubr.bf16.vlgmr.msra.gmra.mxu0 %v709_v55  ;;  %3376 = vmatprep.subr.bf16.mxu1 %v3596_v26 }
  0xb1   : > { %3355 = vmatpush3.bf16.msra.mxu0 %v3595_v59  ;;  %2685 = vmatprep.mubr.bf16.mxu0 %v714_v57 }
  0xb2   : > { %2646 = vmatmul.mubr.bf16.vlgmr.msra.gmra.mxu1 %v711_v39  ;;  %3356 = vmatprep.subr.bf16.mxu0 %v3598_v40  ;;  %v3635_v40 = vld [vmem:[%s4175_s0 + $0x18] sm:$0xff] }
  0xb3   : > { %3377 = vmatpush3.bf16.msra.mxu1 %v3597_v2  ;;  %2725 = vmatprep.mubr.bf16.mxu1 %v716_v60 }
  0xb4   : > { %3378 = vmatprep.subr.bf16.mxu1 %v3600_v17 }
  0xb5   : > { %3357 = vmatpush3.bf16.msra.mxu0 %v3599_v18 }
  0xb6   : > { %3358 = vmatprep.subr.bf16.mxu0 %v3602_v29 }
  0xb7   : > { %3379 = vmatpush3.bf16.msra.mxu1 %v3601_v52 }
  0xb8   : > { %3380 = vmatprep.subr.bf16.mxu1 %v3604_v61 }
  0xb9   : > { %3359 = vmatpush3.bf16.msra.mxu0 %v3603_v62 }
  0xba   : > { %3360 = vmatprep.subr.bf16.mxu0 %v3606_v3 }
  0xbb   : > { %3381 = vmatpush3.bf16.msra.mxu1 %v3605_v63 }
  0xbc   : > { %3382 = vmatprep.subr.bf16.mxu1 %v3608_v6 }
  0xbd   : > { %3361 = vmatpush3.bf16.msra.mxu0 %v3607_v5 }
  0xbe   : > { %3362 = vmatprep.subr.bf16.mxu0 %v3610_v9 }
  0xbf   : > { %3383 = vmatpush3.bf16.msra.mxu1 %v3609_v8 }
  0xc0   : > { %3384 = vmatprep.subr.bf16.mxu1 %v3612_v13 }
  0xc1   : > { %3363 = vmatpush3.bf16.msra.mxu0 %v3611_v12 }
  0xc2   : > { %3364 = vmatprep.subr.bf16.mxu0 %v3614_v19 }
  0xc3   : > { %3385 = vmatpush3.bf16.msra.mxu1 %v3613_v16 }
  0xc4   : > { %3386 = vmatprep.subr.bf16.mxu1 %v3616_v21 }
  0xc5   : > { %3365 = vmatpush3.bf16.msra.mxu0 %v3615_v20  ;;  %v3636_v20 = vld [vmem:[%s4175_s0 + $0x20] sm:$0xff] }
  0xc6   : > { %3366 = vmatprep.subr.bf16.mxu0 %v3618_v23 }
  0xc7   : > { %3387 = vmatpush3.bf16.msra.mxu1 %v3617_v22 }
  0xc8   : > { %3388 = vmatprep.subr.bf16.mxu1 %v3620_v14 }
  0xc9   : > { %3367 = vmatpush3.bf16.msra.mxu0 %v3619_v42 }
  0xca   : > { %3368 = vmatprep.subr.bf16.mxu0 %v3622_v32 }
  0xcb   : > { %3389 = vmatpush3.bf16.msra.mxu1 %v3621_v28 }
  0xcc   : > { %3390 = vmatprep.subr.bf16.mxu1 %v3624_v35 }
  0xcd   : > { %3369 = vmatpush3.bf16.msra.mxu0 %v3623_v33 }
  0xce   : > { %v486_v54 = vpop.xlane.xlu0 %485 }
  0xcf   : > { %v4078_v31 = vmul.f32 0.00032552084, %v486_v54  ;;  %3391 = vmatpush3.bf16.msra.mxu1 %v3625_v38 }
  0xd0   : > { %2686 = vmatmul.mubr.bf16.vlgmr.msra.gmra.mxu0 %v713_v36  ;;  %v3637_v36 = vld [vmem:[%s4175_s0 + $0x28] sm:$0xff] }
  0xd1   : > { %v4087_v37 = vrot.slane %v4078_v31, %v494_v34 }
  0xd2   : > { %2726 = vmatmul.mubr.bf16.vlgmr.msra.gmra.mxu1 %v715_v43 }
  0xd3   : > { %v497_v4 = vsub.f32 %v3632_v44, %v4087_v37  ;;  %v498_v11 = vsub.f32 %v3633_v45, %v4087_v37  ;;  %v499_v48 = vsub.f32 %v3634_v51, %v4087_v37  ;;  %v500_v18 = vsub.f32 %v3635_v40, %v4087_v37 }
  0xd4   : > { %v501_v21 = vsub.f32 %v3636_v20, %v4087_v37  ;;  %v502_v38 = vsub.f32 %v3637_v36, %v4087_v37  ;;  %v3628_v36 = vld [vmem:[%s293_s8 + $0x8] sm:$0xff]  }
  0xd5   : > { %v503_v46 = vmul.f32 %v497_v4, %v497_v4  ;;  %v504_v10 = vmul.f32 %v498_v11, %v498_v11  ;;  %v505_v58 = vmul.f32 %v499_v48, %v499_v48  ;;  %v506_v6 = vmul.f32 %v500_v18, %v500_v18 }
  0xd6   : > { %v507_v54 = vmul.f32 %v501_v21, %v501_v21 }
  0xd7   : > { %v515_v47 = vcombine.high %v503_v46, %v503_v46  ;;  %v522_v1 = vrot.slane %v503_v46, %v3702_v7  ;;  %v532_v24 = vcombine.high %v504_v10, %v504_v10  ;;  %v539_v50 = vrot.slane %v504_v10, %v3702_v7 }
  0xd8   : > { %v549_v29 = vcombine.high %v505_v58, %v505_v58  ;;  %v556_v62 = vrot.slane %v505_v58, %v3702_v7  ;;  %v566_v23 = vcombine.high %v506_v6, %v506_v6  ;;  %v573_v25 = vrot.slane %v506_v6, %v3702_v7 }
  0xd9   : > { %v529_v41 = vrot.slane %v515_v47, %v3702_v7  ;;  %v530_v15 = vcombine.high %v522_v1, %v522_v1  ;;  %v641_v53 = vsel %vm437_vm0, %v522_v1, 0.0  ;;  %v546_v39 = vrot.slane %v532_v24, %v3702_v7 }
  0xda   : > { %v547_v59 = vcombine.high %v539_v50, %v539_v50  ;;  %v648_v2 = vsel %vm437_vm0, %v539_v50, 0.0  ;;  %v563_v8 = vrot.slane %v549_v29, %v3702_v7  ;;  %v564_v9 = vcombine.high %v556_v62, %v556_v62 }
  0xdb   : > { %v531_v49 = vcombine.high %v529_v41, %v529_v41  ;;  %v642_v30 = vsel %vm437_vm0, %v530_v15, 0.0  ;;  %v644_v56 = vsel %vm437_vm0, %v529_v41, 0.0  ;;  %v548_v52 = vcombine.high %v546_v39, %v546_v39 }
  0xdc   : > { %v643_v55 = vadd.f32 %v642_v30, %v641_v53  ;;  %v650_v61 = vsel %vm437_vm0, %v547_v59, 0.0  ;;  %v652_v3 = vsel %vm437_vm0, %v546_v39, 0.0  ;;  %v656_v16 = vsel %vm437_vm0, %v556_v62, 0.0 }
  0xdd   : > { %v646_v60 = vsel %vm437_vm0, %v531_v49, 0.0  ;;  %v654_v12 = vsel %vm437_vm0, %v548_v52, 0.0  ;;  %v565_v22 = vcombine.high %v563_v8, %v563_v8  ;;  %v658_v0 = vsel %vm437_vm0, %v564_v9, 0.0 }
  0xde   : > { %v645_v57 = vadd.f32 %v644_v56, %v643_v55  ;;  %v660_v14 = vsel %vm437_vm0, %v563_v8, 0.0  ;;  %v580_v28 = vrot.slane %v566_v23, %v3702_v7  ;;  %v581_v32 = vcombine.high %v573_v25, %v573_v25 }
  0xdf   : > { %v662_v33 = vsel %vm437_vm0, %v565_v22, 0.0  ;;  %v664_v35 = vsel %vm437_vm0, %v573_v25, 0.0  ;;  %v583_v45 = vcombine.high %v507_v54, %v507_v54  ;;  %v590_v11 = vrot.slane %v507_v54, %v3702_v7 }
  0xe0   : > { %v647_v26 = vadd.f32 %v646_v60, %v645_v57  ;;  %v582_v4 = vcombine.high %v580_v28, %v580_v28  ;;  %v666_v46 = vsel %vm437_vm0, %v581_v32, 0.0  ;;  %v668_v41 = vsel %vm437_vm0, %v580_v28, 0.0 }
  0xe1   : > { %v508_v49 = vmul.f32 %v502_v38, %v502_v38  ;;  %v597_v37 = vrot.slane %v583_v45, %v3702_v7  ;;  %v598_v50 = vcombine.high %v590_v11, %v590_v11  ;;  %v672_v58 = vsel %vm437_vm0, %v590_v11, 0.0  ;;  %v3629_v45 = vld [vmem:[%s293_s8] sm:$0xff]  }
  0xe2   : > { %v649_v17 = vadd.f32 %v648_v2, %v647_v26  ;;  %v670_v53 = vsel %vm437_vm0, %v582_v4, 0.0 }
  0xe3   : > { %v599_v26 = vcombine.high %v597_v37, %v597_v37  ;;  %v600_v2 = vcombine.high %v508_v49, %v508_v49  ;;  %v607_v40 = vrot.slane %v508_v49, %v3702_v7  ;;  %v674_v18 = vsel %vm437_vm0, %v598_v50, 0.0 }
  0xe4   : > { %v651_v63 = vadd.f32 %v650_v61, %v649_v17  ;;  %v676_v52 = vsel %vm437_vm0, %v597_v37, 0.0 }
  0xe5   : > { %v614_v62 = vrot.slane %v600_v2, %v3702_v7  ;;  %v615_v61 = vcombine.high %v607_v40, %v607_v40 }
  0xe6   : > { %v653_v5 = vadd.f32 %v652_v3, %v651_v63  ;;  %v678_v63 = vsel %vm437_vm0, %v599_v26, 0.0 }
  0xe7   : > { %v616_v8 = vcombine.high %v614_v62, %v614_v62  ;;  %v682_v9 = vsel %vm437_vm0, %v615_v61, 0.0 }
  0xe8   : > { %v655_v13 = vadd.f32 %v654_v12, %v653_v5  ;;  %v680_v5 = vsel %vm437_vm0, %v607_v40, 0.0 }
  0xea   : > { %v657_v19 = vadd.f32 %v656_v16, %v655_v13  ;;  %v684_v13 = vsel %vm437_vm0, %v614_v62, 0.0 }
  0xec   : > { %v659_v42 = vadd.f32 %v658_v0, %v657_v19  ;;  %v686_v19 = vsel %vm437_vm0, %v616_v8, 0.0 }
  0xee   : > { %v661_v27 = vadd.f32 %v660_v14, %v659_v42 }
  0xf0   : > { %v663_v34 = vadd.f32 %v662_v33, %v661_v27  ;;  %v3150_v44 = vpop.f32.mrf.mxu0  ;;  %v3626_v33 = vld [vmem:[%s293_s8 + $0x18] sm:$0xff]  }
  0xf2   : > { %v665_v43 = vadd.f32 %v664_v35, %v663_v34  ;;  %v3151_v47 = vpop.f32.mrf.mxu0  ;;  %v3172_v1 = vpop.f32.mrf.mxu1  ;;  %v3648_v34 = vmov 0.0   ;;  %v3627_v35 = vld [vmem:[%s293_s8 + $0x10] sm:$0xff]  }
  0xf3   : > { %v3152_v15 = vadd.f32 %v3151_v47, %v3150_v44  ;;  %3403 = vmatprep.subr.bf16.mxu0 %v3648_v34  ;;  %3411 = vmatprep.mubr.msk.bf16.mxu0 %vm3649_vm1, %v3648_v34 }
  0xf4   : > { %v667_v10 = vadd.f32 %v666_v46, %v665_v43  ;;  %v3153_v48 = vpop.f32.mrf.mxu0  ;;  %v3173_v24 = vpop.f32.mrf.mxu1  ;;  %3404 = vmatpush3.bf16.msra.mxu0 %v3626_v33 }
  0xf5   : > { %v3174_v30 = vadd.f32 %v3173_v24, %v3172_v1  ;;  %3405 = vmatprep.subr.bf16.mxu0 %v3648_v34 }
  0xf6   : > { %v669_v51 = vadd.f32 %v668_v41, %v667_v10  ;;  %v3154_v56 = vpop.f32.mrf.mxu0  ;;  %v3175_v57 = vpop.f32.mrf.mxu1 }
  0xf7   : > { %v2328_v39 = vadd.f32 %v3174_v30, %v3152_v15 }
  0xf8   : > { %v671_v55 = vadd.f32 %v670_v53, %v669_v51  ;;  %v3176_v60 = vpop.f32.mrf.mxu1  ;;  %3406 = vmatpush3.bf16.msra.mxu0 %v3627_v35 }
  0xf9   : > { %3407 = vmatprep.subr.bf16.mxu0 %v3648_v34 }
  0xfa   : > { %v673_v59 = vadd.f32 %v672_v58, %v671_v55 }
  0xfc   : > { %v675_v17 = vadd.f32 %v674_v18, %v673_v59  ;;  %3408 = vmatpush3.bf16.msra.mxu0 %v3628_v36  ;;  %v3125_v36 = vld [vmem:[%s4180_s5] ss:$0 sm:$0xff] }
  0xfd   : > { %3409 = vmatprep.subr.bf16.mxu0 %v3648_v34 }
  0xfe   : > { %v677_v29 = vadd.f32 %v676_v52, %v675_v17 }
 0x100   : > { %v679_v3 = vadd.f32 %v678_v63, %v677_v29  ;;  %3410 = vmatpush3.bf16.msra.mxu0 %v3629_v45 }
 0x102   : > { %v681_v6 = vadd.f32 %v680_v5, %v679_v3 }
 0x104   : > { %v683_v12 = vadd.f32 %v682_v9, %v681_v6 }
 0x106   : > { %v685_v16 = vadd.f32 %v684_v13, %v683_v12 }
 0x108   : > { %v687_v20 = vadd.f32 %v686_v19, %v685_v16 }
 0x10a   : > { %688 = vadd.xlane.f32.xlu0 %v687_v20 }
 0x110   : > { %v3194_v7 = vpop.f32.mrf.mxu0 }
 0x112   : > { %v3195_v21 = vpop.f32.mrf.mxu0  ;;  %v3216_v22 = vpop.f32.mrf.mxu1 }
 0x113   : > { %v3196_v23 = vadd.f32 %v3195_v21, %v3194_v7 }
 0x114   : > { %v3217_v25 = vpop.f32.mrf.mxu1  ;;  %v3197_v0 = vpop.f32.mrf.mxu0 }
 0x115   : > { %v2368_v42 = vadd.f32 %v3196_v23, %v2328_v39  ;;  %v3218_v14 = vadd.f32 %v3217_v25, %v3216_v22  ;;  %v3123_v0 = vld [vmem:[%s285_s11] ss:$0 sm:$0xff] }
 0x116   : > { %v3198_v27 = vpop.f32.mrf.mxu0  ;;  %v3219_v54 = vpop.f32.mrf.mxu1 }
 0x117   : > { %v2408_v28 = vadd.f32 %v3218_v14, %v2368_v42 }
 0x118   : > { %v3220_v32 = vpop.f32.mrf.mxu1 }
 0x130   : > { %v3238_v38 = vpop.f32.mrf.mxu0 }
 0x132   : > { %v3239_v43 = vpop.f32.mrf.mxu0  ;;  %v3260_v44 = vpop.f32.mrf.mxu1 }
 0x133   : > { %v3240_v4 = vadd.f32 %v3239_v43, %v3238_v38 }
 0x134   : > { %v3261_v11 = vpop.f32.mrf.mxu1  ;;  %v3241_v46 = vpop.f32.mrf.mxu0 }
 0x135   : > { %v2448_v10 = vadd.f32 %v3240_v4, %v2408_v28  ;;  %v3262_v47 = vadd.f32 %v3261_v11, %v3260_v44  ;;  %v3124_v28 = vld [vmem:[%s288_s14] ss:$0 sm:$0xff] }
 0x136   : > { %v3242_v1 = vpop.f32.mrf.mxu0  ;;  %v3263_v41 = vpop.f32.mrf.mxu1 }
 0x137   : > { %v2488_v15 = vadd.f32 %v3262_v47, %v2448_v10 }
 0x138   : > { %v3264_v51 = vpop.f32.mrf.mxu1 }
 0x150   : > { %v3282_v48 = vpop.f32.mrf.mxu0 }
 0x152   : > { %v3283_v24 = vpop.f32.mrf.mxu0  ;;  %v3304_v49 = vpop.f32.mrf.mxu1 }
 0x153   : > { %v3284_v37 = vadd.f32 %v3283_v24, %v3282_v48 }
 0x154   : > { %v3305_v50 = vpop.f32.mrf.mxu1  ;;  %v3285_v53 = vpop.f32.mrf.mxu0 }
 0x155   : > { %v2528_v30 = vadd.f32 %v3284_v37, %v2488_v15  ;;  %v3306_v55 = vadd.f32 %v3305_v50, %v3304_v49 }
 0x156   : > { %v3286_v56 = vpop.f32.mrf.mxu0  ;;  %v3307_v57 = vpop.f32.mrf.mxu1 }
 0x157   : > { %v2568_v58 = vadd.f32 %v3306_v55, %v2528_v30 }
 0x158   : > { %v3308_v39 = vpop.f32.mrf.mxu1 }
 0x170   : > { %v3326_v59 = vpop.f32.mrf.mxu0 }
 0x172   : > { %v3327_v60 = vpop.f32.mrf.mxu0  ;;  %v3348_v26 = vpop.f32.mrf.mxu1 }
 0x173   : > { %v3328_v6 = vadd.f32 %v3327_v60, %v3326_v59 }
 0x174   : > { %v3349_v2 = vpop.f32.mrf.mxu1  ;;  %v3329_v40 = vpop.f32.mrf.mxu0 }
 0x175   : > { %v2608_v16 = vadd.f32 %v3328_v6, %v2568_v58  ;;  %v3350_v19 = vadd.f32 %v3349_v2, %v3348_v26 }
 0x176   : > { %v3330_v18 = vpop.f32.mrf.mxu0  ;;  %v3351_v17 = vpop.f32.mrf.mxu1 }
 0x177   : > { %v2648_v21 = vadd.f32 %v3350_v19, %v2608_v16 }
 0x178   : > { %v3352_v52 = vpop.f32.mrf.mxu1 }
 0x190   : > { %v3370_v61 = vpop.f32.mrf.mxu0 }
 0x192   : > { %v3371_v3 = vpop.f32.mrf.mxu0  ;;  %v3392_v5 = vpop.f32.mrf.mxu1 }
 0x193   : > { %v689_v29 = vpop.xlane.xlu0 %688  ;;  %v3372_v7 = vadd.f32 %v3371_v3, %v3370_v61 }
 0x194   : > { %v690_v62 = vmul.f32 0.00032552084, %v689_v29  ;;  %v3393_v8 = vpop.f32.mrf.mxu1  ;;  %v3373_v9 = vpop.f32.mrf.mxu0 }
 0x195   : > { %v2688_v22 = vadd.f32 %v3372_v7, %v2648_v21  ;;  %v3394_v23 = vadd.f32 %v3393_v8, %v3392_v5 }
 0x196   : > { %v691_v63 = vadd.f32 1e-05, %v690_v62  ;;  %v3374_v12 = vpop.f32.mrf.mxu0  ;;  %v3395_v13 = vpop.f32.mrf.mxu1 }
 0x197   : > { %v2728_v42 = vadd.f32 %v3394_v23, %v2688_v22 }
 0x198   : > { %3630 = vrsqrt.f32 %v691_v63  ;;  %v3396_v20 = vpop.f32.mrf.mxu1 }
 0x1a5   : > { %v3631_v25 = vpop.eup %3630 }
 0x1a6   : > { %v2734_v14 = vmul.f32 %v3631_v25, %v4078_v31  ;;  %v2733_v27 = vmul.f32 %v3631_v25, %v2728_v42 }
 0x1a8   : > { %v2742_v54 = vmul.f32 %v3123_v0, %v2734_v14 }
 0x1aa   : > { %v2743_v32 = vsub.f32 %v2733_v27, %v2742_v54 }
 0x1ac   : > { %v2751_v33 = vadd.f32 %v3124_v28, %v2743_v32 }
 0x1ae   : > { %v2752_v34 = vmax.f32 %v2751_v33, 0.0 }
 0x1b0   : > { %v2753_v35 = vpack.c.bf16 %v2752_v34, %v2752_v34 }
 0x1b2   : > { %3412 = vmatmul.mubr.msk.bf16.vlgmr.msra.gmra.mxu0 %vm2793_vm2, %v2753_v35 }
 0x272   : > { %v2831_v38 = vpop.f32.mrf.mxu0 }
 0x273   : > { %v2832_v31 = vadd.f32 %v3125_v36, %v2831_v38 }
 0x274   : > { %v3413_v43 = vpop.f32.mrf.mxu0 }
 0x275   : > { %2838 = vst.msk [vmem:[%s297_s20] sm:$0x3] %vm2837_vm3, %v2832_v31 }
 0x276   : > { %v2834_v44 = vpop.f32.mrf.mxu0 }
 0x278   : > { %v3414_v4 = vpop.f32.mrf.mxu0 }
 0x279 PF: > { %s16_s21 = sadd.s32 1, %s3644_s21  }
 0x27a   : > { %p13_p4 = scmp.ge.s32.totalorder %s16_s21, 4  }
 0x27c   :  { %15 = sbr.rel (!%p13_p4) target bundleno = 1 (0x1), region = 83 }

</bundles_post_ra>
